<compile_context>
chip_gen: v6e
topology: v6e:2x2x1
jax: 0.10.0
libtpu: 0.0.40
codegen_flags: <defaults>
</compile_context>

<pallas_src>
import functools

import jax
import jax.numpy as jnp
from jax.experimental import pallas as pl
from jax.experimental.pallas import tpu as pltpu

IN_FEAT = 600
PADDED_IN = 640                      # 600 rounded up to a multiple of 128
DIMS = [IN_FEAT, 1024, 512, 512, 2]
BN_EPS = 1e-5


def _round_up(x, m):
    return (x + m - 1) // m * m


def _fused_mlp_kernel(is_test,
                      x_ref,
                      w1_ref, b1_ref,
                      w2_ref, b2_ref,
                      w3_ref, b3_ref,
                      w4_ref, b4_ref,
                      o_ref):
    # layer1 (BN already folded into w1/b1): Linear -> ReLU.  bf16 in, f32 acc.
    h = jnp.dot(x_ref[...], w1_ref[...],
                preferred_element_type=jnp.float32) + b1_ref[...]
    h = jnp.maximum(h, 0.0).astype(jnp.bfloat16)

    # layer2
    h = jnp.dot(h, w2_ref[...],
                preferred_element_type=jnp.float32) + b2_ref[...]
    h = jnp.maximum(h, 0.0).astype(jnp.bfloat16)

    # layer3
    h = jnp.dot(h, w3_ref[...],
                preferred_element_type=jnp.float32) + b3_ref[...]
    h = jnp.maximum(h, 0.0).astype(jnp.bfloat16)

    # layer4 (no ReLU)
    h = jnp.dot(h, w4_ref[...],
                preferred_element_type=jnp.float32) + b4_ref[...]

    if is_test:
        # F.softmax(x) on a 2-D tensor defaults to dim=1 (class axis); f32 math.
        m = jnp.max(h, axis=-1, keepdims=True)
        e = jnp.exp(h - m)
        h = e * pl.reciprocal(jnp.sum(e, axis=-1, keepdims=True), approx=False)

    o_ref[...] = h.astype(o_ref.dtype)


def _fold_and_pack_params(params):
    """Fold eval-mode BatchNorm1d into each Linear (in f32), pad layer-1 K to
    PADDED_IN, cast weights to bf16.  Returns the flat kernel operand list."""
    packed = []
    for li in range(1, 5):
        gamma = params[f"bn{li}_gamma"]
        beta = params[f"bn{li}_beta"]
        mean = params[f"bn{li}_mean"]
        var = params[f"bn{li}_var"]
        w = params[f"fc{li}_w"]          # (in, out) == torch weight.T
        bias = params[f"fc{li}_b"]       # (out,)

        # y = ((x - mean) * rsqrt(var+eps) * gamma + beta) @ w + bias
        #   = x @ (scale[:,None] * w) + (bias + shift @ w)          (f32 fold)
        scale = gamma * jax.lax.rsqrt(var + BN_EPS)
        shift = beta - mean * scale
        w_f = w * scale[:, None]
        b_f = bias + shift @ w

        if li == 1:
            # zero-pad K: 600 -> 640 (matching zero-padded x columns)
            w_f = jnp.pad(w_f, ((0, PADDED_IN - IN_FEAT), (0, 0)))

        packed.append(w_f.astype(jnp.bfloat16))
        packed.append(b_f.reshape(1, -1).astype(jnp.float32))
    return packed


@functools.partial(jax.jit, static_argnames=("is_test",))
def my_net_forward(x, params, is_test):
    """x: (B, 600) f32.  params: dict of per-layer BN + Linear tensors."""
    b = x.shape[0]
    weights = _fold_and_pack_params(params)

    # Batch tiling: a single block for small batches, 512-row tiles for large
    # ones (pipelined x/out DMA; weights stay resident across grid steps).
    tb = _round_up(b, 8) if b <= 512 else 512
    b_pad = _round_up(b, tb)

    x_p = jnp.pad(
        x, ((0, b_pad - b), (0, PADDED_IN - IN_FEAT))).astype(jnp.bfloat16)

    grid = (b_pad // tb,)

    def _const(i):
        return (0, 0)

    in_specs = [pl.BlockSpec((tb, PADDED_IN), lambda i: (i, 0))]
    for w in weights:
        in_specs.append(pl.BlockSpec(w.shape, _const))
    out_spec = pl.BlockSpec((tb, DIMS[-1]), lambda i: (i, 0))

    # Cost / VMEM accounting (all static Python ints).
    layer_kn = list(zip([PADDED_IN, DIMS[1], DIMS[2], DIMS[3]], DIMS[1:]))
    flops = 2 * b_pad * sum(k * n for k, n in layer_kn)
    param_bytes = sum(w.size * w.dtype.itemsize for w in weights)
    io_tile_bytes = tb * PADDED_IN * 2 + tb * DIMS[-1] * 4
    act_bytes = 6 * tb * (DIMS[1] + DIMS[2] + DIMS[3])     # f32 + bf16 copies
    vmem_limit = int(min(param_bytes + 2 * io_tile_bytes + act_bytes + (8 << 20),
                         48 << 20))
    bytes_accessed = int(param_bytes + x_p.size * 2 + b_pad * DIMS[-1] * 4)

    out = pl.pallas_call(
        functools.partial(_fused_mlp_kernel, bool(is_test)),
        out_shape=jax.ShapeDtypeStruct((b_pad, DIMS[-1]), jnp.float32),
        grid=grid,
        in_specs=in_specs,
        out_specs=out_spec,
        compiler_params=pltpu.CompilerParams(
            dimension_semantics=("parallel",),
            vmem_limit_bytes=vmem_limit),
        cost_estimate=pl.CostEstimate(
            flops=flops,
            transcendentals=(b_pad * DIMS[-1]) if is_test else 0,
            bytes_accessed=bytes_accessed),
    )(x_p, *weights)
    return out[:b]


def init_params(key):
    params = {}
    for li in range(1, 5):
        fan_in, fan_out = DIMS[li - 1], DIMS[li]
        key, k_w, k_b, k_g, k_be, k_m, k_v = jax.random.split(key, 7)
        bound = 1.0 / jnp.sqrt(fan_in)
        # Linear weights stored as (in, out) for the kernel (= torch weight.T).
        params[f"fc{li}_w"] = jax.random.uniform(
            k_w, (fan_in, fan_out), jnp.float32, -bound, bound)
        params[f"fc{li}_b"] = jax.random.uniform(
            k_b, (fan_out,), jnp.float32, -bound, bound)
        # BatchNorm1d affine + running stats (deterministic synthetic values).
        params[f"bn{li}_gamma"] = 1.0 + 0.1 * jax.random.normal(
            k_g, (fan_in,), jnp.float32)
        params[f"bn{li}_beta"] = 0.1 * jax.random.normal(
            k_be, (fan_in,), jnp.float32)
        params[f"bn{li}_mean"] = 0.1 * jax.random.normal(
            k_m, (fan_in,), jnp.float32)
        params[f"bn{li}_var"] = 1.0 + 0.1 * jax.random.uniform(
            k_v, (fan_in,), jnp.float32)
    return params


if __name__ == "__main__":
    key = jax.random.PRNGKey(0)
    key, k_x = jax.random.split(key)
    params = init_params(key)

    batch = 8
    x = jax.random.normal(k_x, (batch, IN_FEAT), jnp.float32)

    # isTest=True path (includes softmax over the 2 classes).
    out = my_net_forward(x, params, is_test=True)
    jax.block_until_ready(out)
    assert out.shape == (batch, 2)
    # softmax rows should sum to ~1
    assert bool(jnp.all(jnp.abs(jnp.sum(out, axis=-1) - 1.0) < 1e-3))

    # isTest=False path (raw logits).
    logits = my_net_forward(x, params, is_test=False)
    jax.block_until_ready(logits)
    assert logits.shape == (batch, 2)

    print("KERNEL_OK")
</pallas_src>

<mosaic_0001>
module attributes {stable_mosaic.version = 11 : i64} {
  func.func @_fused_mlp_kernel(%arg0: i32, %arg1: memref<8x640xbf16, #tpu.memory_space<vmem>>, %arg2: memref<640x1024xbf16, #tpu.memory_space<vmem>>, %arg3: memref<1x1024xf32, #tpu.memory_space<vmem>>, %arg4: memref<1024x512xbf16, #tpu.memory_space<vmem>>, %arg5: memref<1x512xf32, #tpu.memory_space<vmem>>, %arg6: memref<512x512xbf16, #tpu.memory_space<vmem>>, %arg7: memref<1x512xf32, #tpu.memory_space<vmem>>, %arg8: memref<512x2xbf16, #tpu.memory_space<vmem>>, %arg9: memref<1x2xf32, #tpu.memory_space<vmem>>, %arg10: memref<8x2xf32, #tpu.memory_space<vmem>>) attributes {dimension_semantics = [#tpu.dimension_semantics<parallel>], iteration_bounds = array<i64: 1>, scalar_prefetch = 0 : i64, scratch_operands = 0 : i64, tpu.core_type = #tpu.core_type<tc>, window_params = [{transform_indices = @transform_0, window_bounds = array<i64: 8, 640>}, {pipeline_mode = #tpu.pipeline_mode<synchronous>, transform_indices = @transform_1, window_bounds = array<i64: 640, 1024>}, {pipeline_mode = #tpu.pipeline_mode<synchronous>, transform_indices = @transform_2, window_bounds = array<i64: 1, 1024>}, {pipeline_mode = #tpu.pipeline_mode<synchronous>, transform_indices = @transform_3, window_bounds = array<i64: 1024, 512>}, {pipeline_mode = #tpu.pipeline_mode<synchronous>, transform_indices = @transform_4, window_bounds = array<i64: 1, 512>}, {pipeline_mode = #tpu.pipeline_mode<synchronous>, transform_indices = @transform_5, window_bounds = array<i64: 512, 512>}, {pipeline_mode = #tpu.pipeline_mode<synchronous>, transform_indices = @transform_6, window_bounds = array<i64: 1, 512>}, {pipeline_mode = #tpu.pipeline_mode<synchronous>, transform_indices = @transform_7, window_bounds = array<i64: 512, 2>}, {pipeline_mode = #tpu.pipeline_mode<synchronous>, transform_indices = @transform_8, window_bounds = array<i64: 1, 2>}, {transform_indices = @transform_9, window_bounds = array<i64: 8, 2>}]} {
    %c0 = arith.constant 0 : index
    %c0_0 = arith.constant 0 : index
    %0 = vector.load %arg1[%c0, %c0_0] : memref<8x640xbf16, #tpu.memory_space<vmem>>, vector<8x640xbf16>
    %c0_1 = arith.constant 0 : index
    %c0_2 = arith.constant 0 : index
    %1 = vector.load %arg2[%c0_1, %c0_2] : memref<640x1024xbf16, #tpu.memory_space<vmem>>, vector<640x1024xbf16>
    %cst = arith.constant dense<0.000000e+00> : vector<8x1024xf32>
    %2 = tpu.matmul %0, %1, %cst {dimension_numbers = #tpu.dot_dimension_numbers<[1], [0], [0], [1], [0, 0, 1, 1], [], []>} : vector<8x640xbf16>, vector<640x1024xbf16>, vector<8x1024xf32> -> vector<8x1024xf32>
    %c0_3 = arith.constant 0 : index
    %c0_4 = arith.constant 0 : index
    %3 = vector.load %arg3[%c0_3, %c0_4] : memref<1x1024xf32, #tpu.memory_space<vmem>>, vector<1x1024xf32>
    %4 = vector.broadcast %3 : vector<1x1024xf32> to vector<8x1024xf32>
    %5 = arith.addf %2, %4 : vector<8x1024xf32>
    %cst_5 = arith.constant 0.000000e+00 : f32
    %6 = vector.broadcast %cst_5 : f32 to vector<8x1024xf32>
    %7 = arith.maximumf %5, %6 : vector<8x1024xf32>
    %8 = arith.truncf %7 : vector<8x1024xf32> to vector<8x1024xbf16>
    %c0_6 = arith.constant 0 : index
    %c0_7 = arith.constant 0 : index
    %9 = vector.load %arg4[%c0_6, %c0_7] : memref<1024x512xbf16, #tpu.memory_space<vmem>>, vector<1024x512xbf16>
    %cst_8 = arith.constant dense<0.000000e+00> : vector<8x512xf32>
    %10 = tpu.matmul %8, %9, %cst_8 {dimension_numbers = #tpu.dot_dimension_numbers<[1], [0], [0], [1], [0, 0, 1, 1], [], []>} : vector<8x1024xbf16>, vector<1024x512xbf16>, vector<8x512xf32> -> vector<8x512xf32>
    %c0_9 = arith.constant 0 : index
    %c0_10 = arith.constant 0 : index
    %11 = vector.load %arg5[%c0_9, %c0_10] : memref<1x512xf32, #tpu.memory_space<vmem>>, vector<1x512xf32>
    %12 = vector.broadcast %11 : vector<1x512xf32> to vector<8x512xf32>
    %13 = arith.addf %10, %12 : vector<8x512xf32>
    %cst_11 = arith.constant 0.000000e+00 : f32
    %14 = vector.broadcast %cst_11 : f32 to vector<8x512xf32>
    %15 = arith.maximumf %13, %14 : vector<8x512xf32>
    %16 = arith.truncf %15 : vector<8x512xf32> to vector<8x512xbf16>
    %c0_12 = arith.constant 0 : index
    %c0_13 = arith.constant 0 : index
    %17 = vector.load %arg6[%c0_12, %c0_13] : memref<512x512xbf16, #tpu.memory_space<vmem>>, vector<512x512xbf16>
    %cst_14 = arith.constant dense<0.000000e+00> : vector<8x512xf32>
    %18 = tpu.matmul %16, %17, %cst_14 {dimension_numbers = #tpu.dot_dimension_numbers<[1], [0], [0], [1], [0, 0, 1, 1], [], []>} : vector<8x512xbf16>, vector<512x512xbf16>, vector<8x512xf32> -> vector<8x512xf32>
    %c0_15 = arith.constant 0 : index
    %c0_16 = arith.constant 0 : index
    %19 = vector.load %arg7[%c0_15, %c0_16] : memref<1x512xf32, #tpu.memory_space<vmem>>, vector<1x512xf32>
    %20 = vector.broadcast %19 : vector<1x512xf32> to vector<8x512xf32>
    %21 = arith.addf %18, %20 : vector<8x512xf32>
    %cst_17 = arith.constant 0.000000e+00 : f32
    %22 = vector.broadcast %cst_17 : f32 to vector<8x512xf32>
    %23 = arith.maximumf %21, %22 : vector<8x512xf32>
    %24 = arith.truncf %23 : vector<8x512xf32> to vector<8x512xbf16>
    %c0_18 = arith.constant 0 : index
    %c0_19 = arith.constant 0 : index
    %25 = vector.load %arg8[%c0_18, %c0_19] : memref<512x2xbf16, #tpu.memory_space<vmem>>, vector<512x2xbf16>
    %cst_20 = arith.constant dense<0.000000e+00> : vector<8x2xf32>
    %26 = tpu.matmul %24, %25, %cst_20 {dimension_numbers = #tpu.dot_dimension_numbers<[1], [0], [0], [1], [0, 0, 1, 1], [], []>} : vector<8x512xbf16>, vector<512x2xbf16>, vector<8x2xf32> -> vector<8x2xf32>
    %c0_21 = arith.constant 0 : index
    %c0_22 = arith.constant 0 : index
    %27 = vector.load %arg9[%c0_21, %c0_22] : memref<1x2xf32, #tpu.memory_space<vmem>>, vector<1x2xf32>
    %28 = vector.broadcast %27 : vector<1x2xf32> to vector<8x2xf32>
    %29 = arith.addf %26, %28 : vector<8x2xf32>
    %cst_23 = arith.constant dense<0xFF800000> : vector<8xf32>
    %30 = vector.multi_reduction <maximumf>, %29, %cst_23 [1] : vector<8x2xf32> to vector<8xf32>
    %31 = vector.shape_cast %30 : vector<8xf32> to vector<8x1xf32>
    %32 = vector.broadcast %31 : vector<8x1xf32> to vector<8x2xf32>
    %33 = arith.subf %29, %32 : vector<8x2xf32>
    %34 = math.exp %33 : vector<8x2xf32>
    %cst_24 = arith.constant dense<0.000000e+00> : vector<8xf32>
    %35 = vector.multi_reduction <add>, %34, %cst_24 [1] : vector<8x2xf32> to vector<8xf32>
    %36 = vector.shape_cast %35 : vector<8xf32> to vector<8x1xf32>
    %37 = tpu.reciprocal %36 : vector<8x1xf32> -> vector<8x1xf32>
    %38 = vector.broadcast %37 : vector<8x1xf32> to vector<8x2xf32>
    %39 = arith.mulf %34, %38 : vector<8x2xf32>
    %c0_25 = arith.constant 0 : index
    %c0_26 = arith.constant 0 : index
    %40 = vector.load %arg10[%c0_25, %c0_26] : memref<8x2xf32, #tpu.memory_space<vmem>>, vector<8x2xf32>
    tpu.vector_store %arg10[%c0_25, %c0_26], %39 {strides = array<i32>} : memref<8x2xf32, #tpu.memory_space<vmem>>, vector<8x2xf32>,
    return
  }
  func.func @transform_0(%arg0: i32) -> (i32, i32) {
    %c0_i32 = arith.constant 0 : i32
    %c0_i32_0 = arith.constant 0 : i32
    return %arg0, %c0_i32 : i32, i32
  }
  func.func @transform_1(%arg0: i32) -> (i32, i32) {
    %c0_i32 = arith.constant 0 : i32
    %c0_i32_0 = arith.constant 0 : i32
    %c0_i32_1 = arith.constant 0 : i32
    return %c0_i32, %c0_i32_0 : i32, i32
  }
  func.func @transform_2(%arg0: i32) -> (i32, i32) {
    %c0_i32 = arith.constant 0 : i32
    %c0_i32_0 = arith.constant 0 : i32
    %c0_i32_1 = arith.constant 0 : i32
    return %c0_i32, %c0_i32_0 : i32, i32
  }
  func.func @transform_3(%arg0: i32) -> (i32, i32) {
    %c0_i32 = arith.constant 0 : i32
    %c0_i32_0 = arith.constant 0 : i32
    %c0_i32_1 = arith.constant 0 : i32
    return %c0_i32, %c0_i32_0 : i32, i32
  }
  func.func @transform_4(%arg0: i32) -> (i32, i32) {
    %c0_i32 = arith.constant 0 : i32
    %c0_i32_0 = arith.constant 0 : i32
    %c0_i32_1 = arith.constant 0 : i32
    return %c0_i32, %c0_i32_0 : i32, i32
  }
  func.func @transform_5(%arg0: i32) -> (i32, i32) {
    %c0_i32 = arith.constant 0 : i32
    %c0_i32_0 = arith.constant 0 : i32
    %c0_i32_1 = arith.constant 0 : i32
    return %c0_i32, %c0_i32_0 : i32, i32
  }
  func.func @transform_6(%arg0: i32) -> (i32, i32) {
    %c0_i32 = arith.constant 0 : i32
    %c0_i32_0 = arith.constant 0 : i32
    %c0_i32_1 = arith.constant 0 : i32
    return %c0_i32, %c0_i32_0 : i32, i32
  }
  func.func @transform_7(%arg0: i32) -> (i32, i32) {
    %c0_i32 = arith.constant 0 : i32
    %c0_i32_0 = arith.constant 0 : i32
    %c0_i32_1 = arith.constant 0 : i32
    return %c0_i32, %c0_i32_0 : i32, i32
  }
  func.func @transform_8(%arg0: i32) -> (i32, i32) {
    %c0_i32 = arith.constant 0 : i32
    %c0_i32_0 = arith.constant 0 : i32
    %c0_i32_1 = arith.constant 0 : i32
    return %c0_i32, %c0_i32_0 : i32, i32
  }
  func.func @transform_9(%arg0: i32) -> (i32, i32) {
    %c0_i32 = arith.constant 0 : i32
    %c0_i32_0 = arith.constant 0 : i32
    return %arg0, %c0_i32 : i32, i32
  }
}

</mosaic_0001>

<bundles_post_ra>
// kernel: my_net_forward.1
= control target key start
LH: loop header
LB: loop body
LE: loop exit
PB: predicated region body
PF: predicated region fallthrough
CT: control target
= control target key end

     0   :  { %vm5723_vm0 = vcmask 15360   ;;  %s9625_s1 = inlined_call_operand.vmem [shape: bf16[640,1024], index: 1, kind: input, shape index: {}]   ;;  %s9626_s0 = inlined_call_operand.vmem [shape: bf16[8,640], index: 0, kind: input, shape index: {}]   ;;  %s9627_s3 = inlined_call_operand.vmem [shape: bf16[1024,512], index: 3, kind: input, shape index: {}]   ;;  %s9628_s2 = inlined_call_operand.vmem [shape: f32[1,1024], index: 2, kind: input, shape index: {}]   ;;  %s9629_s5 = inlined_call_operand.vmem [shape: bf16[512,512], index: 5, kind: input, shape index: {}]   ;;  %s9630_s4 = inlined_call_operand.vmem [shape: f32[1,512], index: 4, kind: input, shape index: {}]   ;;  %s9631_s7 = inlined_call_operand.vmem [shape: bf16[512,2], index: 7, kind: input, shape index: {}]   ;;  %s9632_s6 = inlined_call_operand.vmem [shape: f32[1,512], index: 6, kind: input, shape index: {}]   ;;  %s9633_s8 = inlined_call_operand.vmem [shape: f32[1,2], index: 8, kind: input, shape index: {}]   ;;  %s9634_s9 = inlined_call_operand.vmem [shape: f32[8,2], index: 9, kind: output, shape index: {}]  }
   0x1   :  { %v92_v0 = vld [vmem:[%s9625_s1 + $0x1c0] sm:$0xff]  ;;  %v7289_v54 = vld [vmem:[%s9626_s0 + $0x8] sm:$0xff] }
   0x2   :  { %v96_v1 = vld [vmem:[%s9625_s1 + $0x1e0] sm:$0xff]  ;;  %v7303_v59 = vcombine.high %v7289_v54, %v7289_v54 }
   0x3   :  { %v220_v2 = vld [vmem:[%s9625_s1 + $0x5c0] sm:$0xff]  ;;  %v5802_v3 = vcombine.high %v92_v0, %v96_v1  ;;  %v5801_v5 = vcombine.low %v92_v0, %v96_v1 }
   0x4   :  { %v224_v4 = vld [vmem:[%s9625_s1 + $0x5e0] sm:$0xff]  ;;  %2089 = vmatprep.mubr.bf16.mxu1 %v7303_v59 }
   0x5   :  { %v84_v6 = vld [vmem:[%s9625_s1 + $0x180] sm:$0xff]  ;;  %v5930_v8 = vcombine.high %v220_v2, %v224_v4  ;;  %v5929_v9 = vcombine.low %v220_v2, %v224_v4  ;;  %2016 = vmatprep.subr.bf16.mxu0 %v5802_v3 }
   0x6   :  { %v88_v7 = vld [vmem:[%s9625_s1 + $0x1a0] sm:$0xff]  ;;  %2017 = vmatpush1.bf16.msra.mxu0 %v5801_v5 }
   0x7   :  { %v5794_v10 = vcombine.high %v84_v6, %v88_v7  ;;  %v212_v11 = vld [vmem:[%s9625_s1 + $0x580] sm:$0xff]  ;;  %2057 = vmatprep.subr.bf16.mxu1 %v5930_v8  ;;  %v5793_v18 = vcombine.low %v84_v6, %v88_v7 }
   0x8   :  { %v216_v12 = vld [vmem:[%s9625_s1 + $0x5a0] sm:$0xff]  ;;  %2058 = vmatpush1.bf16.msra.mxu1 %v5929_v9 }
   0x9   :  { %v76_v13 = vld [vmem:[%s9625_s1 + $0x140] sm:$0xff]  ;;  %v5922_v14 = vcombine.high %v212_v11, %v216_v12  ;;  %2018 = vmatprep.subr.bf16.mxu0 %v5794_v10  ;;  %v5921_v19 = vcombine.low %v212_v11, %v216_v12 }
   0xa   :  { %v80_v15 = vld [vmem:[%s9625_s1 + $0x160] sm:$0xff]  ;;  %2019 = vmatpush1.bf16.msra.mxu0 %v5793_v18 }
   0xb   :  { %v204_v16 = vld [vmem:[%s9625_s1 + $0x540] sm:$0xff]  ;;  %v5786_v20 = vcombine.high %v76_v13, %v80_v15  ;;  %2059 = vmatprep.subr.bf16.mxu1 %v5922_v14  ;;  %v5785_v26 = vcombine.low %v76_v13, %v80_v15 }
   0xc   :  { %v208_v17 = vld [vmem:[%s9625_s1 + $0x560] sm:$0xff]  ;;  %2060 = vmatpush1.bf16.msra.mxu1 %v5921_v19 }
   0xd   :  { %v5914_v21 = vcombine.high %v204_v16, %v208_v17  ;;  %v68_v22 = vld [vmem:[%s9625_s1 + $0x100] sm:$0xff]  ;;  %2020 = vmatprep.subr.bf16.mxu0 %v5786_v20  ;;  %v5913_v27 = vcombine.low %v204_v16, %v208_v17 }
   0xe   :  { %v72_v23 = vld [vmem:[%s9625_s1 + $0x120] sm:$0xff]  ;;  %2021 = vmatpush1.bf16.msra.mxu0 %v5785_v26 }
   0xf   :  { %v196_v24 = vld [vmem:[%s9625_s1 + $0x500] sm:$0xff]  ;;  %v5778_v28 = vcombine.high %v68_v22, %v72_v23  ;;  %2061 = vmatprep.subr.bf16.mxu1 %v5914_v21  ;;  %v5777_v34 = vcombine.low %v68_v22, %v72_v23 }
  0x10   :  { %v200_v25 = vld [vmem:[%s9625_s1 + $0x520] sm:$0xff]  ;;  %2062 = vmatpush1.bf16.msra.mxu1 %v5913_v27 }
  0x11   :  { %v5906_v29 = vcombine.high %v196_v24, %v200_v25  ;;  %v60_v30 = vld [vmem:[%s9625_s1 + $0xc0] sm:$0xff]  ;;  %2022 = vmatprep.subr.bf16.mxu0 %v5778_v28  ;;  %v5905_v35 = vcombine.low %v196_v24, %v200_v25 }
  0x12   :  { %v64_v31 = vld [vmem:[%s9625_s1 + $0xe0] sm:$0xff]  ;;  %2023 = vmatpush1.bf16.msra.mxu0 %v5777_v34 }
  0x13   :  { %v188_v32 = vld [vmem:[%s9625_s1 + $0x4c0] sm:$0xff]  ;;  %v5770_v36 = vcombine.high %v60_v30, %v64_v31  ;;  %2063 = vmatprep.subr.bf16.mxu1 %v5906_v29  ;;  %v5769_v42 = vcombine.low %v60_v30, %v64_v31 }
  0x14   :  { %v192_v33 = vld [vmem:[%s9625_s1 + $0x4e0] sm:$0xff]  ;;  %2064 = vmatpush1.bf16.msra.mxu1 %v5905_v35 }
  0x15   :  { %v5898_v37 = vcombine.high %v188_v32, %v192_v33  ;;  %v52_v38 = vld [vmem:[%s9625_s1 + $0x80] sm:$0xff]  ;;  %2024 = vmatprep.subr.bf16.mxu0 %v5770_v36  ;;  %v5897_v43 = vcombine.low %v188_v32, %v192_v33 }
  0x16   :  { %v56_v39 = vld [vmem:[%s9625_s1 + $0xa0] sm:$0xff]  ;;  %2025 = vmatpush1.bf16.msra.mxu0 %v5769_v42 }
  0x17   :  { %v180_v40 = vld [vmem:[%s9625_s1 + $0x480] sm:$0xff]  ;;  %v5762_v44 = vcombine.high %v52_v38, %v56_v39  ;;  %2065 = vmatprep.subr.bf16.mxu1 %v5898_v37  ;;  %v5761_v50 = vcombine.low %v52_v38, %v56_v39 }
  0x18   :  { %v184_v41 = vld [vmem:[%s9625_s1 + $0x4a0] sm:$0xff]  ;;  %2066 = vmatpush1.bf16.msra.mxu1 %v5897_v43 }
  0x19   :  { %v5890_v45 = vcombine.high %v180_v40, %v184_v41  ;;  %v44_v46 = vld [vmem:[%s9625_s1 + $0x40] sm:$0xff]  ;;  %2026 = vmatprep.subr.bf16.mxu0 %v5762_v44  ;;  %v5889_v51 = vcombine.low %v180_v40, %v184_v41 }
  0x1a   :  { %v48_v47 = vld [vmem:[%s9625_s1 + $0x60] sm:$0xff]  ;;  %2027 = vmatpush1.bf16.msra.mxu0 %v5761_v50 }
  0x1b   :  { %v172_v48 = vld [vmem:[%s9625_s1 + $0x440] sm:$0xff]  ;;  %v5754_v52 = vcombine.high %v44_v46, %v48_v47  ;;  %2067 = vmatprep.subr.bf16.mxu1 %v5890_v45  ;;  %v5753_v62 = vcombine.low %v44_v46, %v48_v47 }
  0x1c   :  { %v176_v49 = vld [vmem:[%s9625_s1 + $0x460] sm:$0xff]  ;;  %2068 = vmatpush1.bf16.msra.mxu1 %v5889_v51 }
  0x1d   :  { %v7284_v53 = vld [vmem:[%s9626_s0] sm:$0xff]  ;;  %v5882_v55 = vcombine.high %v172_v48, %v176_v49  ;;  %2028 = vmatprep.subr.bf16.mxu0 %v5754_v52  ;;  %v5881_v63 = vcombine.low %v172_v48, %v176_v49 }
  0x1e   :  { %v36_v56 = vld [vmem:[%s9625_s1] sm:$0xff]  ;;  %v7299_v58 = vcombine.high %v7284_v53, %v7284_v53  ;;  %2029 = vmatpush1.bf16.msra.mxu0 %v5753_v62 }
  0x1f   :  { %v40_v57 = vld [vmem:[%s9625_s1 + $0x20] sm:$0xff]  ;;  %2069 = vmatprep.subr.bf16.mxu1 %v5882_v55 }
  0x20   :  { %v164_v60 = vld [vmem:[%s9625_s1 + $0x400] sm:$0xff]  ;;  %2048 = vmatprep.mubr.bf16.mxu0 %v7299_v58  ;;  %v5746_v0 = vcombine.high %v36_v56, %v40_v57  ;;  %v5745_v6 = vcombine.low %v36_v56, %v40_v57  ;;  %2070 = vmatpush1.bf16.msra.mxu1 %v5881_v63 }
  0x21   :  { %v168_v61 = vld [vmem:[%s9625_s1 + $0x420] sm:$0xff] }
  0x22   :  { %v5874_v1 = vcombine.high %v164_v60, %v168_v61  ;;  %v156_v2 = vld [vmem:[%s9625_s1 + $0x3c0] sm:$0xff]  ;;  %2030 = vmatprep.subr.bf16.mxu0 %v5746_v0  ;;  %v5873_v7 = vcombine.low %v164_v60, %v168_v61 }
  0x23   :  { %v160_v3 = vld [vmem:[%s9625_s1 + $0x3e0] sm:$0xff]  ;;  %2031 = vmatpush1.bf16.msra.mxu0 %v5745_v6 }
  0x24   :  { %v284_v4 = vld [vmem:[%s9625_s1 + $0x7c0] sm:$0xff]  ;;  %v5866_v8 = vcombine.high %v156_v2, %v160_v3  ;;  %2071 = vmatprep.subr.bf16.mxu1 %v5874_v1  ;;  %v5865_v14 = vcombine.low %v156_v2, %v160_v3 }
  0x25   :  { %v288_v5 = vld [vmem:[%s9625_s1 + $0x7e0] sm:$0xff]  ;;  %2072 = vmatpush1.bf16.msra.mxu1 %v5873_v7 }
  0x26   :  { %v5994_v9 = vcombine.high %v284_v4, %v288_v5  ;;  %v148_v10 = vld [vmem:[%s9625_s1 + $0x380] sm:$0xff]  ;;  %2032 = vmatprep.subr.bf16.mxu0 %v5866_v8  ;;  %v5993_v15 = vcombine.low %v284_v4, %v288_v5  ;;  %v93_v8 = vld [vmem:[%s9625_s1 + $0x1c8] sm:$0xff] }
  0x27   :  { %v152_v11 = vld [vmem:[%s9625_s1 + $0x3a0] sm:$0xff]  ;;  %2033 = vmatpush2.bf16.msra.mxu0 %v5865_v14 }
  0x28   :  { %v276_v12 = vld [vmem:[%s9625_s1 + $0x780] sm:$0xff]  ;;  %v5858_v16 = vcombine.high %v148_v10, %v152_v11  ;;  %2073 = vmatprep.subr.bf16.mxu1 %v5994_v9  ;;  %v5857_v22 = vcombine.low %v148_v10, %v152_v11  ;;  %v97_v9 = vld [vmem:[%s9625_s1 + $0x1e8] sm:$0xff] }
  0x29   :  { %v280_v13 = vld [vmem:[%s9625_s1 + $0x7a0] sm:$0xff]  ;;  %2074 = vmatpush2.bf16.msra.mxu1 %v5993_v15 }
  0x2a   :  { %v5986_v17 = vcombine.high %v276_v12, %v280_v13  ;;  %v140_v18 = vld [vmem:[%s9625_s1 + $0x340] sm:$0xff]  ;;  %2034 = vmatprep.subr.bf16.mxu0 %v5858_v16  ;;  %v5985_v23 = vcombine.low %v276_v12, %v280_v13  ;;  %v5804_v13 = vcombine.high %v93_v8, %v97_v9  ;;  %v7429_v16 = vcombine.low %v7284_v53, %v7284_v53 }
  0x2b   :  { %v144_v19 = vld [vmem:[%s9625_s1 + $0x360] sm:$0xff]  ;;  %2035 = vmatpush2.bf16.msra.mxu0 %v5857_v22 }
  0x2c   :  { %v268_v20 = vld [vmem:[%s9625_s1 + $0x740] sm:$0xff]  ;;  %v5850_v24 = vcombine.high %v140_v18, %v144_v19  ;;  %2075 = vmatprep.subr.bf16.mxu1 %v5986_v17  ;;  %v5849_v30 = vcombine.low %v140_v18, %v144_v19  ;;  %v85_v17 = vld [vmem:[%s9625_s1 + $0x188] sm:$0xff]  ;;  %v7439_v19 = vcombine.low %v7289_v54, %v7289_v54 }
  0x2d   :  { %v272_v21 = vld [vmem:[%s9625_s1 + $0x760] sm:$0xff]  ;;  %2076 = vmatpush2.bf16.msra.mxu1 %v5985_v23  ;;  %v89_v18 = vld [vmem:[%s9625_s1 + $0x1a8] sm:$0xff] }
  0x2e   :  { %v5978_v25 = vcombine.high %v268_v20, %v272_v21  ;;  %v132_v26 = vld [vmem:[%s9625_s1 + $0x300] sm:$0xff]  ;;  %2036 = vmatprep.subr.bf16.mxu0 %v5850_v24  ;;  %v5977_v31 = vcombine.low %v268_v20, %v272_v21  ;;  %v5803_v21 = vcombine.low %v93_v8, %v97_v9  ;;  %v5796_v53 = vcombine.high %v85_v17, %v89_v18  ;;  %v77_v54 = vld [vmem:[%s9625_s1 + $0x148] sm:$0xff] }
  0x2f   :  { %v136_v27 = vld [vmem:[%s9625_s1 + $0x320] sm:$0xff]  ;;  %2037 = vmatpush2.bf16.msra.mxu0 %v5849_v30 }
  0x30   :  { %v260_v28 = vld [vmem:[%s9625_s1 + $0x700] sm:$0xff]  ;;  %v5842_v32 = vcombine.high %v132_v26, %v136_v27  ;;  %2077 = vmatprep.subr.bf16.mxu1 %v5978_v25  ;;  %v5841_v38 = vcombine.low %v132_v26, %v136_v27  ;;  %v81_v25 = vld [vmem:[%s9625_s1 + $0x168] sm:$0xff]  ;;  %v5795_v27 = vcombine.low %v85_v17, %v89_v18 }
  0x31   :  { %v264_v29 = vld [vmem:[%s9625_s1 + $0x720] sm:$0xff]  ;;  %2078 = vmatpush2.bf16.msra.mxu1 %v5977_v31 }
  0x32   :  { %v5970_v33 = vcombine.high %v260_v28, %v264_v29  ;;  %v124_v34 = vld [vmem:[%s9625_s1 + $0x2c0] sm:$0xff]  ;;  %2038 = vmatprep.subr.bf16.mxu0 %v5842_v32  ;;  %v5969_v39 = vcombine.low %v260_v28, %v264_v29  ;;  %v5788_v29 = vcombine.high %v77_v54, %v81_v25  ;;  %v7146_v32 = vmov 0  }
  0x33   :  { %v128_v35 = vld [vmem:[%s9625_s1 + $0x2e0] sm:$0xff]  ;;  %2039 = vmatpush2.bf16.msra.mxu0 %v5841_v38 }
  0x34   :  { %v252_v36 = vld [vmem:[%s9625_s1 + $0x6c0] sm:$0xff]  ;;  %v5834_v40 = vcombine.high %v124_v34, %v128_v35  ;;  %2079 = vmatprep.subr.bf16.mxu1 %v5970_v33  ;;  %v5833_v46 = vcombine.low %v124_v34, %v128_v35  ;;  %v69_v33 = vld [vmem:[%s9625_s1 + $0x108] sm:$0xff] }
  0x35   :  { %v256_v37 = vld [vmem:[%s9625_s1 + $0x6e0] sm:$0xff]  ;;  %2080 = vmatpush2.bf16.msra.mxu1 %v5969_v39  ;;  %v73_v34 = vld [vmem:[%s9625_s1 + $0x128] sm:$0xff] }
  0x36   :  { %v5962_v41 = vcombine.high %v252_v36, %v256_v37  ;;  %v116_v42 = vld [vmem:[%s9625_s1 + $0x280] sm:$0xff]  ;;  %2040 = vmatprep.subr.bf16.mxu0 %v5834_v40  ;;  %v5961_v47 = vcombine.low %v252_v36, %v256_v37  ;;  %v5787_v36 = vcombine.low %v77_v54, %v81_v25  ;;  %v5780_v38 = vcombine.high %v69_v33, %v73_v34 }
  0x37   :  { %v120_v43 = vld [vmem:[%s9625_s1 + $0x2a0] sm:$0xff]  ;;  %2041 = vmatpush2.bf16.msra.mxu0 %v5833_v46 }
  0x38   :  { %v244_v44 = vld [vmem:[%s9625_s1 + $0x680] sm:$0xff]  ;;  %v5826_v48 = vcombine.high %v116_v42, %v120_v43  ;;  %2081 = vmatprep.subr.bf16.mxu1 %v5962_v41  ;;  %v5825_v56 = vcombine.low %v116_v42, %v120_v43  ;;  %v61_v41 = vld [vmem:[%s9625_s1 + $0xc8] sm:$0xff] }
  0x39   :  { %v248_v45 = vld [vmem:[%s9625_s1 + $0x6a0] sm:$0xff]  ;;  %2082 = vmatpush2.bf16.msra.mxu1 %v5961_v47  ;;  %v65_v42 = vld [vmem:[%s9625_s1 + $0xe8] sm:$0xff] }
  0x3a   :  { %v5954_v49 = vcombine.high %v244_v44, %v248_v45  ;;  %v108_v50 = vld [vmem:[%s9625_s1 + $0x240] sm:$0xff]  ;;  %2042 = vmatprep.subr.bf16.mxu0 %v5826_v48  ;;  %v5953_v57 = vcombine.low %v244_v44, %v248_v45  ;;  %v5779_v44 = vcombine.low %v69_v33, %v73_v34  ;;  %v5772_v46 = vcombine.high %v61_v41, %v65_v42 }
  0x3b   :  { %v112_v51 = vld [vmem:[%s9625_s1 + $0x260] sm:$0xff]  ;;  %2043 = vmatpush2.bf16.msra.mxu0 %v5825_v56 }
  0x3c   :  { %v236_v52 = vld [vmem:[%s9625_s1 + $0x640] sm:$0xff]  ;;  %v5818_v60 = vcombine.high %v108_v50, %v112_v51  ;;  %2083 = vmatprep.subr.bf16.mxu1 %v5954_v49  ;;  %v5817_v2 = vcombine.low %v108_v50, %v112_v51  ;;  %v53_v49 = vld [vmem:[%s9625_s1 + $0x88] sm:$0xff] }
  0x3d   :  { %v240_v55 = vld [vmem:[%s9625_s1 + $0x660] sm:$0xff]  ;;  %2084 = vmatpush2.bf16.msra.mxu1 %v5953_v57  ;;  %v57_v50 = vld [vmem:[%s9625_s1 + $0xa8] sm:$0xff] }
  0x3e   :  { %v5946_v61 = vcombine.high %v236_v52, %v240_v55  ;;  %v100_v62 = vld [vmem:[%s9625_s1 + $0x200] sm:$0xff]  ;;  %2044 = vmatprep.subr.bf16.mxu0 %v5818_v60  ;;  %v5945_v3 = vcombine.low %v236_v52, %v240_v55  ;;  %v5771_v52 = vcombine.low %v61_v41, %v65_v42  ;;  %v5764_v56 = vcombine.high %v53_v49, %v57_v50 }
  0x3f   :  { %v104_v63 = vld [vmem:[%s9625_s1 + $0x220] sm:$0xff]  ;;  %2045 = vmatpush2.bf16.msra.mxu0 %v5817_v2 }
  0x40   :  { %v228_v0 = vld [vmem:[%s9625_s1 + $0x600] sm:$0xff]  ;;  %v5810_v4 = vcombine.high %v100_v62, %v104_v63  ;;  %2085 = vmatprep.subr.bf16.mxu1 %v5946_v61  ;;  %v5809_v10 = vcombine.low %v100_v62, %v104_v63  ;;  %v45_v61 = vld [vmem:[%s9625_s1 + $0x48] sm:$0xff] }
  0x41   :  { %v232_v1 = vld [vmem:[%s9625_s1 + $0x620] sm:$0xff]  ;;  %2086 = vmatpush2.bf16.msra.mxu1 %v5945_v3  ;;  %v49_v62 = vld [vmem:[%s9625_s1 + $0x68] sm:$0xff] }
  0x42   :  { %v5938_v5 = vcombine.high %v228_v0, %v232_v1  ;;  %v348_v6 = vld [vmem:[%s9625_s1 + $0x9c0] sm:$0xff]  ;;  %2046 = vmatprep.subr.bf16.mxu0 %v5810_v4  ;;  %v5937_v11 = vcombine.low %v228_v0, %v232_v1  ;;  %v5763_v0 = vcombine.low %v53_v49, %v57_v50  ;;  %v5756_v2 = vcombine.high %v45_v61, %v49_v62 }
  0x43   :  { %v352_v7 = vld [vmem:[%s9625_s1 + $0x9e0] sm:$0xff]  ;;  %2047 = vmatpush2.bf16.msra.mxu0 %v5809_v10  ;;  %v5755_v8 = vcombine.low %v45_v61, %v49_v62 }
  0x44   :  { %v6058_v12 = vcombine.high %v348_v6, %v352_v7  ;;  %2087 = vmatprep.subr.bf16.mxu1 %v5938_v5  ;;  %v340_v14 = vld [vmem:[%s9625_s1 + $0x980] sm:$0xff]  ;;  %v6057_v20 = vcombine.low %v348_v6, %v352_v7  ;;  %v37_v5 = vld [vmem:[%s9625_s1 + $0x8] sm:$0xff] }
  0x45   :  { %v344_v15 = vld [vmem:[%s9625_s1 + $0x9a0] sm:$0xff]  ;;  %2088 = vmatpush2.bf16.msra.mxu1 %v5937_v11  ;;  %v41_v6 = vld [vmem:[%s9625_s1 + $0x28] sm:$0xff] }
  0x46   :  { %2098 = vmatprep.subr.bf16.mxu0 %v6058_v12  ;;  %v6050_v22 = vcombine.high %v340_v14, %v344_v15  ;;  %2139 = vmatprep.subr.bf16.mxu1 %v5804_v13  ;;  %v332_v23 = vld [vmem:[%s9625_s1 + $0x940] sm:$0xff]  ;;  %v6049_v26 = vcombine.low %v340_v14, %v344_v15  ;;  %v5748_v10 = vcombine.high %v37_v5, %v41_v6  ;;  %v221_v11 = vld [vmem:[%s9625_s1 + $0x5c8] sm:$0xff] }
  0x47   :  { %v336_v24 = vld [vmem:[%s9625_s1 + $0x960] sm:$0xff]  ;;  %2049 = vmatmul.mubr.bf16.vlgmr.msra.gmra.mxu0 %v7429_v16  ;;  %v225_v12 = vld [vmem:[%s9625_s1 + $0x5e8] sm:$0xff]  ;;  %v5747_v17 = vcombine.low %v37_v5, %v41_v6 }
  0x48   :  { %2090 = vmatmul.mubr.bf16.vlgmr.msra.gmra.mxu1 %v7439_v19  ;;  %2099 = vmatpush1.bf16.msra.mxu0 %v6057_v20  ;;  %v6042_v28 = vcombine.high %v332_v23, %v336_v24  ;;  %v324_v30 = vld [vmem:[%s9625_s1 + $0x900] sm:$0xff]  ;;  %v6041_v35 = vcombine.low %v332_v23, %v336_v24  ;;  %v157_v13 = vld [vmem:[%s9625_s1 + $0x3c8] sm:$0xff]  ;;  %v5932_v18 = vcombine.high %v221_v11, %v225_v12 }
  0x49   :  { %2140 = vmatpush1.bf16.msra.mxu1 %v5803_v21  ;;  %2100 = vmatprep.subr.bf16.mxu0 %v6050_v22  ;;  %v328_v31 = vld [vmem:[%s9625_s1 + $0x920] sm:$0xff]  ;;  %v161_v14 = vld [vmem:[%s9625_s1 + $0x3e8] sm:$0xff]  ;;  %v5931_v54 = vcombine.low %v221_v11, %v225_v12 }
  0x4a   :  { %2141 = vmatprep.subr.bf16.mxu1 %v5796_v53  ;;  %2130 = vmatprep.mubr.bf16.mxu0 %v7146_v32  ;;  %v6034_v37 = vcombine.high %v324_v30, %v328_v31  ;;  %v316_v39 = vld [vmem:[%s9625_s1 + $0x8c0] sm:$0xff]  ;;  %v6033_v43 = vcombine.low %v324_v30, %v328_v31  ;;  %v5868_v20 = vcombine.high %v157_v13, %v161_v14  ;;  %v213_v21 = vld [vmem:[%s9625_s1 + $0x588] sm:$0xff]  ;;  %v7538_v53 = vld [vmem:[%s9626_s0 + $0x10] ss:$0 sps:$4 sm:$0xff]  }
  0x4b   :  { %2171 = vmatprep.mubr.bf16.mxu1 %v7299_v58  ;;  %v320_v40 = vld [vmem:[%s9625_s1 + $0x8e0] sm:$0xff]  ;;  %v217_v22 = vld [vmem:[%s9625_s1 + $0x5a8] sm:$0xff]  ;;  %v5867_v25 = vcombine.low %v157_v13, %v161_v14 }
  0x4c   :  { %2101 = vmatpush1.bf16.msra.mxu0 %v6049_v26  ;;  %v6026_v45 = vcombine.high %v316_v39, %v320_v40  ;;  %v308_v47 = vld [vmem:[%s9625_s1 + $0x880] sm:$0xff]  ;;  %v6025_v51 = vcombine.low %v316_v39, %v320_v40  ;;  %v149_v23 = vld [vmem:[%s9625_s1 + $0x388] sm:$0xff]  ;;  %v5924_v26 = vcombine.high %v213_v21, %v217_v22  ;;  %v5923_v33 = vcombine.low %v213_v21, %v217_v22 }
  0x4d   :  { %2142 = vmatpush1.bf16.msra.mxu1 %v5795_v27  ;;  %2102 = vmatprep.subr.bf16.mxu0 %v6042_v28  ;;  %v312_v48 = vld [vmem:[%s9625_s1 + $0x8a0] sm:$0xff]  ;;  %v153_v24 = vld [vmem:[%s9625_s1 + $0x3a8] sm:$0xff] }
  0x4e   :  { %2143 = vmatprep.subr.bf16.mxu1 %v5788_v29  ;;  %v6018_v55 = vcombine.high %v308_v47, %v312_v48  ;;  %v300_v57 = vld [vmem:[%s9625_s1 + $0x840] sm:$0xff]  ;;  %v6017_v63 = vcombine.low %v308_v47, %v312_v48  ;;  %v5860_v27 = vcombine.high %v149_v23, %v153_v24  ;;  %v205_v28 = vld [vmem:[%s9625_s1 + $0x548] sm:$0xff]  ;;  %v5859_v34 = vcombine.low %v149_v23, %v153_v24 }
  0x4f   :  { %v304_v60 = vld [vmem:[%s9625_s1 + $0x860] sm:$0xff]  ;;  %v209_v29 = vld [vmem:[%s9625_s1 + $0x568] sm:$0xff] }
  0x50   :  { %2103 = vmatpush1.bf16.msra.mxu0 %v6041_v35  ;;  %v6010_v1 = vcombine.high %v300_v57, %v304_v60  ;;  %v292_v3 = vld [vmem:[%s9625_s1 + $0x800] sm:$0xff]  ;;  %v6009_v7 = vcombine.low %v300_v57, %v304_v60  ;;  %v141_v30 = vld [vmem:[%s9625_s1 + $0x348] sm:$0xff]  ;;  %v5916_v35 = vcombine.high %v205_v28, %v209_v29  ;;  %v5915_v41 = vcombine.low %v205_v28, %v209_v29 }
  0x51   :  { %2144 = vmatpush1.bf16.msra.mxu1 %v5787_v36  ;;  %2104 = vmatprep.subr.bf16.mxu0 %v6034_v37  ;;  %v296_v4 = vld [vmem:[%s9625_s1 + $0x820] sm:$0xff]  ;;  %v145_v31 = vld [vmem:[%s9625_s1 + $0x368] sm:$0xff] }
  0x52   :  { %2145 = vmatprep.subr.bf16.mxu1 %v5780_v38  ;;  %v6002_v9 = vcombine.high %v292_v3, %v296_v4  ;;  %v6001_v15 = vcombine.low %v292_v3, %v296_v4  ;;  %v5852_v36 = vcombine.high %v141_v30, %v145_v31  ;;  %v197_v37 = vld [vmem:[%s9625_s1 + $0x508] sm:$0xff]  ;;  %v5851_v42 = vcombine.low %v141_v30, %v145_v31 }
  0x53   :  { %v201_v38 = vld [vmem:[%s9625_s1 + $0x528] sm:$0xff] }
  0x54   :  { %2105 = vmatpush1.bf16.msra.mxu0 %v6033_v43  ;;  %v133_v39 = vld [vmem:[%s9625_s1 + $0x308] sm:$0xff]  ;;  %v5908_v43 = vcombine.high %v197_v37, %v201_v38  ;;  %v5907_v49 = vcombine.low %v197_v37, %v201_v38 }
  0x55   :  { %2146 = vmatpush1.bf16.msra.mxu1 %v5779_v44  ;;  %2106 = vmatprep.subr.bf16.mxu0 %v6026_v45  ;;  %v137_v40 = vld [vmem:[%s9625_s1 + $0x328] sm:$0xff] }
  0x56   :  { %2147 = vmatprep.subr.bf16.mxu1 %v5772_v46  ;;  %v5844_v44 = vcombine.high %v133_v39, %v137_v40  ;;  %v189_v45 = vld [vmem:[%s9625_s1 + $0x4c8] sm:$0xff]  ;;  %v5843_v50 = vcombine.low %v133_v39, %v137_v40 }
  0x57   :  { %v193_v46 = vld [vmem:[%s9625_s1 + $0x4e8] sm:$0xff] }
  0x58   :  { %2107 = vmatpush1.bf16.msra.mxu0 %v6025_v51  ;;  %v125_v47 = vld [vmem:[%s9625_s1 + $0x2c8] sm:$0xff]  ;;  %v5900_v51 = vcombine.high %v189_v45, %v193_v46  ;;  %v5899_v61 = vcombine.low %v189_v45, %v193_v46 }
  0x59   :  { %2148 = vmatpush1.bf16.msra.mxu1 %v5771_v52  ;;  %2108 = vmatprep.subr.bf16.mxu0 %v6018_v55  ;;  %v129_v48 = vld [vmem:[%s9625_s1 + $0x2e8] sm:$0xff] }
  0x5a   :  { %2149 = vmatprep.subr.bf16.mxu1 %v5764_v56  ;;  %v5836_v52 = vcombine.high %v125_v47, %v129_v48  ;;  %v181_v55 = vld [vmem:[%s9625_s1 + $0x488] sm:$0xff]  ;;  %v5835_v62 = vcombine.low %v125_v47, %v129_v48 }
  0x5b   :  { %v185_v56 = vld [vmem:[%s9625_s1 + $0x4a8] sm:$0xff] }
  0x5c   :  { %2109 = vmatpush1.bf16.msra.mxu0 %v6017_v63  ;;  %v117_v57 = vld [vmem:[%s9625_s1 + $0x288] sm:$0xff]  ;;  %v5892_v63 = vcombine.high %v181_v55, %v185_v56  ;;  %v5891_v5 = vcombine.low %v181_v55, %v185_v56 }
  0x5d   :  { %2150 = vmatpush1.bf16.msra.mxu1 %v5763_v0  ;;  %2110 = vmatprep.subr.bf16.mxu0 %v6010_v1  ;;  %v121_v60 = vld [vmem:[%s9625_s1 + $0x2a8] sm:$0xff] }
  0x5e   :  { %2151 = vmatprep.subr.bf16.mxu1 %v5756_v2  ;;  %v5828_v0 = vcombine.high %v117_v57, %v121_v60  ;;  %v173_v1 = vld [vmem:[%s9625_s1 + $0x448] sm:$0xff]  ;;  %v5827_v6 = vcombine.low %v117_v57, %v121_v60 }
  0x5f   :  { %v177_v2 = vld [vmem:[%s9625_s1 + $0x468] sm:$0xff] }
  0x60   :  { %2111 = vmatpush1.bf16.msra.mxu0 %v6009_v7  ;;  %v109_v3 = vld [vmem:[%s9625_s1 + $0x248] sm:$0xff]  ;;  %v5884_v7 = vcombine.high %v173_v1, %v177_v2  ;;  %v5883_v13 = vcombine.low %v173_v1, %v177_v2 }
  0x61   :  { %2152 = vmatpush1.bf16.msra.mxu1 %v5755_v8  ;;  %2112 = vmatprep.subr.bf16.mxu0 %v6002_v9  ;;  %v113_v4 = vld [vmem:[%s9625_s1 + $0x268] sm:$0xff] }
  0x62   :  { %2153 = vmatprep.subr.bf16.mxu1 %v5748_v10  ;;  %v5820_v8 = vcombine.high %v109_v3, %v113_v4  ;;  %v165_v9 = vld [vmem:[%s9625_s1 + $0x408] sm:$0xff]  ;;  %v5819_v14 = vcombine.low %v109_v3, %v113_v4 }
  0x63   :  { %v169_v10 = vld [vmem:[%s9625_s1 + $0x428] sm:$0xff] }
  0x64   :  { %2113 = vmatpush1.bf16.msra.mxu0 %v6001_v15  ;;  %v101_v11 = vld [vmem:[%s9625_s1 + $0x208] sm:$0xff]  ;;  %v5876_v15 = vcombine.high %v165_v9, %v169_v10  ;;  %v5875_v23 = vcombine.low %v165_v9, %v169_v10 }
  0x65   :  { %2154 = vmatpush1.bf16.msra.mxu1 %v5747_v17  ;;  %2180 = vmatprep.subr.bf16.mxu0 %v5932_v18  ;;  %v105_v12 = vld [vmem:[%s9625_s1 + $0x228] sm:$0xff] }
  0x66   :  { %2155 = vmatprep.subr.bf16.mxu1 %v5868_v20  ;;  %v5812_v17 = vcombine.high %v101_v11, %v105_v12  ;;  %v285_v18 = vld [vmem:[%s9625_s1 + $0x7c8] sm:$0xff]  ;;  %v5811_v24 = vcombine.low %v101_v11, %v105_v12 }
  0x67   :  { %2131 = vmatmul.mubr.bf16.vlgmr.msra.gmra.mxu0 %v7538_v53  ;;  %v289_v20 = vld [vmem:[%s9625_s1 + $0x7e8] sm:$0xff] }
  0x68   :  { %2181 = vmatpush1.bf16.msra.mxu0 %v5931_v54  ;;  %2212 = vmatprep.mubr.bf16.mxu0 %v7303_v59  ;;  %v349_v21 = vld [vmem:[%s9625_s1 + $0x9c8] sm:$0xff]  ;;  %v5996_v54 = vcombine.high %v285_v18, %v289_v20  ;;  %v5995_v30 = vcombine.low %v285_v18, %v289_v20 }
  0x69   :  { %2156 = vmatpush2.bf16.msra.mxu1 %v5867_v25  ;;  %2182 = vmatprep.subr.bf16.mxu0 %v5924_v26  ;;  %v353_v22 = vld [vmem:[%s9625_s1 + $0x9e8] sm:$0xff] }
  0x6a   :  { %2157 = vmatprep.subr.bf16.mxu1 %v5860_v27  ;;  %v6060_v25 = vcombine.high %v349_v21, %v353_v22  ;;  %v277_v26 = vld [vmem:[%s9625_s1 + $0x788] sm:$0xff]  ;;  %v6059_v31 = vcombine.low %v349_v21, %v353_v22 }
  0x6b   :  { %v281_v27 = vld [vmem:[%s9625_s1 + $0x7a8] sm:$0xff] }
  0x6c   :  { %2183 = vmatpush1.bf16.msra.mxu0 %v5923_v33  ;;  %v341_v28 = vld [vmem:[%s9625_s1 + $0x988] sm:$0xff]  ;;  %v5988_v33 = vcombine.high %v277_v26, %v281_v27  ;;  %v5987_v39 = vcombine.low %v277_v26, %v281_v27  ;;  %v222_v26 = vld [vmem:[%s9625_s1 + $0x5d0] sm:$0xff] }
  0x6d   :  { %2158 = vmatpush2.bf16.msra.mxu1 %v5859_v34  ;;  %2184 = vmatprep.subr.bf16.mxu0 %v5916_v35  ;;  %v345_v29 = vld [vmem:[%s9625_s1 + $0x9a8] sm:$0xff]  ;;  %v226_v27 = vld [vmem:[%s9625_s1 + $0x5f0] sm:$0xff] }
  0x6e   :  { %2159 = vmatprep.subr.bf16.mxu1 %v5852_v36  ;;  %v6052_v34 = vcombine.high %v341_v28, %v345_v29  ;;  %v269_v35 = vld [vmem:[%s9625_s1 + $0x748] sm:$0xff]  ;;  %v6051_v40 = vcombine.low %v341_v28, %v345_v29 }
  0x6f   :  { %v273_v36 = vld [vmem:[%s9625_s1 + $0x768] sm:$0xff] }
  0x70   :  { %2185 = vmatpush1.bf16.msra.mxu0 %v5915_v41  ;;  %v333_v37 = vld [vmem:[%s9625_s1 + $0x948] sm:$0xff]  ;;  %v5980_v41 = vcombine.high %v269_v35, %v273_v36  ;;  %v5979_v47 = vcombine.low %v269_v35, %v273_v36  ;;  %v214_v35 = vld [vmem:[%s9625_s1 + $0x590] sm:$0xff] }
  0x71   :  { %2160 = vmatpush2.bf16.msra.mxu1 %v5851_v42  ;;  %2186 = vmatprep.subr.bf16.mxu0 %v5908_v43  ;;  %v337_v38 = vld [vmem:[%s9625_s1 + $0x968] sm:$0xff]  ;;  %v218_v36 = vld [vmem:[%s9625_s1 + $0x5b0] sm:$0xff] }
  0x72   :  { %2161 = vmatprep.subr.bf16.mxu1 %v5844_v44  ;;  %v6044_v42 = vcombine.high %v333_v37, %v337_v38  ;;  %v261_v43 = vld [vmem:[%s9625_s1 + $0x708] sm:$0xff]  ;;  %v6043_v48 = vcombine.low %v333_v37, %v337_v38  ;;  %v5933_v38 = vcombine.low %v222_v26, %v226_v27 }
  0x73   :  { %v265_v44 = vld [vmem:[%s9625_s1 + $0x728] sm:$0xff] }
  0x74   :  { %2187 = vmatpush1.bf16.msra.mxu0 %v5907_v49  ;;  %v325_v45 = vld [vmem:[%s9625_s1 + $0x908] sm:$0xff]  ;;  %v5972_v49 = vcombine.high %v261_v43, %v265_v44  ;;  %v5971_v57 = vcombine.low %v261_v43, %v265_v44  ;;  %v206_v43 = vld [vmem:[%s9625_s1 + $0x550] sm:$0xff] }
  0x75   :  { %2162 = vmatpush2.bf16.msra.mxu1 %v5843_v50  ;;  %2188 = vmatprep.subr.bf16.mxu0 %v5900_v51  ;;  %v329_v46 = vld [vmem:[%s9625_s1 + $0x928] sm:$0xff]  ;;  %v210_v44 = vld [vmem:[%s9625_s1 + $0x570] sm:$0xff] }
  0x76   :  { %2163 = vmatprep.subr.bf16.mxu1 %v5836_v52  ;;  %v6036_v50 = vcombine.high %v325_v45, %v329_v46  ;;  %v253_v51 = vld [vmem:[%s9625_s1 + $0x6c8] sm:$0xff]  ;;  %v6035_v60 = vcombine.low %v325_v45, %v329_v46  ;;  %v5925_v46 = vcombine.low %v214_v35, %v218_v36 }
  0x77   :  { %v257_v52 = vld [vmem:[%s9625_s1 + $0x6e8] sm:$0xff] }
  0x78   :  { %2189 = vmatpush1.bf16.msra.mxu0 %v5899_v61  ;;  %v317_v55 = vld [vmem:[%s9625_s1 + $0x8c8] sm:$0xff]  ;;  %v5964_v61 = vcombine.high %v253_v51, %v257_v52  ;;  %v5963_v3 = vcombine.low %v253_v51, %v257_v52  ;;  %v202_v51 = vld [vmem:[%s9625_s1 + $0x530] sm:$0xff] }
  0x79   :  { %2164 = vmatpush2.bf16.msra.mxu1 %v5835_v62  ;;  %2190 = vmatprep.subr.bf16.mxu0 %v5892_v63  ;;  %v321_v56 = vld [vmem:[%s9625_s1 + $0x8e8] sm:$0xff] }
  0x7a   :  { %2165 = vmatprep.subr.bf16.mxu1 %v5828_v0  ;;  %v6028_v62 = vcombine.high %v317_v55, %v321_v56  ;;  %v245_v63 = vld [vmem:[%s9625_s1 + $0x688] sm:$0xff]  ;;  %v6027_v4 = vcombine.low %v317_v55, %v321_v56  ;;  %v5917_v55 = vcombine.low %v206_v43, %v210_v44 }
  0x7b   :  { %v249_v0 = vld [vmem:[%s9625_s1 + $0x6a8] sm:$0xff] }
  0x7c   :  { %2191 = vmatpush1.bf16.msra.mxu0 %v5891_v5  ;;  %v309_v1 = vld [vmem:[%s9625_s1 + $0x888] sm:$0xff]  ;;  %v5956_v5 = vcombine.high %v245_v63, %v249_v0  ;;  %v5955_v11 = vcombine.low %v245_v63, %v249_v0  ;;  %v194_v63 = vld [vmem:[%s9625_s1 + $0x4f0] sm:$0xff] }
  0x7d   :  { %2166 = vmatpush2.bf16.msra.mxu1 %v5827_v6  ;;  %2192 = vmatprep.subr.bf16.mxu0 %v5884_v7  ;;  %v313_v2 = vld [vmem:[%s9625_s1 + $0x8a8] sm:$0xff] }
  0x7e   :  { %2167 = vmatprep.subr.bf16.mxu1 %v5820_v8  ;;  %v6020_v6 = vcombine.high %v309_v1, %v313_v2  ;;  %v237_v7 = vld [vmem:[%s9625_s1 + $0x648] sm:$0xff]  ;;  %v6019_v12 = vcombine.low %v309_v1, %v313_v2 }
  0x7f   :  { %v241_v8 = vld [vmem:[%s9625_s1 + $0x668] sm:$0xff] }
  0x80   :  { %2193 = vmatpush1.bf16.msra.mxu0 %v5883_v13  ;;  %v301_v9 = vld [vmem:[%s9625_s1 + $0x848] sm:$0xff]  ;;  %v5948_v13 = vcombine.high %v237_v7, %v241_v8  ;;  %v5947_v21 = vcombine.low %v237_v7, %v241_v8  ;;  %v186_v7 = vld [vmem:[%s9625_s1 + $0x4b0] sm:$0xff] }
  0x81   :  { %2168 = vmatpush2.bf16.msra.mxu1 %v5819_v14  ;;  %2194 = vmatprep.subr.bf16.mxu0 %v5876_v15  ;;  %v305_v10 = vld [vmem:[%s9625_s1 + $0x868] sm:$0xff] }
  0x82   :  { %2169 = vmatprep.subr.bf16.mxu1 %v5812_v17  ;;  %v6012_v14 = vcombine.high %v301_v9, %v305_v10  ;;  %v229_v15 = vld [vmem:[%s9625_s1 + $0x608] sm:$0xff]  ;;  %v6011_v22 = vcombine.low %v301_v9, %v305_v10 }
  0x83   :  { %v233_v17 = vld [vmem:[%s9625_s1 + $0x628] sm:$0xff] }
  0x84   :  { %2195 = vmatpush1.bf16.msra.mxu0 %v5875_v23  ;;  %v293_v18 = vld [vmem:[%s9625_s1 + $0x808] sm:$0xff]  ;;  %v5940_v23 = vcombine.high %v229_v15, %v233_v17  ;;  %v5939_v28 = vcombine.low %v229_v15, %v233_v17  ;;  %v178_v15 = vld [vmem:[%s9625_s1 + $0x470] sm:$0xff] }
  0x85   :  { %2170 = vmatpush2.bf16.msra.mxu1 %v5811_v24  ;;  %2196 = vmatprep.subr.bf16.mxu0 %v5996_v54  ;;  %v297_v20 = vld [vmem:[%s9625_s1 + $0x828] sm:$0xff]  ;;  %v94_v54 = vld [vmem:[%s9625_s1 + $0x1d0] sm:$0xff] }
  0x86   :  { %2221 = vmatprep.subr.bf16.mxu1 %v6060_v25  ;;  %v6004_v24 = vcombine.high %v293_v18, %v297_v20  ;;  %v98_v25 = vld [vmem:[%s9625_s1 + $0x1f0] sm:$0xff]  ;;  %v6003_v29 = vcombine.low %v293_v18, %v297_v20 }
  0x87   :  { %v5805_v37 = vcombine.low %v94_v54, %v98_v25 }
  0x88   :  { %2172 = vmatmul.mubr.bf16.vlgmr.msra.gmra.mxu1 %v7429_v16  ;;  %2197 = vmatpush2.bf16.msra.mxu0 %v5995_v30  ;;  %v5806_v30 = vcombine.high %v94_v54, %v98_v25  ;;  %v170_v54 = vld [vmem:[%s9625_s1 + $0x430] sm:$0xff] }
  0x89   :  { %2222 = vmatpush1.bf16.msra.mxu1 %v6059_v31  ;;  %2198 = vmatprep.subr.bf16.mxu0 %v5988_v33  ;;  %v5934_v31 = vcombine.high %v222_v26, %v226_v27  ;;  %v86_v33 = vld [vmem:[%s9625_s1 + $0x190] sm:$0xff] }
  0x8a   :  { %2223 = vmatprep.subr.bf16.mxu1 %v6052_v34  ;;  %2253 = vmatprep.mubr.bf16.mxu1 %v7146_v32  ;;  %v90_v34 = vld [vmem:[%s9625_s1 + $0x1b0] sm:$0xff] }
  0x8b   :  { %v5797_v45 = vcombine.low %v86_v33, %v90_v34 }
  0x8c   :  { %2199 = vmatpush2.bf16.msra.mxu0 %v5987_v39  ;;  %v5798_v39 = vcombine.high %v86_v33, %v90_v34  ;;  %v290_v33 = vld [vmem:[%s9625_s1 + $0x7f0] sm:$0xff] }
  0x8d   :  { %2224 = vmatpush1.bf16.msra.mxu1 %v6051_v40  ;;  %2200 = vmatprep.subr.bf16.mxu0 %v5980_v41  ;;  %v5926_v40 = vcombine.high %v214_v35, %v218_v36  ;;  %v78_v41 = vld [vmem:[%s9625_s1 + $0x150] sm:$0xff] }
  0x8e   :  { %2225 = vmatprep.subr.bf16.mxu1 %v6044_v42  ;;  %v82_v42 = vld [vmem:[%s9625_s1 + $0x170] sm:$0xff] }
  0x8f   :  { %v5789_v52 = vcombine.low %v78_v41, %v82_v42 }
  0x90   :  { %2201 = vmatpush2.bf16.msra.mxu0 %v5979_v47  ;;  %v5790_v47 = vcombine.high %v78_v41, %v82_v42  ;;  %v282_v41 = vld [vmem:[%s9625_s1 + $0x7b0] sm:$0xff] }
  0x91   :  { %2226 = vmatpush1.bf16.msra.mxu1 %v6043_v48  ;;  %2202 = vmatprep.subr.bf16.mxu0 %v5972_v49  ;;  %v5918_v48 = vcombine.high %v206_v43, %v210_v44  ;;  %v70_v49 = vld [vmem:[%s9625_s1 + $0x110] sm:$0xff] }
  0x92   :  { %2227 = vmatprep.subr.bf16.mxu1 %v6036_v50  ;;  %v74_v50 = vld [vmem:[%s9625_s1 + $0x130] sm:$0xff] }
  0x93   :  { %v5782_v56 = vcombine.high %v70_v49, %v74_v50  ;;  %v5781_v0 = vcombine.low %v70_v49, %v74_v50  ;;  %v274_v49 = vld [vmem:[%s9625_s1 + $0x770] sm:$0xff] }
  0x94   :  { %2203 = vmatpush2.bf16.msra.mxu0 %v5971_v57 }
  0x95   :  { %2228 = vmatpush1.bf16.msra.mxu1 %v6035_v60  ;;  %2204 = vmatprep.subr.bf16.mxu0 %v5964_v61  ;;  %v62_v60 = vld [vmem:[%s9625_s1 + $0xd0] sm:$0xff] }
  0x96   :  { %2229 = vmatprep.subr.bf16.mxu1 %v6028_v62  ;;  %v66_v61 = vld [vmem:[%s9625_s1 + $0xf0] sm:$0xff] }
  0x97   :  { %v190_v62 = vld [vmem:[%s9625_s1 + $0x4d0] sm:$0xff]  ;;  %v5774_v2 = vcombine.high %v62_v60, %v66_v61  ;;  %v5773_v8 = vcombine.low %v62_v60, %v66_v61 }
  0x98   :  { %2205 = vmatpush2.bf16.msra.mxu0 %v5963_v3  ;;  %v5902_v3 = vcombine.high %v190_v62, %v194_v63  ;;  %v5901_v9 = vcombine.low %v190_v62, %v194_v63  ;;  %v266_v60 = vld [vmem:[%s9625_s1 + $0x730] sm:$0xff] }
  0x99   :  { %2230 = vmatpush1.bf16.msra.mxu1 %v6027_v4  ;;  %2206 = vmatprep.subr.bf16.mxu0 %v5956_v5  ;;  %v54_v4 = vld [vmem:[%s9625_s1 + $0x90] sm:$0xff] }
  0x9a   :  { %2231 = vmatprep.subr.bf16.mxu1 %v6020_v6  ;;  %v58_v5 = vld [vmem:[%s9625_s1 + $0xb0] sm:$0xff] }
  0x9b   :  { %v182_v6 = vld [vmem:[%s9625_s1 + $0x490] sm:$0xff]  ;;  %v5766_v10 = vcombine.high %v54_v4, %v58_v5  ;;  %v5765_v17 = vcombine.low %v54_v4, %v58_v5 }
  0x9c   :  { %2207 = vmatpush2.bf16.msra.mxu0 %v5955_v11  ;;  %v5894_v11 = vcombine.high %v182_v6, %v186_v7  ;;  %v5893_v18 = vcombine.low %v182_v6, %v186_v7  ;;  %v258_v4 = vld [vmem:[%s9625_s1 + $0x6f0] sm:$0xff] }
  0x9d   :  { %2232 = vmatpush1.bf16.msra.mxu1 %v6019_v12  ;;  %2208 = vmatprep.subr.bf16.mxu0 %v5948_v13  ;;  %v46_v12 = vld [vmem:[%s9625_s1 + $0x50] sm:$0xff] }
  0x9e   :  { %2233 = vmatprep.subr.bf16.mxu1 %v6012_v14  ;;  %v50_v13 = vld [vmem:[%s9625_s1 + $0x70] sm:$0xff] }
  0x9f   :  { %v174_v14 = vld [vmem:[%s9625_s1 + $0x450] sm:$0xff]  ;;  %v5758_v20 = vcombine.high %v46_v12, %v50_v13  ;;  %v5757_v25 = vcombine.low %v46_v12, %v50_v13 }
  0xa0   :  { %2209 = vmatpush2.bf16.msra.mxu0 %v5947_v21  ;;  %v5886_v21 = vcombine.high %v174_v14, %v178_v15  ;;  %v5885_v26 = vcombine.low %v174_v14, %v178_v15  ;;  %v250_v12 = vld [vmem:[%s9625_s1 + $0x6b0] sm:$0xff] }
  0xa1   :  { %2234 = vmatpush1.bf16.msra.mxu1 %v6011_v22  ;;  %2210 = vmatprep.subr.bf16.mxu0 %v5940_v23  ;;  %v38_v22 = vld [vmem:[%s9625_s1 + $0x10] sm:$0xff] }
  0xa2   :  { %2235 = vmatprep.subr.bf16.mxu1 %v6004_v24  ;;  %v42_v23 = vld [vmem:[%s9625_s1 + $0x30] sm:$0xff] }
  0xa3   :  { %v166_v24 = vld [vmem:[%s9625_s1 + $0x410] sm:$0xff]  ;;  %v5750_v27 = vcombine.high %v38_v22, %v42_v23  ;;  %v5749_v34 = vcombine.low %v38_v22, %v42_v23 }
  0xa4   :  { %2211 = vmatpush2.bf16.msra.mxu0 %v5939_v28  ;;  %v5878_v28 = vcombine.high %v166_v24, %v170_v54  ;;  %v5877_v35 = vcombine.low %v166_v24, %v170_v54  ;;  %v242_v22 = vld [vmem:[%s9625_s1 + $0x670] sm:$0xff] }
  0xa5   :  { %2236 = vmatpush1.bf16.msra.mxu1 %v6003_v29  ;;  %2262 = vmatprep.subr.bf16.mxu0 %v5806_v30  ;;  %v158_v29 = vld [vmem:[%s9625_s1 + $0x3d0] sm:$0xff] }
  0xa6   :  { %2303 = vmatprep.subr.bf16.mxu1 %v5934_v31  ;;  %v162_v30 = vld [vmem:[%s9625_s1 + $0x3f0] sm:$0xff] }
  0xa7   :  { %2213 = vmatmul.mubr.bf16.vlgmr.msra.gmra.mxu0 %v7439_v19  ;;  %v286_v31 = vld [vmem:[%s9625_s1 + $0x7d0] sm:$0xff]  ;;  %v5870_v36 = vcombine.high %v158_v29, %v162_v30  ;;  %v5869_v42 = vcombine.low %v158_v29, %v162_v30 }
  0xa8   :  { %2254 = vmatmul.mubr.bf16.vlgmr.msra.gmra.mxu1 %v7538_v53  ;;  %2263 = vmatpush1.bf16.msra.mxu0 %v5805_v37  ;;  %v198_v53 = vld [vmem:[%s9625_s1 + $0x510] sm:$0xff]  ;;  %v5998_v37 = vcombine.high %v286_v31, %v290_v33  ;;  %v5997_v43 = vcombine.low %v286_v31, %v290_v33 }
  0xa9   :  { %2304 = vmatpush1.bf16.msra.mxu1 %v5933_v38  ;;  %2264 = vmatprep.subr.bf16.mxu0 %v5798_v39  ;;  %v5910_v57 = vcombine.high %v198_v53, %v202_v51  ;;  %v5909_v1 = vcombine.low %v198_v53, %v202_v51  ;;  %v150_v38 = vld [vmem:[%s9625_s1 + $0x390] sm:$0xff] }
  0xaa   :  { %2305 = vmatprep.subr.bf16.mxu1 %v5926_v40  ;;  %2294 = vmatprep.mubr.bf16.mxu0 %v7299_v58  ;;  %v154_v39 = vld [vmem:[%s9625_s1 + $0x3b0] sm:$0xff] }
  0xab   :  { %2335 = vmatprep.mubr.bf16.mxu1 %v7303_v59  ;;  %v278_v40 = vld [vmem:[%s9625_s1 + $0x790] sm:$0xff]  ;;  %v5862_v44 = vcombine.high %v150_v38, %v154_v39  ;;  %v5861_v50 = vcombine.low %v150_v38, %v154_v39  ;;  %v99_v38 = vld [vmem:[%s9625_s1 + $0x1f8] sm:$0xff] }
  0xac   :  { %2265 = vmatpush1.bf16.msra.mxu0 %v5797_v45  ;;  %v142_v45 = vld [vmem:[%s9625_s1 + $0x350] sm:$0xff]  ;;  %v5989_v53 = vcombine.low %v278_v40, %v282_v41 }
  0xad   :  { %2306 = vmatpush1.bf16.msra.mxu1 %v5925_v46  ;;  %2266 = vmatprep.subr.bf16.mxu0 %v5790_v47  ;;  %v146_v46 = vld [vmem:[%s9625_s1 + $0x370] sm:$0xff]  ;;  %v5990_v47 = vcombine.high %v278_v40, %v282_v41 }
  0xae   :  { %2307 = vmatprep.subr.bf16.mxu1 %v5918_v48  ;;  %v270_v48 = vld [vmem:[%s9625_s1 + $0x750] sm:$0xff]  ;;  %v5854_v51 = vcombine.high %v142_v45, %v146_v46  ;;  %v5853_v61 = vcombine.low %v142_v45, %v146_v46  ;;  %v91_v46 = vld [vmem:[%s9625_s1 + $0x1b8] sm:$0xff] }
  0xaf   :  { %v5981_v62 = vcombine.low %v270_v48, %v274_v49  ;;  %v234_v29 = vld [vmem:[%s9625_s1 + $0x630] sm:$0xff] }
  0xb0   :  { %2267 = vmatpush1.bf16.msra.mxu0 %v5789_v52  ;;  %v5982_v52 = vcombine.high %v270_v48, %v274_v49 }
  0xb1   :  { %2308 = vmatpush1.bf16.msra.mxu1 %v5917_v55  ;;  %2268 = vmatprep.subr.bf16.mxu0 %v5782_v56  ;;  %v134_v55 = vld [vmem:[%s9625_s1 + $0x310] sm:$0xff] }
  0xb2   :  { %2309 = vmatprep.subr.bf16.mxu1 %v5910_v57  ;;  %v138_v56 = vld [vmem:[%s9625_s1 + $0x330] sm:$0xff] }
  0xb3   :  { %v262_v57 = vld [vmem:[%s9625_s1 + $0x710] sm:$0xff]  ;;  %v5846_v63 = vcombine.high %v134_v55, %v138_v56  ;;  %v5845_v5 = vcombine.low %v134_v55, %v138_v56  ;;  %v83_v55 = vld [vmem:[%s9625_s1 + $0x178] sm:$0xff] }
  0xb4   :  { %2269 = vmatpush1.bf16.msra.mxu0 %v5781_v0  ;;  %v5974_v0 = vcombine.high %v262_v57, %v266_v60  ;;  %v5973_v6 = vcombine.low %v262_v57, %v266_v60 }
  0xb5   :  { %2310 = vmatpush1.bf16.msra.mxu1 %v5909_v1  ;;  %2270 = vmatprep.subr.bf16.mxu0 %v5774_v2  ;;  %v126_v1 = vld [vmem:[%s9625_s1 + $0x2d0] sm:$0xff] }
  0xb6   :  { %2311 = vmatprep.subr.bf16.mxu1 %v5902_v3  ;;  %v130_v2 = vld [vmem:[%s9625_s1 + $0x2f0] sm:$0xff] }
  0xb7   :  { %v254_v3 = vld [vmem:[%s9625_s1 + $0x6d0] sm:$0xff]  ;;  %v5838_v7 = vcombine.high %v126_v1, %v130_v2  ;;  %v5837_v13 = vcombine.low %v126_v1, %v130_v2  ;;  %v75_v1 = vld [vmem:[%s9625_s1 + $0x138] sm:$0xff] }
  0xb8   :  { %2271 = vmatpush1.bf16.msra.mxu0 %v5773_v8  ;;  %v118_v8 = vld [vmem:[%s9625_s1 + $0x290] sm:$0xff]  ;;  %v5965_v14 = vcombine.low %v254_v3, %v258_v4 }
  0xb9   :  { %2312 = vmatpush1.bf16.msra.mxu1 %v5901_v9  ;;  %2272 = vmatprep.subr.bf16.mxu0 %v5766_v10  ;;  %v122_v9 = vld [vmem:[%s9625_s1 + $0x2b0] sm:$0xff] }
  0xba   :  { %2313 = vmatprep.subr.bf16.mxu1 %v5894_v11  ;;  %v246_v10 = vld [vmem:[%s9625_s1 + $0x690] sm:$0xff]  ;;  %v5966_v11 = vcombine.high %v254_v3, %v258_v4  ;;  %v5830_v15 = vcombine.high %v118_v8, %v122_v9  ;;  %v5829_v23 = vcombine.low %v118_v8, %v122_v9  ;;  %v67_v8 = vld [vmem:[%s9625_s1 + $0xf8] sm:$0xff] }
  0xbb   :  { %v5957_v24 = vcombine.low %v246_v10, %v250_v12 }
  0xbc   :  { %2273 = vmatpush1.bf16.msra.mxu0 %v5765_v17  ;;  %v110_v17 = vld [vmem:[%s9625_s1 + $0x250] sm:$0xff] }
  0xbd   :  { %2314 = vmatpush1.bf16.msra.mxu1 %v5893_v18  ;;  %2274 = vmatprep.subr.bf16.mxu0 %v5758_v20  ;;  %v114_v18 = vld [vmem:[%s9625_s1 + $0x270] sm:$0xff] }
  0xbe   :  { %2315 = vmatprep.subr.bf16.mxu1 %v5886_v21  ;;  %v238_v20 = vld [vmem:[%s9625_s1 + $0x650] sm:$0xff]  ;;  %v5958_v21 = vcombine.high %v246_v10, %v250_v12  ;;  %v5822_v54 = vcombine.high %v110_v17, %v114_v18  ;;  %v5821_v30 = vcombine.low %v110_v17, %v114_v18  ;;  %v59_v17 = vld [vmem:[%s9625_s1 + $0xb8] sm:$0xff] }
  0xbf   :  { %v5949_v31 = vcombine.low %v238_v20, %v242_v22 }
  0xc0   :  { %2275 = vmatpush1.bf16.msra.mxu0 %v5757_v25  ;;  %v102_v25 = vld [vmem:[%s9625_s1 + $0x210] sm:$0xff] }
  0xc1   :  { %2316 = vmatpush1.bf16.msra.mxu1 %v5885_v26  ;;  %2276 = vmatprep.subr.bf16.mxu0 %v5750_v27  ;;  %v106_v26 = vld [vmem:[%s9625_s1 + $0x230] sm:$0xff] }
  0xc2   :  { %2317 = vmatprep.subr.bf16.mxu1 %v5878_v28  ;;  %v230_v27 = vld [vmem:[%s9625_s1 + $0x610] sm:$0xff]  ;;  %v5950_v28 = vcombine.high %v238_v20, %v242_v22  ;;  %v5814_v33 = vcombine.high %v102_v25, %v106_v26  ;;  %v5813_v39 = vcombine.low %v102_v25, %v106_v26  ;;  %v51_v25 = vld [vmem:[%s9625_s1 + $0x78] sm:$0xff] }
  0xc3   :  { %v5941_v40 = vcombine.low %v230_v27, %v234_v29  ;;  %v302_v22 = vld [vmem:[%s9625_s1 + $0x850] sm:$0xff] }
  0xc4   :  { %2277 = vmatpush1.bf16.msra.mxu0 %v5749_v34  ;;  %v350_v34 = vld [vmem:[%s9625_s1 + $0x9d0] sm:$0xff] }
  0xc5   :  { %2318 = vmatpush1.bf16.msra.mxu1 %v5877_v35  ;;  %2278 = vmatprep.subr.bf16.mxu0 %v5870_v36  ;;  %v354_v35 = vld [vmem:[%s9625_s1 + $0x9f0] sm:$0xff]  ;;  %v95_v36 = vld [vmem:[%s9625_s1 + $0x1d8] sm:$0xff] }
  0xc6   :  { %2319 = vmatprep.subr.bf16.mxu1 %v5998_v37  ;;  %v5942_v37 = vcombine.high %v230_v27, %v234_v29  ;;  %v6062_v41 = vcombine.high %v350_v34, %v354_v35  ;;  %v5808_v45 = vcombine.high %v95_v36, %v99_v38  ;;  %v5807_v48 = vcombine.low %v95_v36, %v99_v38 }
  0xc7   :  { %v358_v27 = vlaneseq }
  0xc8   :  { %2279 = vmatpush2.bf16.msra.mxu0 %v5869_v42  ;;  %v342_v42 = vld [vmem:[%s9625_s1 + $0x990] sm:$0xff] }
  0xc9   :  { %2320 = vmatpush2.bf16.msra.mxu1 %v5997_v43  ;;  %2280 = vmatprep.subr.bf16.mxu0 %v5862_v44  ;;  %v346_v43 = vld [vmem:[%s9625_s1 + $0x9b0] sm:$0xff]  ;;  %v87_v44 = vld [vmem:[%s9625_s1 + $0x198] sm:$0xff] }
  0xca   :  { %2321 = vmatprep.subr.bf16.mxu1 %v5990_v47  ;;  %v6061_v47 = vcombine.low %v350_v34, %v354_v35  ;;  %v6054_v49 = vcombine.high %v342_v42, %v346_v43  ;;  %v6053_v56 = vcombine.low %v342_v42, %v346_v43  ;;  %v5799_v57 = vcombine.low %v87_v44, %v91_v46  ;;  %v43_v35 = vld [vmem:[%s9625_s1 + $0x38] sm:$0xff] }
  0xcb   :  { %v223_v42 = vld [vmem:[%s9625_s1 + $0x5d8] sm:$0xff] }
  0xcc   :  { %2281 = vmatpush2.bf16.msra.mxu0 %v5861_v50  ;;  %v5800_v50 = vcombine.high %v87_v44, %v91_v46  ;;  %v227_v44 = vld [vmem:[%s9625_s1 + $0x5f8] sm:$0xff] }
  0xcd   :  { %2322 = vmatpush2.bf16.msra.mxu1 %v5989_v53  ;;  %2282 = vmatprep.subr.bf16.mxu0 %v5854_v51  ;;  %v334_v53 = vld [vmem:[%s9625_s1 + $0x950] sm:$0xff] }
  0xce   :  { %2323 = vmatprep.subr.bf16.mxu1 %v5982_v52  ;;  %v338_v51 = vld [vmem:[%s9625_s1 + $0x970] sm:$0xff]  ;;  %v79_v52 = vld [vmem:[%s9625_s1 + $0x158] sm:$0xff] }
  0xcf   :  { %v6046_v60 = vcombine.high %v334_v53, %v338_v51  ;;  %v6045_v2 = vcombine.low %v334_v53, %v338_v51  ;;  %v5791_v3 = vcombine.low %v79_v52, %v83_v55  ;;  %v155_v53 = vld [vmem:[%s9625_s1 + $0x3b8] sm:$0xff] }
  0xd0   :  { %2283 = vmatpush2.bf16.msra.mxu0 %v5853_v61  ;;  %v5792_v61 = vcombine.high %v79_v52, %v83_v55  ;;  %v215_v51 = vld [vmem:[%s9625_s1 + $0x598] sm:$0xff] }
  0xd1   :  { %2324 = vmatpush2.bf16.msra.mxu1 %v5981_v62  ;;  %2284 = vmatprep.subr.bf16.mxu0 %v5846_v63  ;;  %v326_v62 = vld [vmem:[%s9625_s1 + $0x910] sm:$0xff]  ;;  %v219_v55 = vld [vmem:[%s9625_s1 + $0x5b8] sm:$0xff] }
  0xd2   :  { %2325 = vmatprep.subr.bf16.mxu1 %v5974_v0  ;;  %v330_v63 = vld [vmem:[%s9625_s1 + $0x930] sm:$0xff]  ;;  %v71_v0 = vld [vmem:[%s9625_s1 + $0x118] sm:$0xff] }
  0xd3   :  { %v6038_v4 = vcombine.high %v326_v62, %v330_v63  ;;  %v6037_v9 = vcombine.low %v326_v62, %v330_v63  ;;  %v5783_v10 = vcombine.low %v71_v0, %v75_v1  ;;  %v5928_v63 = vcombine.high %v215_v51, %v219_v55 }
  0xd4   :  { %2285 = vmatpush2.bf16.msra.mxu0 %v5845_v5  ;;  %v5784_v5 = vcombine.high %v71_v0, %v75_v1  ;;  %v143_v0 = vld [vmem:[%s9625_s1 + $0x358] sm:$0xff] }
  0xd5   :  { %2326 = vmatpush2.bf16.msra.mxu1 %v5973_v6  ;;  %2286 = vmatprep.subr.bf16.mxu0 %v5838_v7  ;;  %v318_v6 = vld [vmem:[%s9625_s1 + $0x8d0] sm:$0xff]  ;;  %v147_v1 = vld [vmem:[%s9625_s1 + $0x378] sm:$0xff] }
  0xd6   :  { %2327 = vmatprep.subr.bf16.mxu1 %v5966_v11  ;;  %v322_v7 = vld [vmem:[%s9625_s1 + $0x8f0] sm:$0xff] }
  0xd7   :  { %v6030_v11 = vcombine.high %v318_v6, %v322_v7  ;;  %v6029_v18 = vcombine.low %v318_v6, %v322_v7  ;;  %v5927_v7 = vcombine.low %v215_v51, %v219_v55  ;;  %v103_v55 = vld [vmem:[%s9625_s1 + $0x218] sm:$0xff] }
  0xd8   :  { %2287 = vmatpush2.bf16.msra.mxu0 %v5837_v13  ;;  %v310_v13 = vld [vmem:[%s9625_s1 + $0x890] sm:$0xff] }
  0xd9   :  { %2328 = vmatpush2.bf16.msra.mxu1 %v5965_v14  ;;  %2288 = vmatprep.subr.bf16.mxu0 %v5830_v15  ;;  %v314_v14 = vld [vmem:[%s9625_s1 + $0x8b0] sm:$0xff]  ;;  %v55_v15 = vld [vmem:[%s9625_s1 + $0x98] sm:$0xff] }
  0xda   :  { %2329 = vmatprep.subr.bf16.mxu1 %v5958_v21  ;;  %v6022_v21 = vcombine.high %v310_v13, %v314_v14  ;;  %v6021_v26 = vcombine.low %v310_v13, %v314_v14  ;;  %v203_v13 = vld [vmem:[%s9625_s1 + $0x538] sm:$0xff] }
  0xdc   :  { %2289 = vmatpush2.bf16.msra.mxu0 %v5829_v23  ;;  %v306_v23 = vld [vmem:[%s9625_s1 + $0x870] sm:$0xff] }
  0xdd   :  { %2330 = vmatpush2.bf16.msra.mxu1 %v5957_v24  ;;  %2290 = vmatprep.subr.bf16.mxu0 %v5822_v54  ;;  %v47_v24 = vld [vmem:[%s9625_s1 + $0x58] sm:$0xff]  ;;  %v5768_v54 = vcombine.high %v55_v15, %v59_v17  ;;  %v6014_v29 = vcombine.high %v302_v22, %v306_v23  ;;  %v6013_v36 = vcombine.low %v302_v22, %v306_v23 }
  0xde   :  { %2331 = vmatprep.subr.bf16.mxu1 %v5950_v28  ;;  %v5767_v28 = vcombine.low %v55_v15, %v59_v17  ;;  %v5760_v34 = vcombine.high %v47_v24, %v51_v25  ;;  %v5759_v38 = vcombine.low %v47_v24, %v51_v25  ;;  %v5856_v15 = vcombine.high %v143_v0, %v147_v1  ;;  %v195_v22 = vld [vmem:[%s9625_s1 + $0x4f8] sm:$0xff] }
  0xdf   :  { %v5855_v24 = vcombine.low %v143_v0, %v147_v1  ;;  %v127_v25 = vld [vmem:[%s9625_s1 + $0x2d8] sm:$0xff] }
  0xe0   :  { %2291 = vmatpush2.bf16.msra.mxu0 %v5821_v30  ;;  %v294_v30 = vld [vmem:[%s9625_s1 + $0x810] sm:$0xff]  ;;  %v351_v1 = vld [vmem:[%s9625_s1 + $0x9d8] sm:$0xff] }
  0xe1   :  { %2332 = vmatpush2.bf16.msra.mxu1 %v5949_v31  ;;  %2292 = vmatprep.subr.bf16.mxu0 %v5814_v33  ;;  %v298_v31 = vld [vmem:[%s9625_s1 + $0x830] sm:$0xff]  ;;  %v39_v33 = vld [vmem:[%s9625_s1 + $0x18] sm:$0xff] }
  0xe2   :  { %2333 = vmatprep.subr.bf16.mxu1 %v5942_v37  ;;  %v8014_v37 = vshrl.u32 %v358_v27, 7  ;;  %v5752_v43 = vcombine.high %v39_v33, %v43_v35  ;;  %v6005_v46 = vcombine.low %v294_v30, %v298_v31 }
  0xe4   :  { %2293 = vmatpush2.bf16.msra.mxu0 %v5813_v39  ;;  %v6006_v39 = vcombine.high %v294_v30, %v298_v31  ;;  %v183_v30 = vld [vmem:[%s9625_s1 + $0x498] sm:$0xff] }
  0xe5   :  { %2334 = vmatpush2.bf16.msra.mxu1 %v5941_v40  ;;  %2344 = vmatprep.subr.bf16.mxu0 %v6062_v41  ;;  %v159_v40 = vld [vmem:[%s9625_s1 + $0x3d8] sm:$0xff] }
  0xe6   :  { %2385 = vmatprep.subr.bf16.mxu1 %v5808_v45  ;;  %v163_v41 = vld [vmem:[%s9625_s1 + $0x3f8] sm:$0xff]  ;;  %v8031_v45 = vld [vmem:[%s9628_s2] sm:$0xff] }
  0xe7   :  { %2295 = vmatmul.mubr.bf16.vlgmr.msra.gmra.mxu0 %v7429_v16  ;;  %v5872_v52 = vcombine.high %v159_v40, %v163_v41  ;;  %v5871_v62 = vcombine.low %v159_v40, %v163_v41  ;;  %v187_v31 = vld [vmem:[%s9625_s1 + $0x4b8] sm:$0xff] }
  0xe8   :  { %2336 = vmatmul.mubr.bf16.vlgmr.msra.gmra.mxu1 %v7439_v19  ;;  %2345 = vmatpush1.bf16.msra.mxu0 %v6061_v47  ;;  %v8034_v47 = vsub.s32 0, %v8014_v37  ;;  %v175_v40 = vld [vmem:[%s9625_s1 + $0x458] sm:$0xff] }
  0xe9   :  { %2386 = vmatpush1.bf16.msra.mxu1 %v5807_v48  ;;  %2346 = vmatprep.subr.bf16.mxu0 %v6054_v49  ;;  %v5751_v48 = vcombine.low %v39_v33, %v43_v35  ;;  %v5936_v49 = vcombine.high %v223_v42, %v227_v44  ;;  %v119_v35 = vld [vmem:[%s9625_s1 + $0x298] sm:$0xff] }
  0xea   :  { %2387 = vmatprep.subr.bf16.mxu1 %v5800_v50  ;;  %2376 = vmatprep.mubr.bf16.mxu0 %v7146_v32  ;;  %v151_v50 = vld [vmem:[%s9625_s1 + $0x398] sm:$0xff] }
  0xeb   :  { %2417 = vmatprep.mubr.bf16.mxu1 %v7299_v58  ;;  %v63_v58 = vld [vmem:[%s9625_s1 + $0xd8] sm:$0xff] }
  0xec   :  { %2347 = vmatpush1.bf16.msra.mxu0 %v6053_v56  ;;  %v5776_v12 = vcombine.high %v63_v58, %v67_v8  ;;  %v5775_v20 = vcombine.low %v63_v58, %v67_v8  ;;  %v361_v56 = vrot.slane %v8031_v45, %v8034_v47  ;;  %v199_v58 = vld [vmem:[%s9625_s1 + $0x518] sm:$0xff] }
  0xed   :  { %2388 = vmatpush1.bf16.msra.mxu1 %v5799_v57  ;;  %2348 = vmatprep.subr.bf16.mxu0 %v6046_v60  ;;  %v5935_v57 = vcombine.low %v223_v42, %v227_v44  ;;  %v207_v60 = vld [vmem:[%s9625_s1 + $0x558] sm:$0xff] }
  0xee   :  { %2389 = vmatprep.subr.bf16.mxu1 %v5792_v61  ;;  %v211_v61 = vld [vmem:[%s9625_s1 + $0x578] sm:$0xff] }
  0xef   :  { %v179_v41 = vld [vmem:[%s9625_s1 + $0x478] sm:$0xff] }
  0xf0   :  { %2349 = vmatpush1.bf16.msra.mxu0 %v6045_v2  ;;  %v5864_v2 = vcombine.high %v151_v50, %v155_v53  ;;  %v111_v44 = vld [vmem:[%s9625_s1 + $0x258] sm:$0xff] }
  0xf1   :  { %2390 = vmatpush1.bf16.msra.mxu1 %v5791_v3  ;;  %2350 = vmatprep.subr.bf16.mxu0 %v6038_v4  ;;  %v8065_v4 = vld [vmem:[%s9626_s0 + $0x10] ss:$0 sps:$4 sm:$0xff]  }
  0xf2   :  { %2391 = vmatprep.subr.bf16.mxu1 %v5784_v5 }
  0xf4   :  { %2351 = vmatpush1.bf16.msra.mxu0 %v6037_v9  ;;  %v5863_v9 = vcombine.low %v151_v50, %v155_v53  ;;  %v167_v50 = vld [vmem:[%s9625_s1 + $0x418] sm:$0xff] }
  0xf5   :  { %2392 = vmatpush1.bf16.msra.mxu1 %v5783_v10  ;;  %2352 = vmatprep.subr.bf16.mxu0 %v6030_v11  ;;  %v5920_v10 = vcombine.high %v207_v60, %v211_v61  ;;  %v135_v11 = vld [vmem:[%s9625_s1 + $0x318] sm:$0xff] }
  0xf6   :  { %2393 = vmatprep.subr.bf16.mxu1 %v5776_v12  ;;  %v139_v12 = vld [vmem:[%s9625_s1 + $0x338] sm:$0xff] }
  0xf7   :  { %v5847_v33 = vcombine.low %v135_v11, %v139_v12  ;;  %v171_v53 = vld [vmem:[%s9625_s1 + $0x438] sm:$0xff] }
  0xf8   :  { %2353 = vmatpush1.bf16.msra.mxu0 %v6029_v18  ;;  %v5880_v0 = vcombine.high %v167_v50, %v171_v53 }
  0xf9   :  { %2394 = vmatpush1.bf16.msra.mxu1 %v5775_v20  ;;  %2354 = vmatprep.subr.bf16.mxu0 %v6022_v21  ;;  %v5919_v20 = vcombine.low %v207_v60, %v211_v61  ;;  %v191_v21 = vld [vmem:[%s9625_s1 + $0x4d8] sm:$0xff]  ;;  %v5887_v60 = vcombine.low %v175_v40, %v179_v41 }
  0xfa   :  { %2395 = vmatprep.subr.bf16.mxu1 %v5768_v54  ;;  %v5912_v54 = vcombine.high %v199_v58, %v203_v13  ;;  %v287_v61 = vld [vmem:[%s9625_s1 + $0x7d8] sm:$0xff] }
  0xfc   :  { %2355 = vmatpush1.bf16.msra.mxu0 %v6021_v26  ;;  %v131_v26 = vld [vmem:[%s9625_s1 + $0x2f8] sm:$0xff] }
  0xfd   :  { %2396 = vmatpush1.bf16.msra.mxu1 %v5767_v28  ;;  %2356 = vmatprep.subr.bf16.mxu0 %v6014_v29  ;;  %v5848_v28 = vcombine.high %v135_v11, %v139_v12  ;;  %v5911_v29 = vcombine.low %v199_v58, %v203_v13  ;;  %v5839_v42 = vcombine.low %v127_v25, %v131_v26  ;;  %v347_v11 = vld [vmem:[%s9625_s1 + $0x9b8] sm:$0xff] }
  0xfe   :  { %2397 = vmatprep.subr.bf16.mxu1 %v5760_v34  ;;  %v5904_v34 = vcombine.high %v191_v21, %v195_v22 }
 0x100   :  { %2357 = vmatpush1.bf16.msra.mxu0 %v6013_v36  ;;  %v123_v36 = vld [vmem:[%s9625_s1 + $0x2b8] sm:$0xff] }
 0x101   :  { %2398 = vmatpush1.bf16.msra.mxu1 %v5759_v38  ;;  %2358 = vmatprep.subr.bf16.mxu0 %v6006_v39  ;;  %v5840_v38 = vcombine.high %v127_v25, %v131_v26  ;;  %v5903_v39 = vcombine.low %v191_v21, %v195_v22  ;;  %v5831_v51 = vcombine.low %v119_v35, %v123_v36  ;;  %v335_v21 = vld [vmem:[%s9625_s1 + $0x958] sm:$0xff] }
 0x102   :  { %2399 = vmatprep.subr.bf16.mxu1 %v5752_v43  ;;  %v5896_v43 = vcombine.high %v183_v30, %v187_v31  ;;  %v263_v26 = vld [vmem:[%s9625_s1 + $0x718] sm:$0xff] }
 0x104   :  { %2359 = vmatpush1.bf16.msra.mxu0 %v6005_v46  ;;  %v115_v46 = vld [vmem:[%s9625_s1 + $0x278] sm:$0xff] }
 0x105   :  { %2400 = vmatpush1.bf16.msra.mxu1 %v5751_v48  ;;  %2426 = vmatprep.subr.bf16.mxu0 %v5936_v49  ;;  %v5832_v48 = vcombine.high %v119_v35, %v123_v36  ;;  %v5895_v49 = vcombine.low %v183_v30, %v187_v31 }
 0x106   :  { %2401 = vmatprep.subr.bf16.mxu1 %v5872_v52  ;;  %v5888_v52 = vcombine.high %v175_v40, %v179_v41  ;;  %v255_v40 = vld [vmem:[%s9625_s1 + $0x6d8] sm:$0xff] }
 0x107   :  { %v2050_v3 = vpop.f32.mrf.mxu0  ;;  %2377 = vmatmul.mubr.bf16.vlgmr.msra.gmra.mxu0 %v8065_v4  ;;  %v319_v41 = vld [vmem:[%s9625_s1 + $0x8d8] sm:$0xff] }
 0x108   :  { %v2051_v5 = vadd.f32 %v2050_v3, %v361_v56  ;;  %v2091_v6 = vpop.f32.mrf.mxu1  ;;  %2427 = vmatpush1.bf16.msra.mxu0 %v5935_v57  ;;  %2458 = vmatprep.mubr.bf16.mxu0 %v7303_v59  ;;  %v107_v56 = vld [vmem:[%s9625_s1 + $0x238] sm:$0xff]  ;;  %v5824_v57 = vcombine.high %v111_v44, %v115_v46 }
 0x109   :  { %2402 = vmatpush2.bf16.msra.mxu1 %v5871_v62  ;;  %v8072_v8 = vpop.f32.mrf.mxu0  ;;  %2428 = vmatprep.subr.bf16.mxu0 %v5928_v63  ;;  %v291_v62 = vld [vmem:[%s9625_s1 + $0x7f8] sm:$0xff]  ;;  %v5823_v63 = vcombine.low %v111_v44, %v115_v46  ;;  %v5816_v3 = vcombine.high %v103_v55, %v107_v56  ;;  %v5815_v58 = vcombine.low %v103_v55, %v107_v56 }
 0x10a   :  { %v8083_v14 = vadd.f32 %v2091_v6, %v2051_v5  ;;  %v8085_v59 = vpop.f32.mrf.mxu1  ;;  %2403 = vmatprep.subr.bf16.mxu1 %v5864_v2  ;;  %v355_v2 = vld [vmem:[%s9625_s1 + $0x9f8] sm:$0xff]  ;;  %v5879_v5 = vcombine.low %v167_v50, %v171_v53  ;;  %v5999_v13 = vcombine.low %v287_v61, %v291_v62 }
 0x10b   :  { %v2054_v17 = vpop.f32.mrf.mxu0  ;;  %v279_v6 = vld [vmem:[%s9625_s1 + $0x798] sm:$0xff]  ;;  %v6064_v12 = vcombine.high %v351_v1, %v355_v2 }
 0x10c   :  { %v2095_v18 = vpop.f32.mrf.mxu1  ;;  %2429 = vmatpush1.bf16.msra.mxu0 %v5927_v7  ;;  %v283_v7 = vld [vmem:[%s9625_s1 + $0x7b8] sm:$0xff] }
 0x10d   :  { %2404 = vmatpush2.bf16.msra.mxu1 %v5863_v9  ;;  %v2055_v23 = vpop.f32.mrf.mxu0  ;;  %2430 = vmatprep.subr.bf16.mxu0 %v5920_v10  ;;  %v6000_v9 = vcombine.high %v287_v61, %v291_v62  ;;  %v343_v10 = vld [vmem:[%s9625_s1 + $0x998] sm:$0xff]  ;;  %v6063_v18 = vcombine.low %v351_v1, %v355_v2  ;;  %v5991_v25 = vcombine.low %v279_v6, %v283_v7 }
 0x10e   :  { %v2096_v27 = vpop.f32.mrf.mxu1  ;;  %2405 = vmatprep.subr.bf16.mxu1 %v5856_v15  ;;  %v271_v15 = vld [vmem:[%s9625_s1 + $0x758] sm:$0xff]  ;;  %v6056_v22 = vcombine.high %v343_v10, %v347_v11 }
 0x10f   :  { %v275_v17 = vld [vmem:[%s9625_s1 + $0x778] sm:$0xff] }
 0x110   :  { %2431 = vmatpush1.bf16.msra.mxu0 %v5919_v20  ;;  %v5992_v20 = vcombine.high %v279_v6, %v283_v7  ;;  %v267_v27 = vld [vmem:[%s9625_s1 + $0x738] sm:$0xff]  ;;  %v5984_v30 = vcombine.high %v271_v15, %v275_v17 }
 0x111   :  { %2406 = vmatpush2.bf16.msra.mxu1 %v5855_v24  ;;  %2432 = vmatprep.subr.bf16.mxu0 %v5912_v54  ;;  %v339_v24 = vld [vmem:[%s9625_s1 + $0x978] sm:$0xff] }
 0x112   :  { %2407 = vmatprep.subr.bf16.mxu1 %v5848_v28  ;;  %v6047_v36 = vcombine.low %v335_v21, %v339_v24  ;;  %v247_v44 = vld [vmem:[%s9625_s1 + $0x698] sm:$0xff] }
 0x113   :  { %v251_v46 = vld [vmem:[%s9625_s1 + $0x6b8] sm:$0xff] }
 0x114   :  { %2433 = vmatpush1.bf16.msra.mxu0 %v5911_v29  ;;  %v6055_v29 = vcombine.low %v343_v10, %v347_v11  ;;  %v311_v53 = vld [vmem:[%s9625_s1 + $0x898] sm:$0xff]  ;;  %v5960_v62 = vcombine.high %v247_v44, %v251_v46  ;;  %v5959_v2 = vcombine.low %v247_v44, %v251_v46  ;;  %v6564_v44 = vld [vmem:[%s9627_s3 + $0x44] ss:$16 sps:$4 sm:$0xff]  }
 0x115   :  { %2408 = vmatpush2.bf16.msra.mxu1 %v5847_v33  ;;  %2434 = vmatprep.subr.bf16.mxu0 %v5904_v34  ;;  %v331_v33 = vld [vmem:[%s9625_s1 + $0x938] sm:$0xff]  ;;  %v5983_v34 = vcombine.low %v271_v15, %v275_v17  ;;  %v6567_v46 = vld [vmem:[%s9627_s3 + $0x244] ss:$16 sps:$4 sm:$0xff]  }
 0x116   :  { %2409 = vmatprep.subr.bf16.mxu1 %v5840_v38  ;;  %v5976_v38 = vcombine.high %v263_v26, %v267_v27  ;;  %v239_v56 = vld [vmem:[%s9625_s1 + $0x658] sm:$0xff] }
 0x117   :  { %v295_v10 = vld [vmem:[%s9625_s1 + $0x818] sm:$0xff] }
 0x118   :  { %2435 = vmatpush1.bf16.msra.mxu0 %v5903_v39 }
 0x119   :  { %2410 = vmatpush2.bf16.msra.mxu1 %v5839_v42  ;;  %2436 = vmatprep.subr.bf16.mxu0 %v5896_v43  ;;  %v323_v42 = vld [vmem:[%s9625_s1 + $0x8f8] sm:$0xff]  ;;  %v5975_v43 = vcombine.low %v263_v26, %v267_v27  ;;  %v6540_v26 = vld [vmem:[%s9627_s3 + $0xc4] ss:$16 sps:$4 sm:$0xff]  }
 0x11a   :  { %2411 = vmatprep.subr.bf16.mxu1 %v5832_v48  ;;  %v8209_v48 = vsub.s32 1, %v8014_v37  ;;  %v6031_v61 = vcombine.low %v319_v41, %v323_v42  ;;  %v6543_v27 = vld [vmem:[%s9627_s3 + $0x2c4] ss:$16 sps:$4 sm:$0xff]  }
 0x11c   :  { %2437 = vmatpush1.bf16.msra.mxu0 %v5895_v49 }
 0x11d   :  { %2412 = vmatpush2.bf16.msra.mxu1 %v5831_v51  ;;  %2438 = vmatprep.subr.bf16.mxu0 %v5888_v52  ;;  %v315_v51 = vld [vmem:[%s9625_s1 + $0x8b8] sm:$0xff]  ;;  %v6032_v52 = vcombine.high %v319_v41, %v323_v42  ;;  %v6561_v41 = vld [vmem:[%s9627_s3 + $0x264] ss:$16 sps:$4 sm:$0xff]   ;;  %v6556_v42 = vld [vmem:[%s9627_s3 + $0x60] ss:$16 sps:$4 sm:$0xff]  }
 0x11e   :  { %2413 = vmatprep.subr.bf16.mxu1 %v5824_v57  ;;  %v243_v57 = vld [vmem:[%s9625_s1 + $0x678] sm:$0xff]  ;;  %v6024_v1 = vcombine.high %v311_v53, %v315_v51 }
 0x11f   :  { %v5952_v6 = vcombine.high %v239_v56, %v243_v57  ;;  %v5951_v11 = vcombine.low %v239_v56, %v243_v57  ;;  %v6576_v56 = vld [vmem:[%s9627_s3 + $0x4] ss:$16 sps:$4 sm:$0xff]  }
 0x120   :  { %2439 = vmatpush1.bf16.msra.mxu0 %v5887_v60  ;;  %v365_v60 = vrot.slane %v8031_v45, %v8209_v48  ;;  %v6579_v57 = vld [vmem:[%s9627_s3 + $0x204] ss:$16 sps:$4 sm:$0xff]  }
 0x121   :  { %2414 = vmatpush2.bf16.msra.mxu1 %v5823_v63  ;;  %2440 = vmatprep.subr.bf16.mxu0 %v5880_v0  ;;  %v303_v63 = vld [vmem:[%s9625_s1 + $0x858] sm:$0xff] }
 0x122   :  { %2415 = vmatprep.subr.bf16.mxu1 %v5816_v3  ;;  %v307_v0 = vld [vmem:[%s9625_s1 + $0x878] sm:$0xff]  ;;  %v2053_v3 = vadd.f32 %v8072_v8, %v365_v60  ;;  %v8346_v60 = vsub.s32 3, %v8014_v37 }
 0x123   :  { %v6016_v7 = vcombine.high %v303_v63, %v307_v0  ;;  %v299_v8 = vld [vmem:[%s9625_s1 + $0x838] sm:$0xff] }
 0x124   :  { %2441 = vmatpush1.bf16.msra.mxu0 %v5879_v5  ;;  %v6023_v5 = vcombine.low %v311_v53, %v315_v51  ;;  %v6008_v17 = vcombine.high %v295_v10, %v299_v8  ;;  %v6570_v53 = vld [vmem:[%s9627_s3 + $0x24] ss:$16 sps:$4 sm:$0xff]  }
 0x125   :  { %2416 = vmatpush2.bf16.msra.mxu1 %v5815_v58  ;;  %2442 = vmatprep.subr.bf16.mxu0 %v6000_v9  ;;  %v231_v58 = vld [vmem:[%s9625_s1 + $0x618] sm:$0xff]  ;;  %v6573_v51 = vld [vmem:[%s9627_s3 + $0x224] ss:$16 sps:$4 sm:$0xff]  }
 0x126   :  { %2467 = vmatprep.subr.bf16.mxu1 %v6064_v12  ;;  %v235_v9 = vld [vmem:[%s9625_s1 + $0x638] sm:$0xff]  ;;  %v2094_v12 = vadd.f32 %v8085_v59, %v2053_v3  ;;  %v6537_v59 = vld [vmem:[%s9627_s3 + $0x2e4] ss:$16 sps:$4 sm:$0xff]   ;;  %v6583_v3 = vld [vmem:[%s9627_s3 + $0x3e0] ss:$16 sps:$4 sm:$0xff]  }
 0x127   :  { %v2132_v23 = vpop.f32.mrf.mxu0  ;;  %v5944_v15 = vcombine.high %v231_v58, %v235_v9 }
 0x128   :  { %v8172_v54 = vadd.f32 %v2132_v23, %v8083_v14  ;;  %2418 = vmatmul.mubr.bf16.vlgmr.msra.gmra.mxu1 %v7429_v16  ;;  %2443 = vmatpush2.bf16.msra.mxu0 %v5999_v13  ;;  %v327_v16 = vld [vmem:[%s9625_s1 + $0x918] sm:$0xff]  ;;  %v6048_v14 = vcombine.high %v335_v21, %v339_v24  ;;  %v6015_v13 = vcombine.low %v303_v63, %v307_v0  ;;  %v6532_v24 = vld [vmem:[%s9627_s3 + $0xe0] ss:$16 sps:$4 sm:$0xff]   ;;  %v6582_v63 = vld [vmem:[%s9627_s3 + $0x1e4] ss:$16 sps:$4 sm:$0xff]  }
 0x129   :  { %2468 = vmatpush1.bf16.msra.mxu1 %v6063_v18  ;;  %v8181_v28 = vpop.f32.mrf.mxu0  ;;  %2444 = vmatprep.subr.bf16.mxu0 %v5992_v20  ;;  %v6040_v39 = vcombine.high %v327_v16, %v331_v33  ;;  %v6039_v49 = vcombine.low %v327_v16, %v331_v33  ;;  %v5943_v20 = vcombine.low %v231_v58, %v235_v9  ;;  %v6541_v16 = vld [vmem:[%s9627_s3 + $0x2c0] ss:$16 sps:$4 sm:$0xff]   ;;  %v6585_v0 = vld [vmem:[%s9627_s3 + $0x3e4] ss:$16 sps:$4 sm:$0xff]  }
 0x12a   :  { %2469 = vmatprep.subr.bf16.mxu1 %v6056_v22  ;;  %2499 = vmatprep.mubr.bf16.mxu1 %v7146_v32  ;;  %v259_v32 = vld [vmem:[%s9625_s1 + $0x6f8] sm:$0xff]  ;;  %v2135_v18 = vadd.f32 %v8181_v28, %v2094_v12  ;;  %v6007_v21 = vcombine.low %v295_v10, %v299_v8  ;;  %v6534_v22 = vld [vmem:[%s9627_s3 + $0xe4] ss:$16 sps:$4 sm:$0xff]   ;;  %v6544_v33 = vld [vmem:[%s9627_s3 + $0xa0] ss:$16 sps:$4 sm:$0xff]  }
 0x12b   :  { %v2136_v31 = vpop.f32.mrf.mxu0  ;;  %v5968_v50 = vcombine.high %v255_v40, %v259_v32  ;;  %v5967_v55 = vcombine.low %v255_v40, %v259_v32  ;;  %v6553_v40 = vld [vmem:[%s9627_s3 + $0x280] ss:$16 sps:$4 sm:$0xff]   ;;  %v6558_v32 = vld [vmem:[%s9627_s3 + $0x64] ss:$16 sps:$4 sm:$0xff]  }
 0x12c   :  { %2445 = vmatpush2.bf16.msra.mxu0 %v5991_v25  ;;  %v2509_v23 = vmax.f32 %v2135_v18, 0.0  ;;  %v6535_v25 = vld [vmem:[%s9627_s3 + $0x2e0] ss:$16 sps:$4 sm:$0xff]   ;;  %v6594_v12 = vld [vmem:[%s9627_s3 + $0x1a4] ss:$16 sps:$4 sm:$0xff]  }
 0x12d   :  { %2470 = vmatpush1.bf16.msra.mxu1 %v6055_v29  ;;  %v2137_v35 = vpop.f32.mrf.mxu0  ;;  %2446 = vmatprep.subr.bf16.mxu0 %v5984_v30  ;;  %v6538_v30 = vld [vmem:[%s9627_s3 + $0xc0] ss:$16 sps:$4 sm:$0xff]  }
 0x12e   :  { %2471 = vmatprep.subr.bf16.mxu1 %v6048_v14  ;;  %v8264_v28 = vpack.c.bf16 %v2509_v23, %v2509_v23  ;;  %v6552_v35 = vld [vmem:[%s9627_s3 + $0x84] ss:$16 sps:$4 sm:$0xff]   ;;  %v6586_v10 = vld [vmem:[%s9627_s3 + $0x1c0] ss:$16 sps:$4 sm:$0xff]  }
 0x12f   :  { %v6595_v23 = vld [vmem:[%s9627_s3 + $0x3a0] ss:$16 sps:$4 sm:$0xff]  }
 0x130   :  { %2447 = vmatpush2.bf16.msra.mxu0 %v5983_v34  ;;  %v6547_v34 = vld [vmem:[%s9627_s3 + $0x2a0] ss:$16 sps:$4 sm:$0xff]  }
 0x131   :  { %2472 = vmatpush1.bf16.msra.mxu1 %v6047_v36  ;;  %2448 = vmatprep.subr.bf16.mxu0 %v5976_v38  ;;  %v6555_v38 = vld [vmem:[%s9627_s3 + $0x284] ss:$16 sps:$4 sm:$0xff]  }
 0x132   :  { %2473 = vmatprep.subr.bf16.mxu1 %v6040_v39  ;;  %v6550_v39 = vld [vmem:[%s9627_s3 + $0x80] ss:$16 sps:$4 sm:$0xff]  }
 0x134   :  { %2449 = vmatpush2.bf16.msra.mxu0 %v5975_v43  ;;  %v6559_v43 = vld [vmem:[%s9627_s3 + $0x260] ss:$16 sps:$4 sm:$0xff]  }
 0x135   :  { %2474 = vmatpush1.bf16.msra.mxu1 %v6039_v49  ;;  %2450 = vmatprep.subr.bf16.mxu0 %v5968_v50  ;;  %v6562_v49 = vld [vmem:[%s9627_s3 + $0x40] ss:$16 sps:$4 sm:$0xff]  }
 0x136   :  { %2475 = vmatprep.subr.bf16.mxu1 %v6032_v52  ;;  %v6565_v50 = vld [vmem:[%s9627_s3 + $0x240] ss:$16 sps:$4 sm:$0xff]  }
 0x137   :  { %v6568_v52 = vld [vmem:[%s9627_s3 + $0x20] ss:$16 sps:$4 sm:$0xff]  }
 0x138   :  { %2451 = vmatpush2.bf16.msra.mxu0 %v5967_v55  ;;  %v6571_v55 = vld [vmem:[%s9627_s3 + $0x220] ss:$16 sps:$4 sm:$0xff]  }
 0x139   :  { %2476 = vmatpush1.bf16.msra.mxu1 %v6031_v61  ;;  %2452 = vmatprep.subr.bf16.mxu0 %v5960_v62  ;;  %v6574_v61 = vld [vmem:[%s9627_s3] ss:$16 sps:$4 sm:$0xff]  }
 0x13a   :  { %2477 = vmatprep.subr.bf16.mxu1 %v6024_v1  ;;  %v6577_v62 = vld [vmem:[%s9627_s3 + $0x200] ss:$16 sps:$4 sm:$0xff]   ;;  %v373_v1 = vrot.slane %v8031_v45, %v8346_v60 }
 0x13c   :  { %2453 = vmatpush2.bf16.msra.mxu0 %v5959_v2  ;;  %v6580_v2 = vld [vmem:[%s9627_s3 + $0x1e0] ss:$16 sps:$4 sm:$0xff]  }
 0x13d   :  { %2478 = vmatpush1.bf16.msra.mxu1 %v6023_v5  ;;  %2454 = vmatprep.subr.bf16.mxu0 %v5952_v6  ;;  %v6588_v5 = vld [vmem:[%s9627_s3 + $0x1c4] ss:$16 sps:$4 sm:$0xff]  }
 0x13e   :  { %2479 = vmatprep.subr.bf16.mxu1 %v6016_v7  ;;  %v6591_v6 = vld [vmem:[%s9627_s3 + $0x3c4] ss:$16 sps:$4 sm:$0xff]  }
 0x140   :  { %2455 = vmatpush2.bf16.msra.mxu0 %v5951_v11  ;;  %v6589_v11 = vld [vmem:[%s9627_s3 + $0x3c0] ss:$16 sps:$4 sm:$0xff]  }
 0x141   :  { %2480 = vmatpush1.bf16.msra.mxu1 %v6015_v13  ;;  %2456 = vmatprep.subr.bf16.mxu0 %v5944_v15 }
 0x142   :  { %2481 = vmatprep.subr.bf16.mxu1 %v6008_v17  ;;  %v6597_v17 = vld [vmem:[%s9627_s3 + $0x3a4] ss:$16 sps:$4 sm:$0xff]  }
 0x144   :  { %2457 = vmatpush2.bf16.msra.mxu0 %v5943_v20 }
 0x145   :  { %2482 = vmatpush1.bf16.msra.mxu1 %v6007_v21  ;;  %4082 = vmatprep.subr.bf16.mxu0 %v6534_v22  ;;  %v6592_v22 = vld [vmem:[%s9627_s3 + $0x1a0] ss:$16 sps:$4 sm:$0xff]  }
 0x146   :  { %4123 = vmatprep.subr.bf16.mxu1 %v6537_v59 }
 0x147   :  { %2459 = vmatmul.mubr.bf16.vlgmr.msra.gmra.mxu0 %v7439_v19  ;;  %v6546_v19 = vld [vmem:[%s9627_s3 + $0xa4] ss:$16 sps:$4 sm:$0xff]  }
 0x148   :  { %v8267_v29 = vpop.f32.mrf.mxu1  ;;  %2500 = vmatmul.mubr.bf16.vlgmr.msra.gmra.mxu1 %v8065_v4  ;;  %4083 = vmatpush1.bf16.msra.mxu0 %v6532_v24  ;;  %v6549_v4 = vld [vmem:[%s9627_s3 + $0x2a4] ss:$16 sps:$4 sm:$0xff]  }
 0x149   :  { %4114 = vmatprep.mubr.bf16.mxu0 %v8264_v28  ;;  %4124 = vmatpush1.bf16.msra.mxu1 %v6535_v25  ;;  %v6600_v24 = vld [vmem:[%s9627_s3 + $0x184] ss:$16 sps:$4 sm:$0xff]  }
 0x14a   :  { %v8280_v14 = vpop.f32.mrf.mxu1  ;;  %4084 = vmatprep.subr.bf16.mxu0 %v6540_v26  ;;  %4125 = vmatprep.subr.bf16.mxu1 %v6543_v27  ;;  %v6603_v27 = vld [vmem:[%s9627_s3 + $0x384] ss:$16 sps:$4 sm:$0xff]  }
 0x14b   :  { %v2176_v58 = vadd.f32 %v8280_v14, %v373_v1  ;;  %v6601_v14 = vld [vmem:[%s9627_s3 + $0x380] ss:$16 sps:$4 sm:$0xff]  }
 0x14c   :  { %v2177_v31 = vpop.f32.mrf.mxu1  ;;  %4085 = vmatpush1.bf16.msra.mxu0 %v6538_v30  ;;  %v8400_v30 = vsub.s32 2, %v8014_v37  ;;  %v6631_v1 = vld [vmem:[%s9627_s3 + $0x4c0] ss:$16 sps:$4 sm:$0xff]  }
 0x14d   :  { %4126 = vmatpush1.bf16.msra.mxu1 %v6541_v16  ;;  %4086 = vmatprep.subr.bf16.mxu0 %v6546_v19  ;;  %v6598_v19 = vld [vmem:[%s9627_s3 + $0x180] ss:$16 sps:$4 sm:$0xff]   ;;  %v6609_v31 = vld [vmem:[%s9627_s3 + $0x364] ss:$16 sps:$4 sm:$0xff]  }
 0x14e   :  { %v2178_v36 = vpop.f32.mrf.mxu1  ;;  %4127 = vmatprep.subr.bf16.mxu1 %v6549_v4  ;;  %v6606_v4 = vld [vmem:[%s9627_s3 + $0x164] ss:$16 sps:$4 sm:$0xff]  }
 0x14f   :  { %v6612_v36 = vld [vmem:[%s9627_s3 + $0x144] ss:$16 sps:$4 sm:$0xff]  }
 0x150   :  { %4087 = vmatpush1.bf16.msra.mxu0 %v6544_v33  ;;  %v369_v33 = vrot.slane %v8031_v45, %v8400_v30  ;;  %v6615_v45 = vld [vmem:[%s9627_s3 + $0x344] ss:$16 sps:$4 sm:$0xff]  }
 0x151   :  { %4128 = vmatpush1.bf16.msra.mxu1 %v6547_v34  ;;  %4088 = vmatprep.subr.bf16.mxu0 %v6552_v35  ;;  %v6604_v34 = vld [vmem:[%s9627_s3 + $0x160] ss:$16 sps:$4 sm:$0xff]  }
 0x152   :  { %4129 = vmatprep.subr.bf16.mxu1 %v6555_v38  ;;  %v6607_v35 = vld [vmem:[%s9627_s3 + $0x360] ss:$16 sps:$4 sm:$0xff]   ;;  %v2174_v38 = vadd.f32 %v8267_v29, %v369_v33  ;;  %v6621_v29 = vld [vmem:[%s9627_s3 + $0x324] ss:$16 sps:$4 sm:$0xff]  }
 0x153   :  { %v6657_v33 = vld [vmem:[%s9627_s3 + $0x5c4] ss:$16 sps:$4 sm:$0xff]  }
 0x154   :  { %4089 = vmatpush1.bf16.msra.mxu0 %v6550_v39  ;;  %v6610_v39 = vld [vmem:[%s9627_s3 + $0x140] ss:$16 sps:$4 sm:$0xff]  }
 0x155   :  { %4130 = vmatpush1.bf16.msra.mxu1 %v6553_v40  ;;  %4090 = vmatprep.subr.bf16.mxu0 %v6558_v32  ;;  %v6613_v40 = vld [vmem:[%s9627_s3 + $0x340] ss:$16 sps:$4 sm:$0xff]   ;;  %v6618_v32 = vld [vmem:[%s9627_s3 + $0x124] ss:$16 sps:$4 sm:$0xff]  }
 0x156   :  { %4131 = vmatprep.subr.bf16.mxu1 %v6561_v41 }
 0x158   :  { %4091 = vmatpush1.bf16.msra.mxu0 %v6556_v42  ;;  %v6616_v42 = vld [vmem:[%s9627_s3 + $0x120] ss:$16 sps:$4 sm:$0xff]  }
 0x159   :  { %4132 = vmatpush1.bf16.msra.mxu1 %v6559_v43  ;;  %4092 = vmatprep.subr.bf16.mxu0 %v6564_v44  ;;  %v6619_v43 = vld [vmem:[%s9627_s3 + $0x320] ss:$16 sps:$4 sm:$0xff]   ;;  %v6624_v44 = vld [vmem:[%s9627_s3 + $0x104] ss:$16 sps:$4 sm:$0xff]  }
 0x15a   :  { %4133 = vmatprep.subr.bf16.mxu1 %v6567_v46 }
 0x15c   :  { %4093 = vmatpush1.bf16.msra.mxu0 %v6562_v49  ;;  %v6627_v49 = vld [vmem:[%s9627_s3 + $0x304] ss:$16 sps:$4 sm:$0xff]  }
 0x15d   :  { %4134 = vmatpush1.bf16.msra.mxu1 %v6565_v50  ;;  %4094 = vmatprep.subr.bf16.mxu0 %v6570_v53  ;;  %v6622_v50 = vld [vmem:[%s9627_s3 + $0x100] ss:$16 sps:$4 sm:$0xff]   ;;  %v2508_v53 = vmax.f32 %v8172_v54, 0.0 }
 0x15e   :  { %4135 = vmatprep.subr.bf16.mxu1 %v6573_v51  ;;  %v6625_v51 = vld [vmem:[%s9627_s3 + $0x300] ss:$16 sps:$4 sm:$0xff]  }
 0x15f   :  { %v6628_v54 = vld [vmem:[%s9627_s3 + $0x4e0] ss:$16 sps:$4 sm:$0xff]  }
 0x160   :  { %4095 = vmatpush1.bf16.msra.mxu0 %v6568_v52  ;;  %v6630_v52 = vld [vmem:[%s9627_s3 + $0x4e4] ss:$16 sps:$4 sm:$0xff]  }
 0x161   :  { %4136 = vmatpush1.bf16.msra.mxu1 %v6571_v55  ;;  %4096 = vmatprep.subr.bf16.mxu0 %v6576_v56  ;;  %v6681_v56 = vld [vmem:[%s9627_s3 + $0x6e4] ss:$16 sps:$4 sm:$0xff]  }
 0x162   :  { %4137 = vmatprep.subr.bf16.mxu1 %v6579_v57  ;;  %v8472_v57 = vpack.c.bf16 %v2508_v53, %v2508_v53 }
 0x164   :  { %4097 = vmatpush1.bf16.msra.mxu0 %v6574_v61  ;;  %v6633_v61 = vld [vmem:[%s9627_s3 + $0x4c4] ss:$16 sps:$4 sm:$0xff]  }
 0x165   :  { %4138 = vmatpush1.bf16.msra.mxu1 %v6577_v62  ;;  %4098 = vmatprep.subr.bf16.mxu0 %v6582_v63  ;;  %v6679_v62 = vld [vmem:[%s9627_s3 + $0x6e0] ss:$16 sps:$4 sm:$0xff]  }
 0x166   :  { %4139 = vmatprep.subr.bf16.mxu1 %v6585_v0  ;;  %v6687_v0 = vld [vmem:[%s9627_s3 + $0x6c4] ss:$16 sps:$4 sm:$0xff]  }
 0x167   :  { %v2214_v7 = vpop.f32.mrf.mxu0 }
 0x168   :  { %v2255_v9 = vpop.f32.mrf.mxu1  ;;  %4099 = vmatpush2.bf16.msra.mxu0 %v6580_v2  ;;  %v2215_v41 = vadd.f32 %v2214_v7, %v2174_v38  ;;  %v6636_v2 = vld [vmem:[%s9627_s3 + $0x4a4] ss:$16 sps:$4 sm:$0xff]   ;;  %v6655_v38 = vld [vmem:[%s9627_s3 + $0x5c0] ss:$16 sps:$4 sm:$0xff]  }
 0x169   :  { %4140 = vmatpush2.bf16.msra.mxu1 %v6583_v3  ;;  %v2216_v8 = vpop.f32.mrf.mxu0  ;;  %4100 = vmatprep.subr.bf16.mxu0 %v6588_v5  ;;  %v6685_v3 = vld [vmem:[%s9627_s3 + $0x6c0] ss:$16 sps:$4 sm:$0xff]   ;;  %v6693_v5 = vld [vmem:[%s9627_s3 + $0x6a4] ss:$16 sps:$4 sm:$0xff]  }
 0x16a   :  { %v2217_v13 = vadd.f32 %v2216_v8, %v2176_v58  ;;  %v2257_v15 = vpop.f32.mrf.mxu1  ;;  %4141 = vmatprep.subr.bf16.mxu1 %v6591_v6  ;;  %v2256_v46 = vadd.f32 %v2255_v9, %v2215_v41  ;;  %v6634_v6 = vld [vmem:[%s9627_s3 + $0x4a0] ss:$16 sps:$4 sm:$0xff]   ;;  %v6639_v7 = vld [vmem:[%s9627_s3 + $0x484] ss:$16 sps:$4 sm:$0xff]  }
 0x16b   :  { %v2218_v18 = vpop.f32.mrf.mxu0  ;;  %v6691_v58 = vld [vmem:[%s9627_s3 + $0x6a0] ss:$16 sps:$4 sm:$0xff]   ;;  %v6699_v9 = vld [vmem:[%s9627_s3 + $0x684] ss:$16 sps:$4 sm:$0xff]  }
 0x16c   :  { %v2258_v20 = vadd.f32 %v2257_v15, %v2217_v13  ;;  %v2259_v21 = vpop.f32.mrf.mxu1  ;;  %4101 = vmatpush2.bf16.msra.mxu0 %v6586_v10  ;;  %v2510_v55 = vmax.f32 %v2256_v46, 0.0  ;;  %v6637_v10 = vld [vmem:[%s9627_s3 + $0x480] ss:$16 sps:$4 sm:$0xff]   ;;  %v6642_v8 = vld [vmem:[%s9627_s3 + $0x464] ss:$16 sps:$4 sm:$0xff]  }
 0x16d   :  { %4142 = vmatpush2.bf16.msra.mxu1 %v6589_v11  ;;  %v2219_v59 = vpop.f32.mrf.mxu0  ;;  %4102 = vmatprep.subr.bf16.mxu0 %v6594_v12  ;;  %v6697_v11 = vld [vmem:[%s9627_s3 + $0x680] ss:$16 sps:$4 sm:$0xff]   ;;  %v6705_v12 = vld [vmem:[%s9627_s3 + $0x664] ss:$16 sps:$4 sm:$0xff]  }
 0x16e   :  { %v2511_v25 = vmax.f32 %v2258_v20, 0.0  ;;  %v2260_v26 = vpop.f32.mrf.mxu1  ;;  %4143 = vmatprep.subr.bf16.mxu1 %v6597_v17  ;;  %v8480_v63 = vpack.c.bf16 %v2510_v55, %v2510_v55  ;;  %v6640_v13 = vld [vmem:[%s9627_s3 + $0x460] ss:$16 sps:$4 sm:$0xff]   ;;  %v6645_v15 = vld [vmem:[%s9627_s3 + $0x444] ss:$16 sps:$4 sm:$0xff]  }
 0x16f   :  { %v6703_v17 = vld [vmem:[%s9627_s3 + $0x660] ss:$16 sps:$4 sm:$0xff]   ;;  %v6711_v18 = vld [vmem:[%s9627_s3 + $0x644] ss:$16 sps:$4 sm:$0xff]  }
 0x170   :  { %v8402_v16 = vpack.c.bf16 %v2511_v25, %v2511_v25  ;;  %4103 = vmatpush2.bf16.msra.mxu0 %v6592_v22  ;;  %v6643_v20 = vld [vmem:[%s9627_s3 + $0x440] ss:$16 sps:$4 sm:$0xff]   ;;  %v6648_v21 = vld [vmem:[%s9627_s3 + $0x424] ss:$16 sps:$4 sm:$0xff]  }
 0x171   :  { %4144 = vmatpush2.bf16.msra.mxu1 %v6595_v23  ;;  %4104 = vmatprep.subr.bf16.mxu0 %v6600_v24  ;;  %v6709_v22 = vld [vmem:[%s9627_s3 + $0x640] ss:$16 sps:$4 sm:$0xff]   ;;  %v6717_v59 = vld [vmem:[%s9627_s3 + $0x624] ss:$16 sps:$4 sm:$0xff]  }
 0x172   :  { %4155 = vmatprep.mubr.bf16.mxu1 %v8402_v16  ;;  %4145 = vmatprep.subr.bf16.mxu1 %v6603_v27  ;;  %v6646_v23 = vld [vmem:[%s9627_s3 + $0x420] ss:$16 sps:$4 sm:$0xff]   ;;  %v6651_v24 = vld [vmem:[%s9627_s3 + $0x404] ss:$16 sps:$4 sm:$0xff]  }
 0x173   :  { %v6715_v25 = vld [vmem:[%s9627_s3 + $0x620] ss:$16 sps:$4 sm:$0xff]   ;;  %v6723_v26 = vld [vmem:[%s9627_s3 + $0x604] ss:$16 sps:$4 sm:$0xff]  }
 0x174   :  { %4105 = vmatpush2.bf16.msra.mxu0 %v6598_v19  ;;  %v6649_v27 = vld [vmem:[%s9627_s3 + $0x400] ss:$16 sps:$4 sm:$0xff]   ;;  %v6654_v19 = vld [vmem:[%s9627_s3 + $0x5e4] ss:$16 sps:$4 sm:$0xff]  }
 0x175   :  { %4146 = vmatpush2.bf16.msra.mxu1 %v6601_v14  ;;  %4106 = vmatprep.subr.bf16.mxu0 %v6606_v4  ;;  %v6721_v14 = vld [vmem:[%s9627_s3 + $0x600] ss:$16 sps:$4 sm:$0xff]   ;;  %v6729_v4 = vld [vmem:[%s9627_s3 + $0x7e4] ss:$16 sps:$4 sm:$0xff]  }
 0x176   :  { %4147 = vmatprep.subr.bf16.mxu1 %v6609_v31  ;;  %v6652_v31 = vld [vmem:[%s9627_s3 + $0x5e0] ss:$16 sps:$4 sm:$0xff]   ;;  %v6666_v55 = vld [vmem:[%s9627_s3 + $0x564] ss:$16 sps:$4 sm:$0xff]  }
 0x178   :  { %4107 = vmatpush2.bf16.msra.mxu0 %v6604_v34  ;;  %v6727_v34 = vld [vmem:[%s9627_s3 + $0x7e0] ss:$16 sps:$4 sm:$0xff]  }
 0x179   :  { %4148 = vmatpush2.bf16.msra.mxu1 %v6607_v35  ;;  %4108 = vmatprep.subr.bf16.mxu0 %v6612_v36  ;;  %v6735_v35 = vld [vmem:[%s9627_s3 + $0x7c4] ss:$16 sps:$4 sm:$0xff]  }
 0x17a   :  { %4149 = vmatprep.subr.bf16.mxu1 %v6615_v45 }
 0x17c   :  { %4109 = vmatpush2.bf16.msra.mxu0 %v6610_v39 }
 0x17d   :  { %4150 = vmatpush2.bf16.msra.mxu1 %v6613_v40  ;;  %4110 = vmatprep.subr.bf16.mxu0 %v6618_v32  ;;  %v6660_v40 = vld [vmem:[%s9627_s3 + $0x5a4] ss:$16 sps:$4 sm:$0xff]   ;;  %v6733_v32 = vld [vmem:[%s9627_s3 + $0x7c0] ss:$16 sps:$4 sm:$0xff]  }
 0x17e   :  { %4151 = vmatprep.subr.bf16.mxu1 %v6621_v29  ;;  %v6741_v29 = vld [vmem:[%s9627_s3 + $0x7a4] ss:$16 sps:$4 sm:$0xff]  }
 0x180   :  { %4111 = vmatpush2.bf16.msra.mxu0 %v6616_v42 }
 0x181   :  { %4152 = vmatpush2.bf16.msra.mxu1 %v6619_v43  ;;  %4112 = vmatprep.subr.bf16.mxu0 %v6624_v44  ;;  %v6658_v44 = vld [vmem:[%s9627_s3 + $0x5a0] ss:$16 sps:$4 sm:$0xff]  }
 0x182   :  { %4153 = vmatprep.subr.bf16.mxu1 %v6627_v49  ;;  %v6663_v49 = vld [vmem:[%s9627_s3 + $0x584] ss:$16 sps:$4 sm:$0xff]  }
 0x184   :  { %4113 = vmatpush2.bf16.msra.mxu0 %v6622_v50  ;;  %v6739_v50 = vld [vmem:[%s9627_s3 + $0x7a0] ss:$16 sps:$4 sm:$0xff]  }
 0x185   :  { %4154 = vmatpush2.bf16.msra.mxu1 %v6625_v51  ;;  %4164 = vmatprep.subr.bf16.mxu0 %v6630_v52  ;;  %v6747_v51 = vld [vmem:[%s9627_s3 + $0x784] ss:$16 sps:$4 sm:$0xff]   ;;  %v6661_v52 = vld [vmem:[%s9627_s3 + $0x580] ss:$16 sps:$4 sm:$0xff]  }
 0x186   :  { %4205 = vmatprep.subr.bf16.mxu1 %v6681_v56  ;;  %v6745_v56 = vld [vmem:[%s9627_s3 + $0x780] ss:$16 sps:$4 sm:$0xff]  }
 0x187   :  { %4115 = vmatmul.mubr.bf16.vlgmr.msra.gmra.mxu0 %v8472_v57 }
 0x188   :  { %4156 = vmatmul.mubr.bf16.vlgmr.msra.gmra.mxu1 %v8480_v63  ;;  %4165 = vmatpush1.bf16.msra.mxu0 %v6628_v54  ;;  %v6753_v54 = vld [vmem:[%s9627_s3 + $0x764] ss:$16 sps:$4 sm:$0xff]  }
 0x189   :  { %4166 = vmatprep.subr.bf16.mxu0 %v6633_v61  ;;  %4206 = vmatpush1.bf16.msra.mxu1 %v6679_v62  ;;  %v6664_v61 = vld [vmem:[%s9627_s3 + $0x560] ss:$16 sps:$4 sm:$0xff]   ;;  %v6669_v62 = vld [vmem:[%s9627_s3 + $0x544] ss:$16 sps:$4 sm:$0xff]  }
 0x18a   :  { %4207 = vmatprep.subr.bf16.mxu1 %v6687_v0  ;;  %v6751_v0 = vld [vmem:[%s9627_s3 + $0x760] ss:$16 sps:$4 sm:$0xff]  }
 0x18c   :  { %4167 = vmatpush1.bf16.msra.mxu0 %v6631_v1  ;;  %v6759_v1 = vld [vmem:[%s9627_s3 + $0x744] ss:$16 sps:$4 sm:$0xff]  }
 0x18d   :  { %4168 = vmatprep.subr.bf16.mxu0 %v6636_v2  ;;  %4208 = vmatpush1.bf16.msra.mxu1 %v6685_v3  ;;  %v6667_v2 = vld [vmem:[%s9627_s3 + $0x540] ss:$16 sps:$4 sm:$0xff]   ;;  %v6672_v3 = vld [vmem:[%s9627_s3 + $0x524] ss:$16 sps:$4 sm:$0xff]  }
 0x18e   :  { %4209 = vmatprep.subr.bf16.mxu1 %v6693_v5  ;;  %v6757_v5 = vld [vmem:[%s9627_s3 + $0x740] ss:$16 sps:$4 sm:$0xff]  }
 0x190   :  { %4169 = vmatpush1.bf16.msra.mxu0 %v6634_v6  ;;  %v376_v6 = vsub.s32 4, %v8014_v37 }
 0x191   :  { %4170 = vmatprep.subr.bf16.mxu0 %v6639_v7  ;;  %4210 = vmatpush1.bf16.msra.mxu1 %v6691_v58  ;;  %v6765_v7 = vld [vmem:[%s9627_s3 + $0x724] ss:$16 sps:$4 sm:$0xff]   ;;  %v380_v58 = vsub.s32 5, %v8014_v37 }
 0x192   :  { %4211 = vmatprep.subr.bf16.mxu1 %v6699_v9  ;;  %v6670_v9 = vld [vmem:[%s9627_s3 + $0x520] ss:$16 sps:$4 sm:$0xff]  }
 0x194   :  { %4171 = vmatpush1.bf16.msra.mxu0 %v6637_v10  ;;  %v6675_v10 = vld [vmem:[%s9627_s3 + $0x504] ss:$16 sps:$4 sm:$0xff]  }
 0x195   :  { %4172 = vmatprep.subr.bf16.mxu0 %v6642_v8  ;;  %4212 = vmatpush1.bf16.msra.mxu1 %v6697_v11  ;;  %v6763_v8 = vld [vmem:[%s9627_s3 + $0x720] ss:$16 sps:$4 sm:$0xff]  }
 0x196   :  { %4213 = vmatprep.subr.bf16.mxu1 %v6705_v12  ;;  %v8665_v11 = vld [vmem:[%s9628_s2] sm:$0xff] }
 0x197   :  { %v377_v12 = vrot.slane %v8665_v11, %v376_v6  ;;  %v384_v6 = vsub.s32 6, %v8014_v37 }
 0x198   :  { %4173 = vmatpush1.bf16.msra.mxu0 %v6640_v13  ;;  %v6771_v13 = vld [vmem:[%s9627_s3 + $0x704] ss:$16 sps:$4 sm:$0xff]  }
 0x199   :  { %4174 = vmatprep.subr.bf16.mxu0 %v6645_v15  ;;  %4214 = vmatpush1.bf16.msra.mxu1 %v6703_v17  ;;  %v381_v15 = vrot.slane %v8665_v11, %v380_v58  ;;  %v6673_v17 = vld [vmem:[%s9627_s3 + $0x500] ss:$16 sps:$4 sm:$0xff]   ;;  %v6756_v58 = vld [vmem:[%s9627_s3 + $0x14c] ss:$16 sps:$4 sm:$0xff]  }
 0x19a   :  { %4215 = vmatprep.subr.bf16.mxu1 %v6711_v18  ;;  %v6678_v18 = vld [vmem:[%s9627_s3 + $0xec] ss:$16 sps:$4 sm:$0xff]  }
 0x19c   :  { %4175 = vmatpush1.bf16.msra.mxu0 %v6643_v20  ;;  %v6769_v20 = vld [vmem:[%s9627_s3 + $0x700] ss:$16 sps:$4 sm:$0xff]  }
 0x19d   :  { %4176 = vmatprep.subr.bf16.mxu0 %v6648_v21  ;;  %4216 = vmatpush1.bf16.msra.mxu1 %v6709_v22  ;;  %v6777_v22 = vld [vmem:[%s9627_s3 + $0x2ec] ss:$16 sps:$4 sm:$0xff]  }
 0x19e   :  { %4217 = vmatprep.subr.bf16.mxu1 %v6717_v59 }
 0x1a0   :  { %4177 = vmatpush1.bf16.msra.mxu0 %v6646_v23 }
 0x1a1   :  { %4178 = vmatprep.subr.bf16.mxu0 %v6651_v24  ;;  %4218 = vmatpush1.bf16.msra.mxu1 %v6715_v25 }
 0x1a2   :  { %4219 = vmatprep.subr.bf16.mxu1 %v6723_v26 }
 0x1a4   :  { %4179 = vmatpush1.bf16.msra.mxu0 %v6649_v27 }
 0x1a5   :  { %4180 = vmatprep.subr.bf16.mxu0 %v6654_v19  ;;  %4220 = vmatpush1.bf16.msra.mxu1 %v6721_v14 }
 0x1a6   :  { %4221 = vmatprep.subr.bf16.mxu1 %v6729_v4 }
 0x1a7   :  { %v8583_v36 = vpop.f32.mrf.mxu0 }
 0x1a8   :  { %v8585_v45 = vpop.f32.mrf.mxu1  ;;  %4181 = vmatpush2.bf16.msra.mxu0 %v6652_v31  ;;  %v2297_v21 = vadd.f32 %v8583_v36, %v377_v12  ;;  %v6762_v12 = vld [vmem:[%s9627_s3 + $0x12c] ss:$16 sps:$4 sm:$0xff]  }
 0x1a9   :  { %v8590_v39 = vpop.f32.mrf.mxu0  ;;  %4182 = vmatprep.subr.bf16.mxu0 %v6657_v33  ;;  %4222 = vmatpush2.bf16.msra.mxu1 %v6727_v34 }
 0x1aa   :  { %v8598_v41 = vpop.f32.mrf.mxu1  ;;  %4223 = vmatprep.subr.bf16.mxu1 %v6735_v35  ;;  %v2299_v59 = vadd.f32 %v8590_v39, %v381_v15  ;;  %v2338_v23 = vadd.f32 %v8585_v45, %v2297_v21  ;;  %v6676_v35 = vld [vmem:[%s9627_s3 + $0xe8] ss:$16 sps:$4 sm:$0xff]   ;;  %v6684_v45 = vld [vmem:[%s9627_s3 + $0xcc] ss:$16 sps:$4 sm:$0xff]  }
 0x1ab   :  { %v2300_v42 = vpop.f32.mrf.mxu0  ;;  %v6690_v39 = vld [vmem:[%s9627_s3 + $0xac] ss:$16 sps:$4 sm:$0xff]  }
 0x1ac   :  { %v2341_v43 = vpop.f32.mrf.mxu1  ;;  %4183 = vmatpush2.bf16.msra.mxu0 %v6655_v38  ;;  %v2340_v25 = vadd.f32 %v8598_v41, %v2299_v59  ;;  %v6682_v38 = vld [vmem:[%s9627_s3 + $0xc8] ss:$16 sps:$4 sm:$0xff]   ;;  %v6702_v41 = vld [vmem:[%s9627_s3 + $0x6c] ss:$16 sps:$4 sm:$0xff]  }
 0x1ad   :  { %v2301_v46 = vpop.f32.mrf.mxu0  ;;  %4184 = vmatprep.subr.bf16.mxu0 %v6660_v40  ;;  %4224 = vmatpush2.bf16.msra.mxu1 %v6733_v32  ;;  %v6688_v40 = vld [vmem:[%s9627_s3 + $0xa8] ss:$16 sps:$4 sm:$0xff]   ;;  %v6696_v32 = vld [vmem:[%s9627_s3 + $0x8c] ss:$16 sps:$4 sm:$0xff]  }
 0x1ae   :  { %v2342_v53 = vpop.f32.mrf.mxu1  ;;  %4225 = vmatprep.subr.bf16.mxu1 %v6741_v29  ;;  %v6700_v29 = vld [vmem:[%s9627_s3 + $0x68] ss:$16 sps:$4 sm:$0xff]   ;;  %v6708_v42 = vld [vmem:[%s9627_s3 + $0x4c] ss:$16 sps:$4 sm:$0xff]  }
 0x1af   :  { %v6706_v43 = vld [vmem:[%s9627_s3 + $0x48] ss:$16 sps:$4 sm:$0xff]  }
 0x1b0   :  { %4185 = vmatpush2.bf16.msra.mxu0 %v6658_v44  ;;  %v6714_v44 = vld [vmem:[%s9627_s3 + $0x2c] ss:$16 sps:$4 sm:$0xff]   ;;  %v6712_v46 = vld [vmem:[%s9627_s3 + $0x28] ss:$16 sps:$4 sm:$0xff]  }
 0x1b1   :  { %4186 = vmatprep.subr.bf16.mxu0 %v6663_v49  ;;  %4226 = vmatpush2.bf16.msra.mxu1 %v6739_v50  ;;  %v6720_v49 = vld [vmem:[%s9627_s3 + $0xc] ss:$16 sps:$4 sm:$0xff]  }
 0x1b2   :  { %4227 = vmatprep.subr.bf16.mxu1 %v6747_v51  ;;  %v6718_v51 = vld [vmem:[%s9627_s3 + $0x8] ss:$16 sps:$4 sm:$0xff]  }
 0x1b4   :  { %4187 = vmatpush2.bf16.msra.mxu0 %v6661_v52  ;;  %v6726_v52 = vld [vmem:[%s9627_s3 + $0x1ec] ss:$16 sps:$4 sm:$0xff]  }
 0x1b5   :  { %4188 = vmatprep.subr.bf16.mxu0 %v6666_v55  ;;  %4228 = vmatpush2.bf16.msra.mxu1 %v6745_v56 }
 0x1b6   :  { %4229 = vmatprep.subr.bf16.mxu1 %v6753_v54  ;;  %v6724_v54 = vld [vmem:[%s9627_s3 + $0x1e8] ss:$16 sps:$4 sm:$0xff]  }
 0x1b8   :  { %4189 = vmatpush2.bf16.msra.mxu0 %v6664_v61  ;;  %v6732_v61 = vld [vmem:[%s9627_s3 + $0x1cc] ss:$16 sps:$4 sm:$0xff]  }
 0x1b9   :  { %4190 = vmatprep.subr.bf16.mxu0 %v6669_v62  ;;  %4230 = vmatpush2.bf16.msra.mxu1 %v6751_v0  ;;  %v6730_v62 = vld [vmem:[%s9627_s3 + $0x1c8] ss:$16 sps:$4 sm:$0xff]   ;;  %v6738_v0 = vld [vmem:[%s9627_s3 + $0x1ac] ss:$16 sps:$4 sm:$0xff]  }
 0x1ba   :  { %4231 = vmatprep.subr.bf16.mxu1 %v6759_v1  ;;  %v6736_v1 = vld [vmem:[%s9627_s3 + $0x1a8] ss:$16 sps:$4 sm:$0xff]  }
 0x1bc   :  { %4191 = vmatpush2.bf16.msra.mxu0 %v6667_v2  ;;  %v6744_v2 = vld [vmem:[%s9627_s3 + $0x18c] ss:$16 sps:$4 sm:$0xff]  }
 0x1bd   :  { %4192 = vmatprep.subr.bf16.mxu0 %v6672_v3  ;;  %4232 = vmatpush2.bf16.msra.mxu1 %v6757_v5  ;;  %v6742_v3 = vld [vmem:[%s9627_s3 + $0x188] ss:$16 sps:$4 sm:$0xff]   ;;  %v6750_v5 = vld [vmem:[%s9627_s3 + $0x16c] ss:$16 sps:$4 sm:$0xff]  }
 0x1be   :  { %4233 = vmatprep.subr.bf16.mxu1 %v6765_v7  ;;  %v6748_v7 = vld [vmem:[%s9627_s3 + $0x168] ss:$16 sps:$4 sm:$0xff]  }
 0x1c0   :  { %4193 = vmatpush2.bf16.msra.mxu0 %v6670_v9  ;;  %v388_v9 = vsub.s32 7, %v8014_v37  ;;  %v6760_v37 = vld [vmem:[%s9627_s3 + $0x128] ss:$16 sps:$4 sm:$0xff]  }
 0x1c1   :  { %4194 = vmatprep.subr.bf16.mxu0 %v6675_v10  ;;  %4234 = vmatpush2.bf16.msra.mxu1 %v6763_v8  ;;  %v385_v10 = vrot.slane %v8665_v11, %v384_v6  ;;  %v6754_v8 = vld [vmem:[%s9627_s3 + $0x148] ss:$16 sps:$4 sm:$0xff]   ;;  %v6819_v6 = vld [vmem:[%s9627_s3 + $0x20c] ss:$16 sps:$4 sm:$0xff]  }
 0x1c2   :  { %4235 = vmatprep.subr.bf16.mxu1 %v6771_v13  ;;  %v389_v13 = vrot.slane %v8665_v11, %v388_v9  ;;  %v6766_v11 = vld [vmem:[%s9627_s3 + $0x108] ss:$16 sps:$4 sm:$0xff]  }
 0x1c3   :  { %v6820_v9 = vld [vmem:[%s9627_s3 + $0x5e8] ss:$16 sps:$4 sm:$0xff]  }
 0x1c4   :  { %4195 = vmatpush2.bf16.msra.mxu0 %v6673_v17 }
 0x1c5   :  { %4246 = vmatprep.subr.bf16.mxu0 %v6678_v18  ;;  %4236 = vmatpush2.bf16.msra.mxu1 %v6769_v20  ;;  %v6768_v18 = vld [vmem:[%s9627_s3 + $0x10c] ss:$16 sps:$4 sm:$0xff]  }
 0x1c6   :  { %4287 = vmatprep.subr.bf16.mxu1 %v6777_v22 }
 0x1c7   :  { %v2378_v24 = vpop.f32.mrf.mxu0 }
 0x1c8   :  { %v2379_v26 = vadd.f32 %v2378_v24, %v2338_v23 }
 0x1c9   :  { %v2380_v27 = vpop.f32.mrf.mxu0 }
 0x1ca   :  { %v2381_v19 = vadd.f32 %v2380_v27, %v2340_v25  ;;  %v2512_v14 = vmax.f32 %v2379_v26, 0.0  ;;  %v6774_v27 = vld [vmem:[%s9627_s3 + $0x4ec] ss:$16 sps:$4 sm:$0xff]  }
 0x1cb   :  { %v2382_v4 = vpop.f32.mrf.mxu0 }
 0x1cc   :  { %v2513_v31 = vmax.f32 %v2381_v19, 0.0  ;;  %v8693_v36 = vpack.c.bf16 %v2512_v14, %v2512_v14 }
 0x1cd   :  { %v2383_v33 = vpop.f32.mrf.mxu0 }
 0x1ce   :  { %v8688_v34 = vpack.c.bf16 %v2513_v31, %v2513_v31 }
 0x1d0   :  { %4196 = vmatprep.mubr.bf16.mxu0 %v8688_v34 }
 0x1d1   :  { %4197 = vmatmul.mubr.bf16.vlgmr.msra.gmra.mxu0 %v8693_v36 }
 0x1d2   :  { %4247 = vmatpush1.bf16.msra.mxu0 %v6676_v35  ;;  %4278 = vmatprep.mubr.bf16.mxu0 %v8264_v28  ;;  %v6694_v28 = vld [vmem:[%s9627_s3 + $0x88] ss:$16 sps:$4 sm:$0xff]  }
 0x1d3   :  { %4248 = vmatprep.subr.bf16.mxu0 %v6684_v45  ;;  %v6772_v45 = vld [vmem:[%s9627_s3 + $0x4e8] ss:$16 sps:$4 sm:$0xff]  }
 0x1d6   :  { %4249 = vmatpush1.bf16.msra.mxu0 %v6682_v38  ;;  %v6780_v38 = vld [vmem:[%s9627_s3 + $0x4cc] ss:$16 sps:$4 sm:$0xff]  }
 0x1d7   :  { %4250 = vmatprep.subr.bf16.mxu0 %v6690_v39 }
 0x1da   :  { %4251 = vmatpush1.bf16.msra.mxu0 %v6688_v40  ;;  %v6775_v40 = vld [vmem:[%s9627_s3 + $0x2e8] ss:$16 sps:$4 sm:$0xff]  }
 0x1db   :  { %4252 = vmatprep.subr.bf16.mxu0 %v6696_v32 }
 0x1de   :  { %4253 = vmatpush1.bf16.msra.mxu0 %v6694_v28  ;;  %v6778_v28 = vld [vmem:[%s9627_s3 + $0x4c8] ss:$16 sps:$4 sm:$0xff]  }
 0x1df   :  { %4254 = vmatprep.subr.bf16.mxu0 %v6702_v41  ;;  %v6783_v41 = vld [vmem:[%s9627_s3 + $0x2cc] ss:$16 sps:$4 sm:$0xff]  }
 0x1e2   :  { %4255 = vmatpush1.bf16.msra.mxu0 %v6700_v29  ;;  %v6784_v29 = vld [vmem:[%s9627_s3 + $0x4a8] ss:$16 sps:$4 sm:$0xff]  }
 0x1e3   :  { %4256 = vmatprep.subr.bf16.mxu0 %v6708_v42  ;;  %v6789_v42 = vld [vmem:[%s9627_s3 + $0x2ac] ss:$16 sps:$4 sm:$0xff]  }
 0x1e6   :  { %4257 = vmatpush1.bf16.msra.mxu0 %v6706_v43  ;;  %v6792_v43 = vld [vmem:[%s9627_s3 + $0x48c] ss:$16 sps:$4 sm:$0xff]  }
 0x1e7   :  { %4258 = vmatprep.subr.bf16.mxu0 %v6714_v44  ;;  %v6790_v44 = vld [vmem:[%s9627_s3 + $0x488] ss:$16 sps:$4 sm:$0xff]  }
 0x1e8   :  { %v2419_v50 = vpop.f32.mrf.mxu1 }
 0x1e9   :  { %v2420_v15 = vadd.f32 %v2419_v50, %v385_v10  ;;  %v6793_v50 = vld [vmem:[%s9627_s3 + $0x288] ss:$16 sps:$4 sm:$0xff]   ;;  %v6825_v10 = vld [vmem:[%s9627_s3 + $0x3ec] ss:$16 sps:$4 sm:$0xff]  }
 0x1ea   :  { %v2421_v53 = vpop.f32.mrf.mxu1  ;;  %4259 = vmatpush1.bf16.msra.mxu0 %v6712_v46  ;;  %v6795_v46 = vld [vmem:[%s9627_s3 + $0x28c] ss:$16 sps:$4 sm:$0xff]  }
 0x1eb   :  { %4260 = vmatprep.subr.bf16.mxu0 %v6720_v49  ;;  %v2422_v20 = vadd.f32 %v2421_v53, %v389_v13  ;;  %v6798_v49 = vld [vmem:[%s9627_s3 + $0x46c] ss:$16 sps:$4 sm:$0xff]   ;;  %v6796_v53 = vld [vmem:[%s9627_s3 + $0x468] ss:$16 sps:$4 sm:$0xff]  }
 0x1ec   :  { %v2423_v55 = vpop.f32.mrf.mxu1  ;;  %v6826_v13 = vld [vmem:[%s9627_s3 + $0x5c8] ss:$16 sps:$4 sm:$0xff]  }
 0x1ed   :  { %v6799_v55 = vld [vmem:[%s9627_s3 + $0x268] ss:$16 sps:$4 sm:$0xff]  }
 0x1ee   :  { %v2424_v56 = vpop.f32.mrf.mxu1  ;;  %4261 = vmatpush1.bf16.msra.mxu0 %v6718_v51  ;;  %v6801_v51 = vld [vmem:[%s9627_s3 + $0x26c] ss:$16 sps:$4 sm:$0xff]  }
 0x1ef   :  { %4262 = vmatprep.subr.bf16.mxu0 %v6726_v52  ;;  %v6804_v52 = vld [vmem:[%s9627_s3 + $0x44c] ss:$16 sps:$4 sm:$0xff]   ;;  %v6802_v56 = vld [vmem:[%s9627_s3 + $0x448] ss:$16 sps:$4 sm:$0xff]  }
 0x1f2   :  { %4263 = vmatpush2.bf16.msra.mxu0 %v6724_v54  ;;  %v6807_v54 = vld [vmem:[%s9627_s3 + $0x24c] ss:$16 sps:$4 sm:$0xff]  }
 0x1f3   :  { %4264 = vmatprep.subr.bf16.mxu0 %v6732_v61  ;;  %v6810_v61 = vld [vmem:[%s9627_s3 + $0x42c] ss:$16 sps:$4 sm:$0xff]  }
 0x1f6   :  { %4265 = vmatpush2.bf16.msra.mxu0 %v6730_v62  ;;  %v6805_v62 = vld [vmem:[%s9627_s3 + $0x248] ss:$16 sps:$4 sm:$0xff]  }
 0x1f7   :  { %4266 = vmatprep.subr.bf16.mxu0 %v6738_v0  ;;  %v6808_v0 = vld [vmem:[%s9627_s3 + $0x428] ss:$16 sps:$4 sm:$0xff]  }
 0x1fa   :  { %4267 = vmatpush2.bf16.msra.mxu0 %v6736_v1  ;;  %v6813_v1 = vld [vmem:[%s9627_s3 + $0x22c] ss:$16 sps:$4 sm:$0xff]  }
 0x1fb   :  { %4268 = vmatprep.subr.bf16.mxu0 %v6744_v2  ;;  %v6811_v2 = vld [vmem:[%s9627_s3 + $0x228] ss:$16 sps:$4 sm:$0xff]  }
 0x1fe   :  { %4269 = vmatpush2.bf16.msra.mxu0 %v6742_v3  ;;  %v6816_v3 = vld [vmem:[%s9627_s3 + $0x40c] ss:$16 sps:$4 sm:$0xff]  }
 0x1ff   :  { %4270 = vmatprep.subr.bf16.mxu0 %v6750_v5  ;;  %v6814_v5 = vld [vmem:[%s9627_s3 + $0x408] ss:$16 sps:$4 sm:$0xff]  }
 0x202   :  { %4271 = vmatpush2.bf16.msra.mxu0 %v6748_v7  ;;  %v6822_v7 = vld [vmem:[%s9627_s3 + $0x5ec] ss:$16 sps:$4 sm:$0xff]  }
 0x203   :  { %4272 = vmatprep.subr.bf16.mxu0 %v6756_v58  ;;  %v6817_v58 = vld [vmem:[%s9627_s3 + $0x208] ss:$16 sps:$4 sm:$0xff]  }
 0x206   :  { %4273 = vmatpush2.bf16.msra.mxu0 %v6754_v8  ;;  %v6828_v8 = vld [vmem:[%s9627_s3 + $0x5cc] ss:$16 sps:$4 sm:$0xff]  }
 0x207   :  { %v2460_v17 = vpop.f32.mrf.mxu0  ;;  %4274 = vmatprep.subr.bf16.mxu0 %v6762_v12  ;;  %v6823_v12 = vld [vmem:[%s9627_s3 + $0x3e8] ss:$16 sps:$4 sm:$0xff]  }
 0x208   :  { %v2461_v21 = vadd.f32 %v2460_v17, %v2420_v15  ;;  %v2501_v22 = vpop.f32.mrf.mxu1  ;;  %v6831_v15 = vld [vmem:[%s9627_s3 + $0x3cc] ss:$16 sps:$4 sm:$0xff]   ;;  %v6829_v17 = vld [vmem:[%s9627_s3 + $0x3c8] ss:$16 sps:$4 sm:$0xff]  }
 0x209   :  { %v2462_v59 = vpop.f32.mrf.mxu0 }
 0x20a   :  { %v2502_v23 = vadd.f32 %v2501_v22, %v2461_v21  ;;  %v2463_v24 = vadd.f32 %v2462_v59, %v2422_v20  ;;  %v2503_v25 = vpop.f32.mrf.mxu1  ;;  %4275 = vmatpush2.bf16.msra.mxu0 %v6760_v37  ;;  %v6834_v37 = vld [vmem:[%s9627_s3 + $0x5ac] ss:$16 sps:$4 sm:$0xff]   ;;  %v6835_v22 = vld [vmem:[%s9627_s3 + $0x3a8] ss:$16 sps:$4 sm:$0xff]  }
 0x20b   :  { %v2464_v26 = vpop.f32.mrf.mxu0  ;;  %4276 = vmatprep.subr.bf16.mxu0 %v6768_v18  ;;  %v6832_v18 = vld [vmem:[%s9627_s3 + $0x5a8] ss:$16 sps:$4 sm:$0xff]   ;;  %v6837_v20 = vld [vmem:[%s9627_s3 + $0x3ac] ss:$16 sps:$4 sm:$0xff]  }
 0x20c   :  { %v2504_v19 = vadd.f32 %v2503_v25, %v2463_v24  ;;  %v2505_v14 = vpop.f32.mrf.mxu1  ;;  %v2514_v31 = vmax.f32 %v2502_v23, 0.0  ;;  %v6840_v21 = vld [vmem:[%s9627_s3 + $0x58c] ss:$16 sps:$4 sm:$0xff]   ;;  %v6838_v59 = vld [vmem:[%s9627_s3 + $0x588] ss:$16 sps:$4 sm:$0xff]  }
 0x20d   :  { %v2465_v4 = vpop.f32.mrf.mxu0  ;;  %v6843_v23 = vld [vmem:[%s9627_s3 + $0x38c] ss:$16 sps:$4 sm:$0xff]   ;;  %v6841_v25 = vld [vmem:[%s9627_s3 + $0x388] ss:$16 sps:$4 sm:$0xff]   ;;  %v8960_v14 = vld [vmem:[%s9630_s4] sm:$0xf] }
 0x20e   :  { %v2515_v33 = vmax.f32 %v2504_v19, 0.0  ;;  %v2506_v35 = vpop.f32.mrf.mxu1  ;;  %4277 = vmatpush2.bf16.msra.mxu0 %v6766_v11  ;;  %v8807_v32 = vpack.c.bf16 %v2514_v31, %v2514_v31  ;;  %v6846_v24 = vld [vmem:[%s9627_s3 + $0x56c] ss:$16 sps:$4 sm:$0xff]   ;;  %v6844_v11 = vld [vmem:[%s9627_s3 + $0x568] ss:$16 sps:$4 sm:$0xff]  }
 0x20f   :  { %4328 = vmatprep.subr.bf16.mxu0 %v6774_v27  ;;  %v6849_v26 = vld [vmem:[%s9627_s3 + $0x36c] ss:$16 sps:$4 sm:$0xff]   ;;  %v6847_v19 = vld [vmem:[%s9627_s3 + $0x368] ss:$16 sps:$4 sm:$0xff]  }
 0x210   :  { %v8801_v39 = vpack.c.bf16 %v2515_v33, %v2515_v33  ;;  %v6852_v27 = vld [vmem:[%s9627_s3 + $0x54c] ss:$16 sps:$4 sm:$0xff]   ;;  %v6850_v4 = vld [vmem:[%s9627_s3 + $0x548] ss:$16 sps:$4 sm:$0xff]  }
 0x211   :  { %4279 = vmatmul.mubr.bf16.vlgmr.msra.gmra.mxu0 %v8472_v57  ;;  %v6786_v57 = vld [vmem:[%s9627_s3 + $0x4ac] ss:$16 sps:$4 sm:$0xff]   ;;  %v6853_v35 = vld [vmem:[%s9627_s3 + $0x348] ss:$16 sps:$4 sm:$0xff]  }
 0x212   :  { %4329 = vmatpush1.bf16.msra.mxu0 %v6772_v45  ;;  %4360 = vmatprep.mubr.bf16.mxu0 %v8688_v34  ;;  %v6781_v34 = vld [vmem:[%s9627_s3 + $0x2c8] ss:$16 sps:$4 sm:$0xff]   ;;  %v6855_v31 = vld [vmem:[%s9627_s3 + $0x34c] ss:$16 sps:$4 sm:$0xff]   ;;  %v2785_v45 = vrot.slane %v8960_v14, %v8034_v47 }
 0x213   :  { %4237 = vmatprep.mubr.bf16.mxu1 %v8801_v39  ;;  %4330 = vmatprep.subr.bf16.mxu0 %v6780_v38  ;;  %v6858_v33 = vld [vmem:[%s9627_s3 + $0x52c] ss:$16 sps:$4 sm:$0xff]   ;;  %v6856_v38 = vld [vmem:[%s9627_s3 + $0x528] ss:$16 sps:$4 sm:$0xff]  }
 0x214   :  { %4238 = vmatmul.mubr.bf16.vlgmr.msra.gmra.mxu1 %v8807_v32 }
 0x215   :  { %4288 = vmatpush1.bf16.msra.mxu1 %v6775_v40  ;;  %4319 = vmatprep.mubr.bf16.mxu1 %v8402_v16  ;;  %v6787_v16 = vld [vmem:[%s9627_s3 + $0x2a8] ss:$16 sps:$4 sm:$0xff]   ;;  %v6861_v40 = vld [vmem:[%s9627_s3 + $0x32c] ss:$16 sps:$4 sm:$0xff]  }
 0x216   :  { %4331 = vmatpush1.bf16.msra.mxu0 %v6778_v28  ;;  %4289 = vmatprep.subr.bf16.mxu1 %v6783_v41  ;;  %v6864_v28 = vld [vmem:[%s9627_s3 + $0x50c] ss:$16 sps:$4 sm:$0xff]   ;;  %v2789_v41 = vrot.slane %v8960_v14, %v8209_v48 }
 0x217   :  { %4332 = vmatprep.subr.bf16.mxu0 %v6786_v57 }
 0x219   :  { %4290 = vmatpush1.bf16.msra.mxu1 %v6781_v34  ;;  %v6859_v34 = vld [vmem:[%s9627_s3 + $0x328] ss:$16 sps:$4 sm:$0xff]  }
 0x21a   :  { %4333 = vmatpush1.bf16.msra.mxu0 %v6784_v29  ;;  %4291 = vmatprep.subr.bf16.mxu1 %v6789_v42 }
 0x21b   :  { %4334 = vmatprep.subr.bf16.mxu0 %v6792_v43  ;;  %v6862_v43 = vld [vmem:[%s9627_s3 + $0x508] ss:$16 sps:$4 sm:$0xff]  }
 0x21d   :  { %4292 = vmatpush1.bf16.msra.mxu1 %v6787_v16  ;;  %v6867_v16 = vld [vmem:[%s9627_s3 + $0x30c] ss:$16 sps:$4 sm:$0xff]  }
 0x21e   :  { %4335 = vmatpush1.bf16.msra.mxu0 %v6790_v44  ;;  %4293 = vmatprep.subr.bf16.mxu1 %v6795_v46 }
 0x21f   :  { %4336 = vmatprep.subr.bf16.mxu0 %v6798_v49 }
 0x221   :  { %4294 = vmatpush1.bf16.msra.mxu1 %v6793_v50 }
 0x222   :  { %4337 = vmatpush1.bf16.msra.mxu0 %v6796_v53  ;;  %4295 = vmatprep.subr.bf16.mxu1 %v6801_v51  ;;  %v6918_v51 = vld [vmem:[%s9629_s5 + $0xe4] ss:$16 sps:$4 sm:$0xff]  }
 0x223   :  { %4338 = vmatprep.subr.bf16.mxu0 %v6804_v52 }
 0x225   :  { %4296 = vmatpush1.bf16.msra.mxu1 %v6799_v55 }
 0x226   :  { %4339 = vmatpush1.bf16.msra.mxu0 %v6802_v56  ;;  %4297 = vmatprep.subr.bf16.mxu1 %v6807_v54  ;;  %v6865_v54 = vld [vmem:[%s9627_s3 + $0x308] ss:$16 sps:$4 sm:$0xff]  }
 0x227   :  { %4340 = vmatprep.subr.bf16.mxu0 %v6810_v61 }
 0x229   :  { %4298 = vmatpush1.bf16.msra.mxu1 %v6805_v62  ;;  %v6870_v62 = vld [vmem:[%s9627_s3 + $0x6ec] ss:$16 sps:$4 sm:$0xff]  }
 0x22a   :  { %4341 = vmatpush1.bf16.msra.mxu0 %v6808_v0  ;;  %4299 = vmatprep.subr.bf16.mxu1 %v6813_v1  ;;  %v6916_v0 = vld [vmem:[%s9629_s5 + $0xe0] ss:$16 sps:$4 sm:$0xff]   ;;  %v6921_v1 = vld [vmem:[%s9629_s5 + $0xc4] ss:$16 sps:$4 sm:$0xff]  }
 0x22b   :  { %4342 = vmatprep.subr.bf16.mxu0 %v6816_v3  ;;  %v6873_v3 = vld [vmem:[%s9627_s3 + $0x6cc] ss:$16 sps:$4 sm:$0xff]  }
 0x22d   :  { %4300 = vmatpush1.bf16.msra.mxu1 %v6811_v2  ;;  %v6868_v2 = vld [vmem:[%s9627_s3 + $0x6e8] ss:$16 sps:$4 sm:$0xff]  }
 0x22e   :  { %4343 = vmatpush1.bf16.msra.mxu0 %v6814_v5  ;;  %4301 = vmatprep.subr.bf16.mxu1 %v6819_v6  ;;  %v6919_v5 = vld [vmem:[%s9629_s5 + $0xc0] ss:$16 sps:$4 sm:$0xff]   ;;  %v6924_v6 = vld [vmem:[%s9629_s5 + $0xa4] ss:$16 sps:$4 sm:$0xff]  }
 0x22f   :  { %4344 = vmatprep.subr.bf16.mxu0 %v6822_v7  ;;  %v6876_v7 = vld [vmem:[%s9627_s3 + $0x6ac] ss:$16 sps:$4 sm:$0xff]  }
 0x231   :  { %4302 = vmatpush1.bf16.msra.mxu1 %v6817_v58  ;;  %v6922_v58 = vld [vmem:[%s9629_s5 + $0xa0] ss:$16 sps:$4 sm:$0xff]  }
 0x232   :  { %4345 = vmatpush2.bf16.msra.mxu0 %v6820_v9  ;;  %4303 = vmatprep.subr.bf16.mxu1 %v6825_v10  ;;  %v6879_v9 = vld [vmem:[%s9627_s3 + $0x68c] ss:$16 sps:$4 sm:$0xff]   ;;  %v6925_v10 = vld [vmem:[%s9629_s5 + $0x80] ss:$16 sps:$4 sm:$0xff]  }
 0x233   :  { %4346 = vmatprep.subr.bf16.mxu0 %v6828_v8  ;;  %v6930_v8 = vld [vmem:[%s9629_s5 + $0x64] ss:$16 sps:$4 sm:$0xff]  }
 0x235   :  { %4304 = vmatpush2.bf16.msra.mxu1 %v6823_v12  ;;  %v6877_v12 = vld [vmem:[%s9627_s3 + $0x688] ss:$16 sps:$4 sm:$0xff]  }
 0x236   :  { %4347 = vmatpush2.bf16.msra.mxu0 %v6826_v13  ;;  %4305 = vmatprep.subr.bf16.mxu1 %v6831_v15  ;;  %v6882_v13 = vld [vmem:[%s9627_s3 + $0x66c] ss:$16 sps:$4 sm:$0xff]   ;;  %v6928_v15 = vld [vmem:[%s9629_s5 + $0x60] ss:$16 sps:$4 sm:$0xff]  }
 0x237   :  { %4348 = vmatprep.subr.bf16.mxu0 %v6834_v37  ;;  %v6933_v37 = vld [vmem:[%s9629_s5 + $0x44] ss:$16 sps:$4 sm:$0xff]  }
 0x239   :  { %4306 = vmatpush2.bf16.msra.mxu1 %v6829_v17  ;;  %v6880_v17 = vld [vmem:[%s9627_s3 + $0x668] ss:$16 sps:$4 sm:$0xff]  }
 0x23a   :  { %4349 = vmatpush2.bf16.msra.mxu0 %v6832_v18  ;;  %4307 = vmatprep.subr.bf16.mxu1 %v6837_v20  ;;  %v6885_v18 = vld [vmem:[%s9627_s3 + $0x64c] ss:$16 sps:$4 sm:$0xff]   ;;  %v6931_v20 = vld [vmem:[%s9629_s5 + $0x40] ss:$16 sps:$4 sm:$0xff]  }
 0x23b   :  { %4350 = vmatprep.subr.bf16.mxu0 %v6840_v21  ;;  %v6936_v21 = vld [vmem:[%s9629_s5 + $0x24] ss:$16 sps:$4 sm:$0xff]  }
 0x23d   :  { %4308 = vmatpush2.bf16.msra.mxu1 %v6835_v22  ;;  %v6883_v22 = vld [vmem:[%s9627_s3 + $0x648] ss:$16 sps:$4 sm:$0xff]  }
 0x23e   :  { %4351 = vmatpush2.bf16.msra.mxu0 %v6838_v59  ;;  %4309 = vmatprep.subr.bf16.mxu1 %v6843_v23  ;;  %v6888_v59 = vld [vmem:[%s9627_s3 + $0x62c] ss:$16 sps:$4 sm:$0xff]   ;;  %v6934_v23 = vld [vmem:[%s9629_s5 + $0x20] ss:$16 sps:$4 sm:$0xff]  }
 0x23f   :  { %4352 = vmatprep.subr.bf16.mxu0 %v6846_v24  ;;  %v6939_v24 = vld [vmem:[%s9629_s5 + $0x4] ss:$16 sps:$4 sm:$0xff]  }
 0x241   :  { %4310 = vmatpush2.bf16.msra.mxu1 %v6841_v25  ;;  %v6886_v25 = vld [vmem:[%s9627_s3 + $0x628] ss:$16 sps:$4 sm:$0xff]  }
 0x242   :  { %4353 = vmatpush2.bf16.msra.mxu0 %v6844_v11  ;;  %4311 = vmatprep.subr.bf16.mxu1 %v6849_v26  ;;  %v6891_v11 = vld [vmem:[%s9627_s3 + $0x60c] ss:$16 sps:$4 sm:$0xff]   ;;  %v6937_v26 = vld [vmem:[%s9629_s5] ss:$16 sps:$4 sm:$0xff]  }
 0x243   :  { %4354 = vmatprep.subr.bf16.mxu0 %v6852_v27  ;;  %v6942_v27 = vld [vmem:[%s9629_s5 + $0x1e4] ss:$16 sps:$4 sm:$0xff]  }
 0x245   :  { %4312 = vmatpush2.bf16.msra.mxu1 %v6847_v19  ;;  %v6889_v19 = vld [vmem:[%s9627_s3 + $0x608] ss:$16 sps:$4 sm:$0xff]  }
 0x246   :  { %4355 = vmatpush2.bf16.msra.mxu0 %v6850_v4  ;;  %4313 = vmatprep.subr.bf16.mxu1 %v6855_v31  ;;  %v6894_v4 = vld [vmem:[%s9627_s3 + $0x7ec] ss:$16 sps:$4 sm:$0xff]   ;;  %v6940_v31 = vld [vmem:[%s9629_s5 + $0x1e0] ss:$16 sps:$4 sm:$0xff]  }
 0x247   :  { %v4116_v57 = vpop.f32.mrf.mxu0  ;;  %4356 = vmatprep.subr.bf16.mxu0 %v6858_v33  ;;  %v6945_v33 = vld [vmem:[%s9629_s5 + $0x1c4] ss:$16 sps:$4 sm:$0xff]  }
 0x248   :  { %v4117_v29 = vadd.f32 %v4116_v57, %v2785_v45  ;;  %v4157_v42 = vpop.f32.mrf.mxu1  ;;  %v6897_v45 = vld [vmem:[%s9627_s3 + $0x7cc] ss:$16 sps:$4 sm:$0xff]   ;;  %v6946_v57 = vld [vmem:[%s9629_s5 + $0x1a0] ss:$16 sps:$4 sm:$0xff]  }
 0x249   :  { %4314 = vmatpush2.bf16.msra.mxu1 %v6853_v35  ;;  %v4118_v44 = vpop.f32.mrf.mxu0  ;;  %v6892_v35 = vld [vmem:[%s9627_s3 + $0x7e8] ss:$16 sps:$4 sm:$0xff]  }
 0x24a   :  { %v8996_v46 = vadd.f32 %v4157_v42, %v4117_v29  ;;  %v4119_v49 = vadd.f32 %v4118_v44, %v2789_v41  ;;  %v4159_v50 = vpop.f32.mrf.mxu1  ;;  %4357 = vmatpush2.bf16.msra.mxu0 %v6856_v38  ;;  %4315 = vmatprep.subr.bf16.mxu1 %v6861_v40  ;;  %v6943_v38 = vld [vmem:[%s9629_s5 + $0x1c0] ss:$16 sps:$4 sm:$0xff]   ;;  %v6948_v40 = vld [vmem:[%s9629_s5 + $0x1a4] ss:$16 sps:$4 sm:$0xff]   ;;  %v6900_v41 = vld [vmem:[%s9627_s3 + $0x7ac] ss:$16 sps:$4 sm:$0xff]  }
 0x24b   :  { %v4120_v53 = vpop.f32.mrf.mxu0  ;;  %4358 = vmatprep.subr.bf16.mxu0 %v6864_v28  ;;  %v6895_v28 = vld [vmem:[%s9627_s3 + $0x7c8] ss:$16 sps:$4 sm:$0xff]   ;;  %v6903_v42 = vld [vmem:[%s9627_s3 + $0x78c] ss:$16 sps:$4 sm:$0xff]  }
 0x24c   :  { %v9001_v52 = vadd.f32 %v4159_v50, %v4119_v49  ;;  %v4161_v55 = vpop.f32.mrf.mxu1  ;;  %v6898_v29 = vld [vmem:[%s9627_s3 + $0x7a8] ss:$16 sps:$4 sm:$0xff]   ;;  %v6906_v49 = vld [vmem:[%s9627_s3 + $0x76c] ss:$16 sps:$4 sm:$0xff]   ;;  %v6952_v50 = vld [vmem:[%s9629_s5 + $0x160] ss:$16 sps:$4 sm:$0xff]  }
 0x24d   :  { %4316 = vmatpush2.bf16.msra.mxu1 %v6859_v34  ;;  %v4121_v56 = vpop.f32.mrf.mxu0  ;;  %v6951_v34 = vld [vmem:[%s9629_s5 + $0x184] ss:$16 sps:$4 sm:$0xff]   ;;  %v6901_v44 = vld [vmem:[%s9627_s3 + $0x788] ss:$16 sps:$4 sm:$0xff]   ;;  %v6909_v55 = vld [vmem:[%s9627_s3 + $0x74c] ss:$16 sps:$4 sm:$0xff]  }
 0x24e   :  { %v4162_v61 = vpop.f32.mrf.mxu1  ;;  %4359 = vmatpush2.bf16.msra.mxu0 %v6862_v43  ;;  %4317 = vmatprep.subr.bf16.mxu1 %v6867_v16  ;;  %v6949_v43 = vld [vmem:[%s9629_s5 + $0x180] ss:$16 sps:$4 sm:$0xff]   ;;  %v6954_v16 = vld [vmem:[%s9629_s5 + $0x164] ss:$16 sps:$4 sm:$0xff]  }
 0x24f   :  { %5208 = vmatprep.subr.bf16.mxu0 %v6918_v51  ;;  %v6957_v53 = vld [vmem:[%s9629_s5 + $0x144] ss:$16 sps:$4 sm:$0xff]   ;;  %v6904_v51 = vld [vmem:[%s9627_s3 + $0x768] ss:$16 sps:$4 sm:$0xff]   ;;  %v6955_v56 = vld [vmem:[%s9629_s5 + $0x140] ss:$16 sps:$4 sm:$0xff]  }
 0x250   :  { %v6907_v61 = vld [vmem:[%s9627_s3 + $0x748] ss:$16 sps:$4 sm:$0xff]  }
 0x251   :  { %4318 = vmatpush2.bf16.msra.mxu1 %v6865_v54  ;;  %4361 = vmatmul.mubr.bf16.vlgmr.msra.gmra.mxu0 %v8693_v36  ;;  %v6871_v36 = vld [vmem:[%s9627_s3 + $0x6c8] ss:$16 sps:$4 sm:$0xff]   ;;  %v6960_v54 = vld [vmem:[%s9629_s5 + $0x124] ss:$16 sps:$4 sm:$0xff]  }
 0x252   :  { %4369 = vmatprep.subr.bf16.mxu1 %v6870_v62  ;;  %5209 = vmatpush1.bf16.msra.mxu0 %v6916_v0  ;;  %v6912_v62 = vld [vmem:[%s9627_s3 + $0x72c] ss:$16 sps:$4 sm:$0xff]   ;;  %v6958_v0 = vld [vmem:[%s9629_s5 + $0x120] ss:$16 sps:$4 sm:$0xff]  }
 0x253   :  { %5210 = vmatprep.subr.bf16.mxu0 %v6921_v1  ;;  %v6963_v1 = vld [vmem:[%s9629_s5 + $0x104] ss:$16 sps:$4 sm:$0xff]  }
 0x254   :  { %4320 = vmatmul.mubr.bf16.vlgmr.msra.gmra.mxu1 %v8480_v63  ;;  %v6927_v63 = vld [vmem:[%s9629_s5 + $0x84] ss:$16 sps:$4 sm:$0xff]  }
 0x255   :  { %4370 = vmatpush1.bf16.msra.mxu1 %v6868_v2  ;;  %4401 = vmatprep.mubr.bf16.mxu1 %v8801_v39  ;;  %v6874_v39 = vld [vmem:[%s9627_s3 + $0x6a8] ss:$16 sps:$4 sm:$0xff]  }
 0x256   :  { %4371 = vmatprep.subr.bf16.mxu1 %v6873_v3  ;;  %5211 = vmatpush1.bf16.msra.mxu0 %v6919_v5  ;;  %v6910_v2 = vld [vmem:[%s9627_s3 + $0x728] ss:$16 sps:$4 sm:$0xff]   ;;  %v6915_v3 = vld [vmem:[%s9627_s3 + $0x70c] ss:$16 sps:$4 sm:$0xff]   ;;  %v6961_v5 = vld [vmem:[%s9629_s5 + $0x100] ss:$16 sps:$4 sm:$0xff]  }
 0x257   :  { %5212 = vmatprep.subr.bf16.mxu0 %v6924_v6  ;;  %v6966_v6 = vld [vmem:[%s9629_s5 + $0xec] ss:$16 sps:$4 sm:$0xff]  }
 0x259   :  { %4372 = vmatpush1.bf16.msra.mxu1 %v6871_v36  ;;  %v6913_v36 = vld [vmem:[%s9627_s3 + $0x708] ss:$16 sps:$4 sm:$0xff]  }
 0x25a   :  { %4373 = vmatprep.subr.bf16.mxu1 %v6876_v7  ;;  %5213 = vmatpush1.bf16.msra.mxu0 %v6922_v58 }
 0x25b   :  { %5214 = vmatprep.subr.bf16.mxu0 %v6927_v63 }
 0x25d   :  { %4374 = vmatpush1.bf16.msra.mxu1 %v6874_v39 }
 0x25e   :  { %4375 = vmatprep.subr.bf16.mxu1 %v6879_v9  ;;  %5215 = vmatpush1.bf16.msra.mxu0 %v6925_v10 }
 0x25f   :  { %5216 = vmatprep.subr.bf16.mxu0 %v6930_v8  ;;  %v7012_v8 = vld [vmem:[%s9629_s5 + $0x2e0] ss:$16 sps:$4 sm:$0xff]  }
 0x261   :  { %4376 = vmatpush1.bf16.msra.mxu1 %v6877_v12  ;;  %v7014_v12 = vld [vmem:[%s9629_s5 + $0x2e4] ss:$16 sps:$4 sm:$0xff]  }
 0x262   :  { %4377 = vmatprep.subr.bf16.mxu1 %v6882_v13  ;;  %5217 = vmatpush1.bf16.msra.mxu0 %v6928_v15  ;;  %v7018_v13 = vld [vmem:[%s9629_s5 + $0x2a0] ss:$16 sps:$4 sm:$0xff]   ;;  %v7023_v15 = vld [vmem:[%s9629_s5 + $0x284] ss:$16 sps:$4 sm:$0xff]  }
 0x263   :  { %5218 = vmatprep.subr.bf16.mxu0 %v6933_v37  ;;  %v7021_v37 = vld [vmem:[%s9629_s5 + $0x280] ss:$16 sps:$4 sm:$0xff]  }
 0x265   :  { %4378 = vmatpush1.bf16.msra.mxu1 %v6880_v17  ;;  %v7026_v17 = vld [vmem:[%s9629_s5 + $0x264] ss:$16 sps:$4 sm:$0xff]  }
 0x266   :  { %4379 = vmatprep.subr.bf16.mxu1 %v6885_v18  ;;  %5219 = vmatpush1.bf16.msra.mxu0 %v6931_v20  ;;  %v7024_v18 = vld [vmem:[%s9629_s5 + $0x260] ss:$16 sps:$4 sm:$0xff]   ;;  %v7029_v20 = vld [vmem:[%s9629_s5 + $0x244] ss:$16 sps:$4 sm:$0xff]  }
 0x267   :  { %5220 = vmatprep.subr.bf16.mxu0 %v6936_v21  ;;  %v7027_v21 = vld [vmem:[%s9629_s5 + $0x240] ss:$16 sps:$4 sm:$0xff]  }
 0x269   :  { %4380 = vmatpush1.bf16.msra.mxu1 %v6883_v22  ;;  %v7032_v22 = vld [vmem:[%s9629_s5 + $0x224] ss:$16 sps:$4 sm:$0xff]  }
 0x26a   :  { %4381 = vmatprep.subr.bf16.mxu1 %v6888_v59  ;;  %5221 = vmatpush1.bf16.msra.mxu0 %v6934_v23  ;;  %v7030_v59 = vld [vmem:[%s9629_s5 + $0x220] ss:$16 sps:$4 sm:$0xff]   ;;  %v7035_v23 = vld [vmem:[%s9629_s5 + $0x204] ss:$16 sps:$4 sm:$0xff]  }
 0x26b   :  { %5222 = vmatprep.subr.bf16.mxu0 %v6939_v24  ;;  %v7033_v24 = vld [vmem:[%s9629_s5 + $0x200] ss:$16 sps:$4 sm:$0xff]  }
 0x26d   :  { %4382 = vmatpush1.bf16.msra.mxu1 %v6886_v25  ;;  %v7038_v25 = vld [vmem:[%s9629_s5 + $0x3e4] ss:$16 sps:$4 sm:$0xff]  }
 0x26e   :  { %4383 = vmatprep.subr.bf16.mxu1 %v6891_v11  ;;  %5223 = vmatpush1.bf16.msra.mxu0 %v6937_v26  ;;  %v7036_v11 = vld [vmem:[%s9629_s5 + $0x3e0] ss:$16 sps:$4 sm:$0xff]   ;;  %v7041_v26 = vld [vmem:[%s9629_s5 + $0x3c4] ss:$16 sps:$4 sm:$0xff]  }
 0x26f   :  { %5224 = vmatprep.subr.bf16.mxu0 %v6942_v27  ;;  %v7039_v27 = vld [vmem:[%s9629_s5 + $0x3c0] ss:$16 sps:$4 sm:$0xff]  }
 0x271   :  { %4384 = vmatpush1.bf16.msra.mxu1 %v6889_v19  ;;  %v7044_v19 = vld [vmem:[%s9629_s5 + $0x3a4] ss:$16 sps:$4 sm:$0xff]  }
 0x272   :  { %4385 = vmatprep.subr.bf16.mxu1 %v6894_v4  ;;  %5225 = vmatpush2.bf16.msra.mxu0 %v6940_v31  ;;  %v7042_v4 = vld [vmem:[%s9629_s5 + $0x3a0] ss:$16 sps:$4 sm:$0xff]   ;;  %v7047_v31 = vld [vmem:[%s9629_s5 + $0x384] ss:$16 sps:$4 sm:$0xff]  }
 0x273   :  { %5226 = vmatprep.subr.bf16.mxu0 %v6945_v33  ;;  %v7045_v33 = vld [vmem:[%s9629_s5 + $0x380] ss:$16 sps:$4 sm:$0xff]  }
 0x275   :  { %4386 = vmatpush2.bf16.msra.mxu1 %v6892_v35  ;;  %v7050_v35 = vld [vmem:[%s9629_s5 + $0x364] ss:$16 sps:$4 sm:$0xff]  }
 0x276   :  { %4387 = vmatprep.subr.bf16.mxu1 %v6897_v45  ;;  %5227 = vmatpush2.bf16.msra.mxu0 %v6943_v38  ;;  %v7048_v45 = vld [vmem:[%s9629_s5 + $0x360] ss:$16 sps:$4 sm:$0xff]   ;;  %v7053_v38 = vld [vmem:[%s9629_s5 + $0x344] ss:$16 sps:$4 sm:$0xff]  }
 0x277   :  { %5228 = vmatprep.subr.bf16.mxu0 %v6948_v40  ;;  %v7051_v40 = vld [vmem:[%s9629_s5 + $0x340] ss:$16 sps:$4 sm:$0xff]  }
 0x279   :  { %4388 = vmatpush2.bf16.msra.mxu1 %v6895_v28 }
 0x27a   :  { %4389 = vmatprep.subr.bf16.mxu1 %v6900_v41  ;;  %5229 = vmatpush2.bf16.msra.mxu0 %v6946_v57  ;;  %v7056_v57 = vld [vmem:[%s9629_s5 + $0x324] ss:$16 sps:$4 sm:$0xff]  }
 0x27b   :  { %5230 = vmatprep.subr.bf16.mxu0 %v6951_v34 }
 0x27d   :  { %4390 = vmatpush2.bf16.msra.mxu1 %v6898_v29  ;;  %v7054_v29 = vld [vmem:[%s9629_s5 + $0x320] ss:$16 sps:$4 sm:$0xff]  }
 0x27e   :  { %4391 = vmatprep.subr.bf16.mxu1 %v6903_v42  ;;  %5231 = vmatpush2.bf16.msra.mxu0 %v6949_v43 }
 0x27f   :  { %5232 = vmatprep.subr.bf16.mxu0 %v6954_v16 }
 0x281   :  { %4392 = vmatpush2.bf16.msra.mxu1 %v6901_v44 }
 0x282   :  { %4393 = vmatprep.subr.bf16.mxu1 %v6906_v49  ;;  %5233 = vmatpush2.bf16.msra.mxu0 %v6952_v50  ;;  %v7059_v50 = vld [vmem:[%s9629_s5 + $0x304] ss:$16 sps:$4 sm:$0xff]  }
 0x283   :  { %5234 = vmatprep.subr.bf16.mxu0 %v6957_v53 }
 0x285   :  { %4394 = vmatpush2.bf16.msra.mxu1 %v6904_v51 }
 0x286   :  { %4395 = vmatprep.subr.bf16.mxu1 %v6909_v55  ;;  %5235 = vmatpush2.bf16.msra.mxu0 %v6955_v56  ;;  %v7057_v55 = vld [vmem:[%s9629_s5 + $0x300] ss:$16 sps:$4 sm:$0xff]  }
 0x287   :  { %5236 = vmatprep.subr.bf16.mxu0 %v6960_v54 }
 0x289   :  { %4396 = vmatpush2.bf16.msra.mxu1 %v6907_v61 }
 0x28a   :  { %4397 = vmatprep.subr.bf16.mxu1 %v6912_v62  ;;  %5237 = vmatpush2.bf16.msra.mxu0 %v6958_v0  ;;  %v6964_v62 = vld [vmem:[%s9629_s5 + $0xe8] ss:$16 sps:$4 sm:$0xff]   ;;  %v7062_v0 = vld [vmem:[%s9629_s5 + $0x2ec] ss:$16 sps:$4 sm:$0xff]  }
 0x28b   :  { %5238 = vmatprep.subr.bf16.mxu0 %v6963_v1 }
 0x28d   :  { %4398 = vmatpush2.bf16.msra.mxu1 %v6910_v2  ;;  %v6969_v2 = vld [vmem:[%s9629_s5 + $0xcc] ss:$16 sps:$4 sm:$0xff]  }
 0x28e   :  { %4399 = vmatprep.subr.bf16.mxu1 %v6915_v3  ;;  %5239 = vmatpush2.bf16.msra.mxu0 %v6961_v5  ;;  %v6967_v3 = vld [vmem:[%s9629_s5 + $0xc8] ss:$16 sps:$4 sm:$0xff]   ;;  %v6972_v5 = vld [vmem:[%s9629_s5 + $0xac] ss:$16 sps:$4 sm:$0xff]  }
 0x28f   :  { %5290 = vmatprep.subr.bf16.mxu0 %v6966_v6  ;;  %v6970_v6 = vld [vmem:[%s9629_s5 + $0xa8] ss:$16 sps:$4 sm:$0xff]  }
 0x291   :  { %4400 = vmatpush2.bf16.msra.mxu1 %v6913_v36  ;;  %v4198_v7 = vpop.f32.mrf.mxu0  ;;  %v6975_v36 = vld [vmem:[%s9629_s5 + $0x8c] ss:$16 sps:$4 sm:$0xff]  }
 0x292   :  { %v9202_v58 = vadd.f32 %v4198_v7, %v8996_v46  ;;  %5249 = vmatprep.subr.bf16.mxu1 %v7014_v12  ;;  %v7015_v46 = vld [vmem:[%s9629_s5 + $0x2c0] ss:$16 sps:$4 sm:$0xff]   ;;  %v6973_v7 = vld [vmem:[%s9629_s5 + $0x88] ss:$16 sps:$4 sm:$0xff]   ;;  %v6987_v12 = vld [vmem:[%s9629_s5 + $0xc] ss:$16 sps:$4 sm:$0xff]  }
 0x293   :  { %v4200_v63 = vpop.f32.mrf.mxu0 }
 0x294   :  { %4402 = vmatmul.mubr.bf16.vlgmr.msra.gmra.mxu1 %v8807_v32  ;;  %v9206_v39 = vadd.f32 %v4200_v63, %v9001_v52  ;;  %v7017_v32 = vld [vmem:[%s9629_s5 + $0x2c4] ss:$16 sps:$4 sm:$0xff]   ;;  %v6976_v63 = vld [vmem:[%s9629_s5 + $0x68] ss:$16 sps:$4 sm:$0xff]  }
 0x295   :  { %v4202_v9 = vpop.f32.mrf.mxu0  ;;  %5250 = vmatpush1.bf16.msra.mxu1 %v7012_v8  ;;  %v7020_v52 = vld [vmem:[%s9629_s5 + $0x2a4] ss:$16 sps:$4 sm:$0xff]   ;;  %v6982_v8 = vld [vmem:[%s9629_s5 + $0x28] ss:$16 sps:$4 sm:$0xff]  }
 0x296   :  { %5251 = vmatprep.subr.bf16.mxu1 %v7017_v32  ;;  %v6979_v9 = vld [vmem:[%s9629_s5 + $0x48] ss:$16 sps:$4 sm:$0xff]   ;;  %v6990_v32 = vld [vmem:[%s9629_s5 + $0x1ec] ss:$16 sps:$4 sm:$0xff]  }
 0x297   :  { %v4203_v10 = vpop.f32.mrf.mxu0 }
 0x298   :  { %v6984_v10 = vld [vmem:[%s9629_s5 + $0x2c] ss:$16 sps:$4 sm:$0xff]  }
 0x299   :  { %5252 = vmatpush1.bf16.msra.mxu1 %v7015_v46  ;;  %v6985_v46 = vld [vmem:[%s9629_s5 + $0x8] ss:$16 sps:$4 sm:$0xff]  }
 0x29a   :  { %5253 = vmatprep.subr.bf16.mxu1 %v7020_v52  ;;  %v6988_v52 = vld [vmem:[%s9629_s5 + $0x1e8] ss:$16 sps:$4 sm:$0xff]  }
 0x29d   :  { %5254 = vmatpush1.bf16.msra.mxu1 %v7018_v13  ;;  %v6993_v13 = vld [vmem:[%s9629_s5 + $0x1cc] ss:$16 sps:$4 sm:$0xff]  }
 0x29e   :  { %5255 = vmatprep.subr.bf16.mxu1 %v7023_v15  ;;  %v6991_v15 = vld [vmem:[%s9629_s5 + $0x1c8] ss:$16 sps:$4 sm:$0xff]  }
 0x2a1   :  { %5256 = vmatpush1.bf16.msra.mxu1 %v7021_v37  ;;  %v6996_v37 = vld [vmem:[%s9629_s5 + $0x1ac] ss:$16 sps:$4 sm:$0xff]  }
 0x2a2   :  { %5257 = vmatprep.subr.bf16.mxu1 %v7026_v17  ;;  %v6994_v17 = vld [vmem:[%s9629_s5 + $0x1a8] ss:$16 sps:$4 sm:$0xff]  }
 0x2a5   :  { %5258 = vmatpush1.bf16.msra.mxu1 %v7024_v18  ;;  %v6999_v18 = vld [vmem:[%s9629_s5 + $0x18c] ss:$16 sps:$4 sm:$0xff]  }
 0x2a6   :  { %5259 = vmatprep.subr.bf16.mxu1 %v7029_v20  ;;  %v6997_v20 = vld [vmem:[%s9629_s5 + $0x188] ss:$16 sps:$4 sm:$0xff]  }
 0x2a9   :  { %5260 = vmatpush1.bf16.msra.mxu1 %v7027_v21  ;;  %v7002_v21 = vld [vmem:[%s9629_s5 + $0x16c] ss:$16 sps:$4 sm:$0xff]  }
 0x2aa   :  { %5261 = vmatprep.subr.bf16.mxu1 %v7032_v22  ;;  %v7000_v22 = vld [vmem:[%s9629_s5 + $0x168] ss:$16 sps:$4 sm:$0xff]  }
 0x2ad   :  { %5262 = vmatpush1.bf16.msra.mxu1 %v7030_v59  ;;  %v7005_v59 = vld [vmem:[%s9629_s5 + $0x14c] ss:$16 sps:$4 sm:$0xff]  }
 0x2ae   :  { %5263 = vmatprep.subr.bf16.mxu1 %v7035_v23  ;;  %v2793_v23 = vrot.slane %v8960_v14, %v8400_v30 }
 0x2b1   :  { %5264 = vmatpush1.bf16.msra.mxu1 %v7033_v24  ;;  %v7003_v24 = vld [vmem:[%s9629_s5 + $0x148] ss:$16 sps:$4 sm:$0xff]  }
 0x2b2   :  { %5265 = vmatprep.subr.bf16.mxu1 %v7038_v25  ;;  %v7008_v25 = vld [vmem:[%s9629_s5 + $0x12c] ss:$16 sps:$4 sm:$0xff]  }
 0x2b5   :  { %5266 = vmatpush2.bf16.msra.mxu1 %v7036_v11  ;;  %v2797_v11 = vrot.slane %v8960_v14, %v8346_v60 }
 0x2b6   :  { %5267 = vmatprep.subr.bf16.mxu1 %v7041_v26 }
 0x2b9   :  { %5268 = vmatpush2.bf16.msra.mxu1 %v7039_v27 }
 0x2ba   :  { %5269 = vmatprep.subr.bf16.mxu1 %v7044_v19 }
 0x2bd   :  { %5270 = vmatpush2.bf16.msra.mxu1 %v7042_v4  ;;  %v7006_v4 = vld [vmem:[%s9629_s5 + $0x128] ss:$16 sps:$4 sm:$0xff]  }
 0x2be   :  { %5271 = vmatprep.subr.bf16.mxu1 %v7047_v31 }
 0x2c1   :  { %5272 = vmatpush2.bf16.msra.mxu1 %v7045_v33  ;;  %v7011_v33 = vld [vmem:[%s9629_s5 + $0x10c] ss:$16 sps:$4 sm:$0xff]  }
 0x2c2   :  { %5273 = vmatprep.subr.bf16.mxu1 %v7050_v35 }
 0x2c5   :  { %5274 = vmatpush2.bf16.msra.mxu1 %v7048_v45 }
 0x2c6   :  { %5275 = vmatprep.subr.bf16.mxu1 %v7053_v38 }
 0x2c9   :  { %5276 = vmatpush2.bf16.msra.mxu1 %v7051_v40 }
 0x2ca   :  { %5277 = vmatprep.subr.bf16.mxu1 %v7056_v57  ;;  %v7009_v57 = vld [vmem:[%s9629_s5 + $0x108] ss:$16 sps:$4 sm:$0xff]  }
 0x2cd   :  { %5278 = vmatpush2.bf16.msra.mxu1 %v7054_v29 }
 0x2ce   :  { %5279 = vmatprep.subr.bf16.mxu1 %v7059_v50 }
 0x2d1   :  { %v9292_v28 = vpop.f32.mrf.mxu0  ;;  %5280 = vmatpush2.bf16.msra.mxu1 %v7057_v55 }
 0x2d2   :  { %5331 = vmatprep.subr.bf16.mxu1 %v7062_v0  ;;  %v4281_v27 = vadd.f32 %v9292_v28, %v2793_v23  ;;  %v7063_v0 = vld [vmem:[%s9629_s5 + $0x2c8] ss:$16 sps:$4 sm:$0xff]   ;;  %v7089_v23 = vld [vmem:[%s9629_s5 + $0x3cc] ss:$16 sps:$4 sm:$0xff]  }
 0x2d3   :  { %v9294_v41 = vpop.f32.mrf.mxu0 }
 0x2d4   :  { %v4239_v34 = vpop.f32.mrf.mxu1  ;;  %v4283_v35 = vadd.f32 %v9294_v41, %v2797_v11  ;;  %v7090_v11 = vld [vmem:[%s9629_s5 + $0x3a8] ss:$16 sps:$4 sm:$0xff]  }
 0x2d5   :  { %v4240_v42 = vadd.f32 %v4239_v34, %v9202_v58  ;;  %v4284_v43 = vpop.f32.mrf.mxu0  ;;  %v6978_v58 = vld [vmem:[%s9629_s5 + $0x6c] ss:$16 sps:$4 sm:$0xff]  }
 0x2d6   :  { %v4241_v16 = vpop.f32.mrf.mxu1 }
 0x2d7   :  { %v4242_v44 = vadd.f32 %v4241_v16, %v9206_v39  ;;  %v4285_v49 = vpop.f32.mrf.mxu0  ;;  %v4410_v53 = vmax.f32 %v4240_v42, 0.0  ;;  %v6981_v39 = vld [vmem:[%s9629_s5 + $0x4c] ss:$16 sps:$4 sm:$0xff]  }
 0x2d8   :  { %v4243_v51 = vpop.f32.mrf.mxu1 }
 0x2d9   :  { %v4411_v56 = vmax.f32 %v4242_v44, 0.0  ;;  %v9316_v1 = vpack.c.bf16 %v4410_v53, %v4410_v53 }
 0x2da   :  { %v4244_v54 = vpop.f32.mrf.mxu1 }
 0x2db   :  { %v4415_v61 = vpack.c.bf16 %v4411_v56, %v4411_v56  ;;  %v7060_v54 = vld [vmem:[%s9629_s5 + $0x2e8] ss:$16 sps:$4 sm:$0xff]  }
 0x2dd   :  { %5240 = vmatprep.mubr.bf16.mxu0 %v4415_v61 }
 0x2de   :  { %5241 = vmatmul.mubr.bf16.vlgmr.msra.gmra.mxu0 %v9316_v1 }
 0x2df   :  { %5291 = vmatpush1.bf16.msra.mxu0 %v6964_v62  ;;  %5322 = vmatprep.mubr.bf16.mxu0 %v4415_v61  ;;  %v7065_v62 = vld [vmem:[%s9629_s5 + $0x2cc] ss:$16 sps:$4 sm:$0xff]  }
 0x2e0   :  { %5292 = vmatprep.subr.bf16.mxu0 %v6969_v2  ;;  %v7066_v2 = vld [vmem:[%s9629_s5 + $0x2a8] ss:$16 sps:$4 sm:$0xff]  }
 0x2e3   :  { %5293 = vmatpush1.bf16.msra.mxu0 %v6967_v3  ;;  %v7071_v3 = vld [vmem:[%s9629_s5 + $0x28c] ss:$16 sps:$4 sm:$0xff]  }
 0x2e4   :  { %5294 = vmatprep.subr.bf16.mxu0 %v6972_v5  ;;  %v7069_v5 = vld [vmem:[%s9629_s5 + $0x288] ss:$16 sps:$4 sm:$0xff]  }
 0x2e7   :  { %5295 = vmatpush1.bf16.msra.mxu0 %v6970_v6  ;;  %v7108_v6 = vld [vmem:[%s9631_s7 + $0x78] sm:$0xff]  }
 0x2e8   :  { %5296 = vmatprep.subr.bf16.mxu0 %v6975_v36  ;;  %v7074_v36 = vld [vmem:[%s9629_s5 + $0x26c] ss:$16 sps:$4 sm:$0xff]  }
 0x2eb   :  { %5297 = vmatpush1.bf16.msra.mxu0 %v6973_v7  ;;  %v7109_v7 = vld [vmem:[%s9631_s7 + $0x38] sm:$0xff]  }
 0x2ec   :  { %5298 = vmatprep.subr.bf16.mxu0 %v6978_v58  ;;  %v7110_v58 = vld [vmem:[%s9631_s7 + $0x70] sm:$0xff]  }
 0x2ef   :  { %5299 = vmatpush1.bf16.msra.mxu0 %v6976_v63  ;;  %v7111_v63 = vld [vmem:[%s9631_s7 + $0x30] sm:$0xff]  }
 0x2f0   :  { %5300 = vmatprep.subr.bf16.mxu0 %v6981_v39  ;;  %v7112_v39 = vld [vmem:[%s9631_s7 + $0x68] sm:$0xff]  }
 0x2f3   :  { %5301 = vmatpush1.bf16.msra.mxu0 %v6979_v9  ;;  %v7072_v9 = vld [vmem:[%s9629_s5 + $0x268] ss:$16 sps:$4 sm:$0xff]  }
 0x2f4   :  { %5302 = vmatprep.subr.bf16.mxu0 %v6984_v10  ;;  %v7077_v10 = vld [vmem:[%s9629_s5 + $0x24c] ss:$16 sps:$4 sm:$0xff]  }
 0x2f7   :  { %5303 = vmatpush1.bf16.msra.mxu0 %v6982_v8  ;;  %v7113_v8 = vld [vmem:[%s9631_s7 + $0x28] sm:$0xff]  }
 0x2f8   :  { %5304 = vmatprep.subr.bf16.mxu0 %v6987_v12  ;;  %v7075_v12 = vld [vmem:[%s9629_s5 + $0x248] ss:$16 sps:$4 sm:$0xff]  }
 0x2fb   :  { %5305 = vmatpush1.bf16.msra.mxu0 %v6985_v46  ;;  %v7114_v46 = vld [vmem:[%s9631_s7 + $0x60] sm:$0xff]  }
 0x2fc   :  { %5306 = vmatprep.subr.bf16.mxu0 %v6990_v32  ;;  %v7080_v32 = vld [vmem:[%s9629_s5 + $0x22c] ss:$16 sps:$4 sm:$0xff]  }
 0x2ff   :  { %5307 = vmatpush2.bf16.msra.mxu0 %v6988_v52  ;;  %v7115_v52 = vld [vmem:[%s9631_s7 + $0x20] sm:$0xff]  }
 0x300   :  { %5308 = vmatprep.subr.bf16.mxu0 %v6993_v13  ;;  %v7116_v13 = vld [vmem:[%s9631_s7 + $0x58] sm:$0xff]  }
 0x303   :  { %5309 = vmatpush2.bf16.msra.mxu0 %v6991_v15  ;;  %v7078_v15 = vld [vmem:[%s9629_s5 + $0x228] ss:$16 sps:$4 sm:$0xff]  }
 0x304   :  { %5310 = vmatprep.subr.bf16.mxu0 %v6996_v37  ;;  %v7083_v37 = vld [vmem:[%s9629_s5 + $0x20c] ss:$16 sps:$4 sm:$0xff]  }
 0x307   :  { %5311 = vmatpush2.bf16.msra.mxu0 %v6994_v17  ;;  %v7117_v17 = vld [vmem:[%s9631_s7 + $0x18] sm:$0xff]  }
 0x308   :  { %5312 = vmatprep.subr.bf16.mxu0 %v6999_v18  ;;  %v7118_v18 = vld [vmem:[%s9631_s7 + $0x50] sm:$0xff]  }
 0x30b   :  { %5313 = vmatpush2.bf16.msra.mxu0 %v6997_v20  ;;  %v7081_v20 = vld [vmem:[%s9629_s5 + $0x208] ss:$16 sps:$4 sm:$0xff]  }
 0x30c   :  { %5314 = vmatprep.subr.bf16.mxu0 %v7002_v21  ;;  %v7086_v21 = vld [vmem:[%s9629_s5 + $0x3ec] ss:$16 sps:$4 sm:$0xff]  }
 0x30f   :  { %5315 = vmatpush2.bf16.msra.mxu0 %v7000_v22  ;;  %v7119_v22 = vld [vmem:[%s9631_s7 + $0x10] sm:$0xff]  }
 0x310   :  { %5316 = vmatprep.subr.bf16.mxu0 %v7005_v59  ;;  %v7084_v59 = vld [vmem:[%s9629_s5 + $0x3e8] ss:$16 sps:$4 sm:$0xff]  }
 0x311   :  { %v4362_v26 = vpop.f32.mrf.mxu0 }
 0x313   :  { %5317 = vmatpush2.bf16.msra.mxu0 %v7003_v24  ;;  %v4364_v19 = vpop.f32.mrf.mxu0  ;;  %v7087_v24 = vld [vmem:[%s9629_s5 + $0x3c8] ss:$16 sps:$4 sm:$0xff]  }
 0x314   :  { %v4321_v31 = vpop.f32.mrf.mxu1  ;;  %5318 = vmatprep.subr.bf16.mxu0 %v7008_v25  ;;  %v7092_v25 = vld [vmem:[%s9629_s5 + $0x3ac] ss:$16 sps:$4 sm:$0xff]  }
 0x315   :  { %v4322_v45 = vadd.f32 %v4321_v31, %v4281_v27  ;;  %v4366_v38 = vpop.f32.mrf.mxu0  ;;  %v7093_v27 = vld [vmem:[%s9629_s5 + $0x388] ss:$16 sps:$4 sm:$0xff]   ;;  %v7101_v31 = vld [vmem:[%s9629_s5 + $0x34c] ss:$16 sps:$4 sm:$0xff]  }
 0x316   :  { %v4323_v14 = vpop.f32.mrf.mxu1  ;;  %v7107_v38 = vld [vmem:[%s9629_s5 + $0x30c] ss:$16 sps:$4 sm:$0xff]  }
 0x317   :  { %v4324_v40 = vadd.f32 %v4323_v14, %v4283_v35  ;;  %5319 = vmatpush2.bf16.msra.mxu0 %v7006_v4  ;;  %v4367_v28 = vpop.f32.mrf.mxu0  ;;  %v4363_v34 = vadd.f32 %v4362_v26, %v4322_v45  ;;  %v7095_v26 = vld [vmem:[%s9629_s5 + $0x38c] ss:$16 sps:$4 sm:$0xff]   ;;  %v7096_v4 = vld [vmem:[%s9629_s5 + $0x368] ss:$16 sps:$4 sm:$0xff]  }
 0x318   :  { %v4325_v29 = vpop.f32.mrf.mxu1  ;;  %5320 = vmatprep.subr.bf16.mxu0 %v7011_v33  ;;  %v7099_v33 = vld [vmem:[%s9629_s5 + $0x348] ss:$16 sps:$4 sm:$0xff]   ;;  %v7104_v35 = vld [vmem:[%s9629_s5 + $0x32c] ss:$16 sps:$4 sm:$0xff]  }
 0x319   :  { %v4365_v42 = vadd.f32 %v4364_v19, %v4324_v40  ;;  %v7098_v19 = vld [vmem:[%s9629_s5 + $0x36c] ss:$16 sps:$4 sm:$0xff]   ;;  %v7102_v45 = vld [vmem:[%s9629_s5 + $0x328] ss:$16 sps:$4 sm:$0xff]  }
 0x31a   :  { %v4326_v43 = vpop.f32.mrf.mxu1  ;;  %v7105_v14 = vld [vmem:[%s9629_s5 + $0x308] ss:$16 sps:$4 sm:$0xff]  }
 0x31b   :  { %5321 = vmatpush2.bf16.msra.mxu0 %v7009_v57  ;;  %v7120_v28 = vld [vmem:[%s9631_s7 + $0x48] sm:$0xff]  }
 0x31c   :  { %6482 = vmatprep.subr.bf16.mxu0 %v7108_v6  ;;  %v7136_v6 = vld [vmem:[%s9631_s7 + $0xc8] sm:$0xff]  }
 0x31e   :  { %5323 = vmatmul.mubr.bf16.vlgmr.msra.gmra.mxu0 %v9316_v1  ;;  %v7068_v1 = vld [vmem:[%s9629_s5 + $0x2ac] ss:$16 sps:$4 sm:$0xff]  }
 0x31f   :  { %6483 = vmatpush3.bf16.msra.mxu0 %v7109_v7  ;;  %v7137_v7 = vld [vmem:[%s9631_s7 + $0x88] sm:$0xff]  }
 0x320   :  { %6484 = vmatprep.subr.bf16.mxu0 %v7110_v58 }
 0x323   :  { %6485 = vmatpush3.bf16.msra.mxu0 %v7111_v63 }
 0x324   :  { %6486 = vmatprep.subr.bf16.mxu0 %v7112_v39 }
 0x327   :  { %6487 = vmatpush3.bf16.msra.mxu0 %v7113_v8 }
 0x328   :  { %6488 = vmatprep.subr.bf16.mxu0 %v7114_v46 }
 0x32b   :  { %6489 = vmatpush3.bf16.msra.mxu0 %v7115_v52 }
 0x32c   :  { %6490 = vmatprep.subr.bf16.mxu0 %v7116_v13 }
 0x32f   :  { %6491 = vmatpush3.bf16.msra.mxu0 %v7117_v17 }
 0x330   :  { %6492 = vmatprep.subr.bf16.mxu0 %v7118_v18 }
 0x333   :  { %6493 = vmatpush3.bf16.msra.mxu0 %v7119_v22 }
 0x334   :  { %6494 = vmatprep.subr.bf16.mxu0 %v7120_v28 }
 0x354   :  { %v4403_v16 = vpop.f32.mrf.mxu1 }
 0x355   :  { %v4404_v41 = vadd.f32 %v4403_v16, %v4363_v34  ;;  %v7121_v34 = vld [vmem:[%s9631_s7 + $0x8] sm:$0xff]   ;;  %v7123_v16 = vld [vmem:[%s9631_s7] sm:$0xff]  }
 0x356   :  { %v4405_v44 = vpop.f32.mrf.mxu1  ;;  %6495 = vmatpush3.bf16.msra.mxu0 %v7121_v34 }
 0x357   :  { %v4406_v49 = vadd.f32 %v4405_v44, %v4365_v42  ;;  %v4412_v50 = vmax.f32 %v4404_v41, 0.0  ;;  %v7122_v42 = vld [vmem:[%s9631_s7 + $0x40] sm:$0xff]   ;;  %v7124_v41 = vld [vmem:[%s9631_s7 + $0xf8] sm:$0xff]  }
 0x358   :  { %v4407_v53 = vpop.f32.mrf.mxu1  ;;  %6496 = vmatprep.subr.bf16.mxu0 %v7122_v42  ;;  %v7125_v44 = vld [vmem:[%s9631_s7 + $0xb8] sm:$0xff]  }
 0x359   :  { %v4413_v51 = vmax.f32 %v4406_v49, 0.0  ;;  %v9419_v61 = vpack.c.bf16 %v4412_v50, %v4412_v50  ;;  %v7126_v49 = vld [vmem:[%s9631_s7 + $0xf0] sm:$0xff]   ;;  %v7128_v53 = vld [vmem:[%s9631_s7 + $0xe8] sm:$0xff]  }
 0x35a   :  { %v4408_v55 = vpop.f32.mrf.mxu1  ;;  %6497 = vmatpush3.bf16.msra.mxu0 %v7123_v16  ;;  %v7127_v50 = vld [vmem:[%s9631_s7 + $0xb0] sm:$0xff]  }
 0x35b   :  { %v4417_v56 = vpack.c.bf16 %v4413_v51, %v4413_v51  ;;  %v7129_v51 = vld [vmem:[%s9631_s7 + $0xa8] sm:$0xff]   ;;  %v7130_v55 = vld [vmem:[%s9631_s7 + $0xe0] sm:$0xff]  }
 0x35d   :  { %5281 = vmatprep.mubr.bf16.mxu1 %v4417_v56 }
 0x35e   :  { %5282 = vmatmul.mubr.bf16.vlgmr.msra.gmra.mxu1 %v9419_v61 }
 0x35f   :  { %5332 = vmatpush1.bf16.msra.mxu1 %v7060_v54  ;;  %5363 = vmatprep.mubr.bf16.mxu1 %v4417_v56  ;;  %v7131_v56 = vld [vmem:[%s9631_s7 + $0xa0] sm:$0xff]   ;;  %v7132_v54 = vld [vmem:[%s9631_s7 + $0xd8] sm:$0xff]  }
 0x360   :  { %5333 = vmatprep.subr.bf16.mxu1 %v7065_v62  ;;  %v7134_v62 = vld [vmem:[%s9631_s7 + $0xd0] sm:$0xff]  }
 0x363   :  { %5334 = vmatpush1.bf16.msra.mxu1 %v7063_v0  ;;  %v7135_v0 = vld [vmem:[%s9631_s7 + $0x90] sm:$0xff]  }
 0x364   :  { %5335 = vmatprep.subr.bf16.mxu1 %v7068_v1  ;;  %v4546_v1 = vld [vmem:[%s9632_s6] sm:$0xf] }
 0x365   :  { %v4555_v8 = vrot.slane %v4546_v1, %v8209_v48 }
 0x367   :  { %5336 = vmatpush1.bf16.msra.mxu1 %v7066_v2  ;;  %v4559_v2 = vrot.slane %v4546_v1, %v8400_v30  ;;  %v7138_v30 = vld [vmem:[%s9631_s7 + $0xc0] sm:$0xff]  }
 0x368   :  { %5337 = vmatprep.subr.bf16.mxu1 %v7071_v3  ;;  %v4563_v3 = vrot.slane %v4546_v1, %v8346_v60  ;;  %v7139_v60 = vld [vmem:[%s9631_s7 + $0x80] sm:$0xff]  }
 0x36b   :  { %5338 = vmatpush1.bf16.msra.mxu1 %v7069_v5 }
 0x36c   :  { %5339 = vmatprep.subr.bf16.mxu1 %v7074_v36 }
 0x36f   :  { %5340 = vmatpush1.bf16.msra.mxu1 %v7072_v9 }
 0x370   :  { %5341 = vmatprep.subr.bf16.mxu1 %v7077_v10  ;;  %v4551_v10 = vrot.slane %v4546_v1, %v8034_v47 }
 0x373   :  { %5342 = vmatpush1.bf16.msra.mxu1 %v7075_v12 }
 0x374   :  { %5343 = vmatprep.subr.bf16.mxu1 %v7080_v32 }
 0x377   :  { %5344 = vmatpush1.bf16.msra.mxu1 %v7078_v15 }
 0x378   :  { %5345 = vmatprep.subr.bf16.mxu1 %v7083_v37 }
 0x37b   :  { %5346 = vmatpush1.bf16.msra.mxu1 %v7081_v20 }
 0x37c   :  { %5347 = vmatprep.subr.bf16.mxu1 %v7086_v21 }
 0x37f   :  { %5348 = vmatpush2.bf16.msra.mxu1 %v7084_v59 }
 0x380   :  { %5349 = vmatprep.subr.bf16.mxu1 %v7089_v23 }
 0x383   :  { %5350 = vmatpush2.bf16.msra.mxu1 %v7087_v24 }
 0x384   :  { %5351 = vmatprep.subr.bf16.mxu1 %v7092_v25 }
 0x387   :  { %5352 = vmatpush2.bf16.msra.mxu1 %v7090_v11 }
 0x388   :  { %5353 = vmatprep.subr.bf16.mxu1 %v7095_v26 }
 0x38b   :  { %5354 = vmatpush2.bf16.msra.mxu1 %v7093_v27 }
 0x38c   :  { %5355 = vmatprep.subr.bf16.mxu1 %v7098_v19 }
 0x38f   :  { %5356 = vmatpush2.bf16.msra.mxu1 %v7096_v4 }
 0x390   :  { %5357 = vmatprep.subr.bf16.mxu1 %v7101_v31 }
 0x393   :  { %5358 = vmatpush2.bf16.msra.mxu1 %v7099_v33 }
 0x394   :  { %5359 = vmatprep.subr.bf16.mxu1 %v7104_v35 }
 0x397   :  { %5360 = vmatpush2.bf16.msra.mxu1 %v7102_v45 }
 0x398   :  { %5361 = vmatprep.subr.bf16.mxu1 %v7107_v38  ;;  %v6449_v38 = vld [vmem:[%s9633_s8] ss:$0 sm:$0xff] }
 0x39b   :  { %5362 = vmatpush2.bf16.msra.mxu1 %v7105_v14 }
 0x39c   :  { %6504 = vmatprep.subr.bf16.mxu1 %v7124_v41 }
 0x39e   :  { %5364 = vmatmul.mubr.bf16.vlgmr.msra.gmra.mxu1 %v9419_v61  ;;  %v5242_v40 = vpop.f32.mrf.mxu0  ;;  %v7133_v61 = vld [vmem:[%s9631_s7 + $0x98] sm:$0xff]  }
 0x39f   :  { %6505 = vmatpush3.bf16.msra.mxu1 %v7125_v44  ;;  %v5243_v12 = vadd.f32 %v5242_v40, %v4551_v10 }
 0x3a0   :  { %v5244_v57 = vpop.f32.mrf.mxu0  ;;  %6506 = vmatprep.subr.bf16.mxu1 %v7126_v49 }
 0x3a1   :  { %v5245_v32 = vadd.f32 %v5244_v57, %v4555_v8 }
 0x3a2   :  { %v5246_v29 = vpop.f32.mrf.mxu0 }
 0x3a3   :  { %6507 = vmatpush3.bf16.msra.mxu1 %v7127_v50 }
 0x3a4   :  { %v5247_v43 = vpop.f32.mrf.mxu0  ;;  %6508 = vmatprep.subr.bf16.mxu1 %v7128_v53 }
 0x3a7   :  { %6509 = vmatpush3.bf16.msra.mxu1 %v7129_v51 }
 0x3a8   :  { %6510 = vmatprep.subr.bf16.mxu1 %v7130_v55 }
 0x3ab   :  { %6511 = vmatpush3.bf16.msra.mxu1 %v7131_v56 }
 0x3ac   :  { %6512 = vmatprep.subr.bf16.mxu1 %v7132_v54 }
 0x3af   :  { %6513 = vmatpush3.bf16.msra.mxu1 %v7133_v61 }
 0x3b0   :  { %6514 = vmatprep.subr.bf16.mxu1 %v7134_v62 }
 0x3b3   :  { %6515 = vmatpush3.bf16.msra.mxu1 %v7135_v0 }
 0x3b4   :  { %6516 = vmatprep.subr.bf16.mxu1 %v7136_v6 }
 0x3b7   :  { %6517 = vmatpush3.bf16.msra.mxu1 %v7137_v7 }
 0x3b8   :  { %6518 = vmatprep.subr.bf16.mxu1 %v7138_v30 }
 0x3bb   :  { %6519 = vmatpush3.bf16.msra.mxu1 %v7139_v60 }
 0x3de   :  { %v5324_v5 = vpop.f32.mrf.mxu0 }
 0x3df   :  { %v5325_v36 = vadd.f32 %v5324_v5, %v4559_v2 }
 0x3e0   :  { %v5326_v58 = vpop.f32.mrf.mxu0 }
 0x3e1   :  { %v5327_v63 = vadd.f32 %v5326_v58, %v4563_v3 }
 0x3e2   :  { %v5328_v39 = vpop.f32.mrf.mxu0 }
 0x3e4   :  { %v5329_v9 = vpop.f32.mrf.mxu0 }
 0x41e   :  { %v5283_v46 = vpop.f32.mrf.mxu1 }
 0x41f   :  { %v5284_v52 = vadd.f32 %v5283_v46, %v5243_v12 }
 0x420   :  { %v5285_v13 = vpop.f32.mrf.mxu1 }
 0x421   :  { %v5286_v15 = vadd.f32 %v5285_v13, %v5245_v32  ;;  %v5372_v37 = vmax.f32 %v5284_v52, 0.0 }
 0x422   :  { %v5287_v17 = vpop.f32.mrf.mxu1 }
 0x423   :  { %v5373_v18 = vmax.f32 %v5286_v15, 0.0  ;;  %v5376_v22 = vpack.c.bf16 %v5372_v37, %v5372_v37 }
 0x424   :  { %v5288_v20 = vpop.f32.mrf.mxu1 }
 0x425   :  { %v5377_v21 = vpack.c.bf16 %v5373_v18, %v5373_v18 }
 0x427   :  { %5675 = vmatprep.mubr.bf16.mxu0 %v5377_v21 }
 0x428   :  { %5676 = vmatmul.mubr.bf16.vlgmr.msra.gmra.mxu0 %v5376_v22 }
 0x45e   :  { %v5365_v59 = vpop.f32.mrf.mxu1 }
 0x45f   :  { %v5366_v23 = vadd.f32 %v5365_v59, %v5325_v36 }
 0x460   :  { %v5367_v24 = vpop.f32.mrf.mxu1 }
 0x461   :  { %v5368_v47 = vadd.f32 %v5367_v24, %v5327_v63  ;;  %v5374_v25 = vmax.f32 %v5366_v23, 0.0 }
 0x462   :  { %v5369_v48 = vpop.f32.mrf.mxu1 }
 0x463   :  { %v5375_v11 = vmax.f32 %v5368_v47, 0.0  ;;  %v5378_v19 = vpack.c.bf16 %v5374_v25, %v5374_v25 }
 0x464   :  { %v5370_v26 = vpop.f32.mrf.mxu1 }
 0x465   :  { %v5379_v27 = vpack.c.bf16 %v5375_v11, %v5375_v11 }
 0x467   :  { %5715 = vmatprep.mubr.bf16.mxu1 %v5379_v27 }
 0x468   :  { %5716 = vmatmul.mubr.bf16.vlgmr.msra.gmra.mxu1 %v5378_v19 }
 0x4e8   :  { %v6498_v4 = vpop.f32.mrf.mxu0 }
 0x4ea   :  { %v6499_v31 = vpop.f32.mrf.mxu0 }
 0x4eb   :  { %v6500_v45 = vadd.f32 %v6499_v31, %v6498_v4 }
 0x4ec   :  { %v6501_v33 = vpop.f32.mrf.mxu0 }
 0x4ed   :  { %v5678_v28 = vadd.f32 %v6500_v45, %v6449_v38 }
 0x4ee   :  { %v6502_v35 = vpop.f32.mrf.mxu0 }
 0x528   :  { %v6520_v14 = vpop.f32.mrf.mxu1 }
 0x52a   :  { %v6521_v40 = vpop.f32.mrf.mxu1 }
 0x52b   :  { %v6522_v57 = vadd.f32 %v6521_v40, %v6520_v14 }
 0x52c   :  { %v6523_v34 = vpop.f32.mrf.mxu1 }
 0x52d   :  { %v5718_v29 = vadd.f32 %v6522_v57, %v5678_v28 }
 0x52e   :  { %v6524_v42 = vpop.f32.mrf.mxu1 }
 0x52f   :  { %v5724_v43 = vsel %vm5723_vm0, %v5718_v29, -inf }
 0x530   :  { %5725 = vmax.xlane.f32.xlu0 %v5724_v43 }
 0x5b9   :  { %v5726_v16 = vpop.xlane.xlu0 %5725 }
 0x5ba   :  { %v5727_v41 = vsub.f32 %v5718_v29, %v5726_v16 }
 0x5bc   :  { %v5728_v44 = vmul.f32 1.442695, %v5727_v41 }
 0x5be   :  { %7140 = vpow2.f32 %v5728_v44 }
 0x5cb   :  { %v7141_v49 = vpop.eup %7140 }
 0x5cc   :  { %v5730_v50 = vsel %vm5723_vm0, %v7141_v49, 0.0 }
 0x5cd   :  { %5731 = vadd.xlane.f32.xlu0 %v5730_v50 }
 0x656   :  { %v5732_v53 = vpop.xlane.xlu0 %5731 }
 0x657   :  { %7142 = vrcp.f32 %v5732_v53 }
 0x664   :  { %v7143_v51 = vpop.eup %7142 }
 0x665   :  { %v5734_v55 = vmul.f32 %v7143_v51, %v7141_v49 }
 0x667   :  { %5735 = vst.msk [vmem:[%s9634_s9] sm:$0xff] %vm5723_vm0, %v5734_v55 }

</bundles_post_ra>
